<compile_context>
chip_gen: v5e
topology: v5e:2x2
jax: 0.10.0
libtpu: 0.0.40
codegen_flags: <defaults>
</compile_context>

<pallas_src>
from functools import partial

import jax
import jax.numpy as jnp
from jax.experimental import pallas as pl
from jax.experimental.pallas import tpu as pltpu


NC_PAD = 128    # pad classifier output columns to a full lane width


# ----------------------------- Pallas kernel --------------------------------

def member_kernel(pooled_ref, proj_ref, pb_ref,
                  w1_ref, b1_ref, w2_ref, b2_ref, w3_ref, b3_ref,
                  out_ref):
    """One ensemble member per grid step: stand-in backbone (GAP features are
    already pooled; here Linear + ReLU) followed by the exact classifier head.
    Weights for member m+1 are DMA'd by the pipeline while member m computes."""
    # TODO(synk): real torchvision backbones (conv stacks, pretrained weights)
    # have no in-script equivalent; replaced with GAP + linear projection + ReLU.
    pooled = pooled_ref[...]                                          # [Bp, C] bf16
    feats = jnp.dot(pooled, proj_ref[0], preferred_element_type=jnp.float32)
    feats = jnp.maximum(feats + pb_ref[0], 0.0)                       # [Bp, F] f32

    h1 = jnp.dot(feats.astype(jnp.bfloat16), w1_ref[0],
                 preferred_element_type=jnp.float32)
    h1 = jnp.maximum(h1 + b1_ref[0], 0.0)                             # [Bp, 1024]
    # TODO(synk): Dropout(0.25) treated as identity (inference / eval mode).
    h2 = jnp.dot(h1.astype(jnp.bfloat16), w2_ref[0],
                 preferred_element_type=jnp.float32)
    h2 = jnp.maximum(h2 + b2_ref[0], 0.0)                             # [Bp, 512]
    logits = jnp.dot(h2.astype(jnp.bfloat16), w3_ref[0],
                     preferred_element_type=jnp.float32) + b3_ref[0]
    out_ref[0] = logits                                               # [Bp, 128] lane-dense


# ----------------------------- param preparation (one-time) ------------------

def prepare_params(params):
    """One-time layout/dtype prep: bf16 matmul operands, pad classifier columns
    to 128 lanes.  Called once; prepared tensors are reused every forward."""
    NC = params["w3"].shape[-1]
    return {
        "proj": params["proj"].astype(jnp.bfloat16),                  # [M, C, F]
        "pb":   params["pb"],                                         # [M, 1, F]  f32
        "w1":   params["w1"].astype(jnp.bfloat16),                    # [M, F, 1024]
        "b1":   params["b1"],                                         # [M, 1, 1024] f32
        "w2":   params["w2"].astype(jnp.bfloat16),                    # [M, 1024, 512]
        "b2":   params["b2"],                                         # [M, 1, 512] f32
        "w3":   jnp.pad(params["w3"],
                        ((0, 0), (0, 0), (0, NC_PAD - NC))).astype(jnp.bfloat16),
        "b3":   jnp.pad(params["b3"], ((0, 0), (0, 0), (0, NC_PAD - NC))),  # f32
    }


# ----------------------------- forward (jitted) -------------------------------

@partial(jax.jit, static_argnames=("num_classes",))
def custom_model_forward(x_nchw, prepared, num_classes):
    """Reproduces CustomModel.forward: returns a list of per-member outputs."""
    B = x_nchw.shape[0]
    M, C, F = prepared["proj"].shape
    H1 = prepared["w1"].shape[-1]
    H2 = prepared["w2"].shape[-1]
    Bp = max(8, ((B + 7) // 8) * 8)                                   # full sublane rows

    # Global average pool over spatial (trivial XLA reduce), pad batch rows,
    # cast to bf16 for the MXU.  All fused by jit around the pallas_call.
    pooled = jnp.mean(x_nchw, axis=(2, 3))                            # [B, C]
    pooled = jnp.pad(pooled, ((0, Bp - B), (0, 0))).astype(jnp.bfloat16)

    grid_spec = pltpu.PrefetchScalarGridSpec(
        num_scalar_prefetch=0,
        grid=(M,),
        in_specs=[
            pl.BlockSpec((Bp, C),       lambda m: (0, 0)),        # resident across members
            pl.BlockSpec((1, C, F),     lambda m: (m, 0, 0)),
            pl.BlockSpec((1, 1, F),     lambda m: (m, 0, 0)),
            pl.BlockSpec((1, F, H1),    lambda m: (m, 0, 0)),
            pl.BlockSpec((1, 1, H1),    lambda m: (m, 0, 0)),
            pl.BlockSpec((1, H1, H2),   lambda m: (m, 0, 0)),
            pl.BlockSpec((1, 1, H2),    lambda m: (m, 0, 0)),
            pl.BlockSpec((1, H2, NC_PAD), lambda m: (m, 0, 0)),
            pl.BlockSpec((1, 1, NC_PAD),  lambda m: (m, 0, 0)),
        ],
        out_specs=pl.BlockSpec((1, Bp, NC_PAD), lambda m: (m, 0, 0)),
    )

    out = pl.pallas_call(
        member_kernel,
        out_shape=jax.ShapeDtypeStruct((M, Bp, NC_PAD), jnp.float32),
        grid_spec=grid_spec,
        compiler_params=pltpu.CompilerParams(
            dimension_semantics=("parallel",)),      # members shard across TCs on v7x
    )(pooled, prepared["proj"], prepared["pb"],
      prepared["w1"], prepared["b1"],
      prepared["w2"], prepared["b2"],
      prepared["w3"], prepared["b3"])

    logits = out[:, :B, :num_classes]                                 # strip padding
    # list of [B, num_classes], one per ensemble member (matches PyTorch output)
    return [logits[m] for m in range(M)]


# ----------------------------- param init ------------------------------------

def init_params(key, num_models, in_channels, num_ftrs, num_classes):
    def dense(k, fan_in, fan_out):
        scale = 1.0 / jnp.sqrt(jnp.float32(fan_in))
        return jax.random.uniform(k, (num_models, fan_in, fan_out),
                                  jnp.float32, -scale, scale)
    ks = jax.random.split(key, 8)
    return {
        "proj": dense(ks[0], in_channels, num_ftrs),
        "pb":   jnp.zeros((num_models, 1, num_ftrs), jnp.float32),
        "w1":   dense(ks[1], num_ftrs, 1024),
        "b1":   0.01 * jax.random.normal(ks[2], (num_models, 1, 1024), jnp.float32),
        "w2":   dense(ks[3], 1024, 512),
        "b2":   0.01 * jax.random.normal(ks[4], (num_models, 1, 512), jnp.float32),
        "w3":   dense(ks[5], 512, num_classes),
        "b3":   0.01 * jax.random.normal(ks[6], (num_models, 1, num_classes),
                                         jnp.float32),
    }


# ----------------------------- main -------------------------------------------

if __name__ == "__main__":
    base_model_names = ["resnet18", "alexnet", "mobilenet_v2"]   # 3 ensemble members
    num_models = len(base_model_names)
    num_classes = 10
    num_ftrs = 256          # stand-in backbone feature width

    B, C, H, W = 2, 4, 16, 16
    key = jax.random.PRNGKey(0)
    k_x, k_p = jax.random.split(key)
    x = jax.random.normal(k_x, (B, C, H, W), jnp.float32)

    params = init_params(k_p, num_models, C, num_ftrs, num_classes)
    prepared = prepare_params(params)          # one-time weight layout / dtype prep

    outputs = custom_model_forward(x, prepared, num_classes)
    outputs = [jax.block_until_ready(o) for o in outputs]

    assert len(outputs) == num_models
    for o in outputs:
        assert o.shape == (B, num_classes)
        assert o.dtype == jnp.float32

    print("KERNEL_OK")
</pallas_src>

<mosaic_0001>
module attributes {stable_mosaic.version = 11 : i64} {
  func.func @member_kernel(%arg0: i32, %arg1: memref<8x4xbf16, #tpu.memory_space<vmem>>, %arg2: memref<1x4x256xbf16, #tpu.memory_space<vmem>>, %arg3: memref<1x1x256xf32, #tpu.memory_space<vmem>>, %arg4: memref<1x256x1024xbf16, #tpu.memory_space<vmem>>, %arg5: memref<1x1x1024xf32, #tpu.memory_space<vmem>>, %arg6: memref<1x1024x512xbf16, #tpu.memory_space<vmem>>, %arg7: memref<1x1x512xf32, #tpu.memory_space<vmem>>, %arg8: memref<1x512x128xbf16, #tpu.memory_space<vmem>>, %arg9: memref<1x1x128xf32, #tpu.memory_space<vmem>>, %arg10: memref<1x8x128xf32, #tpu.memory_space<vmem>>) attributes {dimension_semantics = [#tpu.dimension_semantics<parallel>], iteration_bounds = array<i64: 3>, scalar_prefetch = 0 : i64, scratch_operands = 0 : i64, tpu.core_type = #tpu.core_type<tc>, window_params = [{pipeline_mode = #tpu.pipeline_mode<synchronous>, transform_indices = @transform_0, window_bounds = array<i64: 8, 4>}, {transform_indices = @transform_1, window_bounds = array<i64: 1, 4, 256>}, {transform_indices = @transform_2, window_bounds = array<i64: 1, 1, 256>}, {transform_indices = @transform_3, window_bounds = array<i64: 1, 256, 1024>}, {transform_indices = @transform_4, window_bounds = array<i64: 1, 1, 1024>}, {transform_indices = @transform_5, window_bounds = array<i64: 1, 1024, 512>}, {transform_indices = @transform_6, window_bounds = array<i64: 1, 1, 512>}, {transform_indices = @transform_7, window_bounds = array<i64: 1, 512, 128>}, {transform_indices = @transform_8, window_bounds = array<i64: 1, 1, 128>}, {transform_indices = @transform_9, window_bounds = array<i64: 1, 8, 128>}]} {
    %c0 = arith.constant 0 : index
    %c0_0 = arith.constant 0 : index
    %0 = vector.load %arg1[%c0, %c0_0] : memref<8x4xbf16, #tpu.memory_space<vmem>>, vector<8x4xbf16>
    %c0_1 = arith.constant 0 : index
    %c0_2 = arith.constant 0 : index
    %c0_3 = arith.constant 0 : index
    %1 = vector.load %arg2[%c0_1, %c0_2, %c0_3] : memref<1x4x256xbf16, #tpu.memory_space<vmem>>, vector<1x4x256xbf16>
    %2 = vector.shape_cast %1 : vector<1x4x256xbf16> to vector<4x256xbf16>
    %cst = arith.constant dense<0.000000e+00> : vector<8x256xf32>
    %3 = tpu.matmul %0, %2, %cst {dimension_numbers = #tpu.dot_dimension_numbers<[1], [0], [0], [1], [0, 0, 1, 1], [], []>} : vector<8x4xbf16>, vector<4x256xbf16>, vector<8x256xf32> -> vector<8x256xf32>
    %c0_4 = arith.constant 0 : index
    %c0_5 = arith.constant 0 : index
    %c0_6 = arith.constant 0 : index
    %4 = vector.load %arg3[%c0_4, %c0_5, %c0_6] : memref<1x1x256xf32, #tpu.memory_space<vmem>>, vector<1x1x256xf32>
    %5 = vector.shape_cast %4 : vector<1x1x256xf32> to vector<1x256xf32>
    %6 = vector.broadcast %5 : vector<1x256xf32> to vector<8x256xf32>
    %7 = arith.addf %3, %6 : vector<8x256xf32>
    %cst_7 = arith.constant 0.000000e+00 : f32
    %8 = vector.broadcast %cst_7 : f32 to vector<8x256xf32>
    %9 = arith.maximumf %7, %8 : vector<8x256xf32>
    %10 = arith.truncf %9 : vector<8x256xf32> to vector<8x256xbf16>
    %c0_8 = arith.constant 0 : index
    %c0_9 = arith.constant 0 : index
    %c0_10 = arith.constant 0 : index
    %11 = vector.load %arg4[%c0_8, %c0_9, %c0_10] : memref<1x256x1024xbf16, #tpu.memory_space<vmem>>, vector<1x256x1024xbf16>
    %12 = vector.shape_cast %11 : vector<1x256x1024xbf16> to vector<256x1024xbf16>
    %cst_11 = arith.constant dense<0.000000e+00> : vector<8x1024xf32>
    %13 = tpu.matmul %10, %12, %cst_11 {dimension_numbers = #tpu.dot_dimension_numbers<[1], [0], [0], [1], [0, 0, 1, 1], [], []>} : vector<8x256xbf16>, vector<256x1024xbf16>, vector<8x1024xf32> -> vector<8x1024xf32>
    %c0_12 = arith.constant 0 : index
    %c0_13 = arith.constant 0 : index
    %c0_14 = arith.constant 0 : index
    %14 = vector.load %arg5[%c0_12, %c0_13, %c0_14] : memref<1x1x1024xf32, #tpu.memory_space<vmem>>, vector<1x1x1024xf32>
    %15 = vector.shape_cast %14 : vector<1x1x1024xf32> to vector<1x1024xf32>
    %16 = vector.broadcast %15 : vector<1x1024xf32> to vector<8x1024xf32>
    %17 = arith.addf %13, %16 : vector<8x1024xf32>
    %cst_15 = arith.constant 0.000000e+00 : f32
    %18 = vector.broadcast %cst_15 : f32 to vector<8x1024xf32>
    %19 = arith.maximumf %17, %18 : vector<8x1024xf32>
    %20 = arith.truncf %19 : vector<8x1024xf32> to vector<8x1024xbf16>
    %c0_16 = arith.constant 0 : index
    %c0_17 = arith.constant 0 : index
    %c0_18 = arith.constant 0 : index
    %21 = vector.load %arg6[%c0_16, %c0_17, %c0_18] : memref<1x1024x512xbf16, #tpu.memory_space<vmem>>, vector<1x1024x512xbf16>
    %22 = vector.shape_cast %21 : vector<1x1024x512xbf16> to vector<1024x512xbf16>
    %cst_19 = arith.constant dense<0.000000e+00> : vector<8x512xf32>
    %23 = tpu.matmul %20, %22, %cst_19 {dimension_numbers = #tpu.dot_dimension_numbers<[1], [0], [0], [1], [0, 0, 1, 1], [], []>} : vector<8x1024xbf16>, vector<1024x512xbf16>, vector<8x512xf32> -> vector<8x512xf32>
    %c0_20 = arith.constant 0 : index
    %c0_21 = arith.constant 0 : index
    %c0_22 = arith.constant 0 : index
    %24 = vector.load %arg7[%c0_20, %c0_21, %c0_22] : memref<1x1x512xf32, #tpu.memory_space<vmem>>, vector<1x1x512xf32>
    %25 = vector.shape_cast %24 : vector<1x1x512xf32> to vector<1x512xf32>
    %26 = vector.broadcast %25 : vector<1x512xf32> to vector<8x512xf32>
    %27 = arith.addf %23, %26 : vector<8x512xf32>
    %cst_23 = arith.constant 0.000000e+00 : f32
    %28 = vector.broadcast %cst_23 : f32 to vector<8x512xf32>
    %29 = arith.maximumf %27, %28 : vector<8x512xf32>
    %30 = arith.truncf %29 : vector<8x512xf32> to vector<8x512xbf16>
    %c0_24 = arith.constant 0 : index
    %c0_25 = arith.constant 0 : index
    %c0_26 = arith.constant 0 : index
    %31 = vector.load %arg8[%c0_24, %c0_25, %c0_26] : memref<1x512x128xbf16, #tpu.memory_space<vmem>>, vector<1x512x128xbf16>
    %32 = vector.shape_cast %31 : vector<1x512x128xbf16> to vector<512x128xbf16>
    %cst_27 = arith.constant dense<0.000000e+00> : vector<8x128xf32>
    %33 = tpu.matmul %30, %32, %cst_27 {dimension_numbers = #tpu.dot_dimension_numbers<[1], [0], [0], [1], [0, 0, 1, 1], [], []>} : vector<8x512xbf16>, vector<512x128xbf16>, vector<8x128xf32> -> vector<8x128xf32>
    %c0_28 = arith.constant 0 : index
    %c0_29 = arith.constant 0 : index
    %c0_30 = arith.constant 0 : index
    %34 = vector.load %arg9[%c0_28, %c0_29, %c0_30] : memref<1x1x128xf32, #tpu.memory_space<vmem>>, vector<1x1x128xf32>
    %35 = vector.shape_cast %34 : vector<1x1x128xf32> to vector<1x128xf32>
    %36 = vector.broadcast %35 : vector<1x128xf32> to vector<8x128xf32>
    %37 = arith.addf %33, %36 : vector<8x128xf32>
    %c0_31 = arith.constant 0 : index
    %c0_32 = arith.constant 0 : index
    %c0_33 = arith.constant 0 : index
    %38 = vector.load %arg10[%c0_31, %c0_32, %c0_33] : memref<1x8x128xf32, #tpu.memory_space<vmem>>, vector<1x8x128xf32>
    %39 = vector.shape_cast %38 : vector<1x8x128xf32> to vector<8x128xf32>
    %40 = vector.shape_cast %37 : vector<8x128xf32> to vector<1x8x128xf32>
    tpu.vector_store %arg10[%c0_31, %c0_32, %c0_33], %40 {strides = array<i32>} : memref<1x8x128xf32, #tpu.memory_space<vmem>>, vector<1x8x128xf32>,
    return
  }
  func.func @transform_0(%arg0: i32) -> (i32, i32) {
    %c0_i32 = arith.constant 0 : i32
    %c0_i32_0 = arith.constant 0 : i32
    %c0_i32_1 = arith.constant 0 : i32
    return %c0_i32, %c0_i32_0 : i32, i32
  }
  func.func @transform_1(%arg0: i32) -> (i32, i32, i32) {
    %c0_i32 = arith.constant 0 : i32
    %c0_i32_0 = arith.constant 0 : i32
    %c0_i32_1 = arith.constant 0 : i32
    return %arg0, %c0_i32, %c0_i32_0 : i32, i32, i32
  }
  func.func @transform_2(%arg0: i32) -> (i32, i32, i32) {
    %c0_i32 = arith.constant 0 : i32
    %c0_i32_0 = arith.constant 0 : i32
    %c0_i32_1 = arith.constant 0 : i32
    return %arg0, %c0_i32, %c0_i32_0 : i32, i32, i32
  }
  func.func @transform_3(%arg0: i32) -> (i32, i32, i32) {
    %c0_i32 = arith.constant 0 : i32
    %c0_i32_0 = arith.constant 0 : i32
    %c0_i32_1 = arith.constant 0 : i32
    return %arg0, %c0_i32, %c0_i32_0 : i32, i32, i32
  }
  func.func @transform_4(%arg0: i32) -> (i32, i32, i32) {
    %c0_i32 = arith.constant 0 : i32
    %c0_i32_0 = arith.constant 0 : i32
    %c0_i32_1 = arith.constant 0 : i32
    return %arg0, %c0_i32, %c0_i32_0 : i32, i32, i32
  }
  func.func @transform_5(%arg0: i32) -> (i32, i32, i32) {
    %c0_i32 = arith.constant 0 : i32
    %c0_i32_0 = arith.constant 0 : i32
    %c0_i32_1 = arith.constant 0 : i32
    return %arg0, %c0_i32, %c0_i32_0 : i32, i32, i32
  }
  func.func @transform_6(%arg0: i32) -> (i32, i32, i32) {
    %c0_i32 = arith.constant 0 : i32
    %c0_i32_0 = arith.constant 0 : i32
    %c0_i32_1 = arith.constant 0 : i32
    return %arg0, %c0_i32, %c0_i32_0 : i32, i32, i32
  }
  func.func @transform_7(%arg0: i32) -> (i32, i32, i32) {
    %c0_i32 = arith.constant 0 : i32
    %c0_i32_0 = arith.constant 0 : i32
    %c0_i32_1 = arith.constant 0 : i32
    return %arg0, %c0_i32, %c0_i32_0 : i32, i32, i32
  }
  func.func @transform_8(%arg0: i32) -> (i32, i32, i32) {
    %c0_i32 = arith.constant 0 : i32
    %c0_i32_0 = arith.constant 0 : i32
    %c0_i32_1 = arith.constant 0 : i32
    return %arg0, %c0_i32, %c0_i32_0 : i32, i32, i32
  }
  func.func @transform_9(%arg0: i32) -> (i32, i32, i32) {
    %c0_i32 = arith.constant 0 : i32
    %c0_i32_0 = arith.constant 0 : i32
    %c0_i32_1 = arith.constant 0 : i32
    return %arg0, %c0_i32, %c0_i32_0 : i32, i32, i32
  }
}

</mosaic_0001>

<bundles_post_ra>
// kernel: custom_model_forward.1
= control target key start
LH: loop header
LB: loop body
LE: loop exit
PB: predicated region body
PF: predicated region fallthrough
CT: control target
= control target key end

     0   :  { %s7917_s0 = inlined_call_operand.vmem [shape: bf16[8,4], index: 0, kind: input, shape index: {}]   ;;  %s7918_s1 = inlined_call_operand.hbm [shape: bf16[3,4,256], index: 1, kind: input, shape index: {}]   ;;  %s7919_s2 = inlined_call_operand.hbm [shape: f32[3,1,256], index: 2, kind: input, shape index: {}]   ;;  %s7920_s3 = inlined_call_operand.hbm [shape: bf16[3,256,1024], index: 3, kind: input, shape index: {}]   ;;  %s7921_s4 = inlined_call_operand.hbm [shape: f32[3,1,1024], index: 4, kind: input, shape index: {}]   ;;  %s7922_s5 = inlined_call_operand.hbm [shape: bf16[3,1024,512], index: 5, kind: input, shape index: {}]   ;;  %s7923_s6 = inlined_call_operand.hbm [shape: f32[3,1,512], index: 6, kind: input, shape index: {}]   ;;  %s7924_s7 = inlined_call_operand.hbm [shape: bf16[3,512,128], index: 7, kind: input, shape index: {}]   ;;  %s7925_s8 = inlined_call_operand.hbm [shape: f32[3,1,128], index: 8, kind: input, shape index: {}]   ;;  %s7926_s9 = inlined_call_operand.vmem [shape: f32[3,8,128], index: 9, kind: output, shape index: {}]  }
   0x1   :  { %7933 = sst [smem:[#allocation23_spill]] %s7917_s0 }
   0x2   :  { %7934 = sst [smem:[#allocation24_spill]] %s7919_s2 }
   0x3   :  { %7935 = sst [smem:[#allocation25_spill]] %s7921_s4 }
   0x4   :  { %7936 = sst [smem:[#allocation26_spill]] %s7926_s9 }
   0x5   :  { %14 = vsyncpa [#allocation3], 0 }
   0x6   :  { %16 = vsyncpa [#allocation3 + $0x1], 0 }
   0x7   :  { %17 = vsyncpa [#allocation5], 0 }
   0x8   :  { %19 = vsyncpa [#allocation5 + $0x1], 0 }
   0x9   :  { %20 = vsyncpa [#allocation8], 0 }
   0xa   :  { %22 = vsyncpa [#allocation8 + $0x1], 0 }
   0xb   :  { %23 = vsyncpa [#allocation11], 0 }
   0xc   :  { %25 = vsyncpa [#allocation11 + $0x1], 0 }
   0xd   :  { %26 = vsyncpa [#allocation14], 0 }
   0xe   :  { %28 = vsyncpa [#allocation14 + $0x1], 0  ;;  %s6725_s30 = smov 0   ;;  %s6727_s10 = smov 0  }
   0xf   :  { %s6729_s11 = smov 0   ;;  %s6731_s12 = smov 0  }
  0x10 LB: > { %7937 = sst [smem:[#allocation20_spill]] %s6663_s11  ;;  %s6744_s13 = sadd.s32 4294967295, %s6667_s12   ;;  %s6667_s12 = sphi %s6731_s12, %s7951_s12   ;;  %s6663_s11 = sphi %s6729_s11, %s7953_s11   ;;  %s6659_s10 = sphi %s6727_s10, %s7955_s10   ;;  %s6655_s30 = sphi %s6725_s30, %s7954_s30  }
  0x11   : > { %s6747_s14 = sadd.s32 1, %s6667_s12   ;;  %s62_s16 = sadd.s32 1, %s6663_s11 }
  0x12   : > { %7938 = sst [smem:[#allocation21_spill]] %s6747_s14  ;;  %s59_s15 = ssub.s32 %s6667_s12, %s6747_s14 }
  0x13   : > { %p60_p0 = scmp.eq.s32.totalorder %s59_s15, 0  ;;  %p69_p1 = scmp.ne.s32.totalorder %s6663_s11, %s6659_s10 }
  0x14   : > { %p70_p2 = scmp.eq.s32.totalorder %s6667_s12, 0  ;;  %p75_p3 = scmp.ne.s32.totalorder %s6659_s10, %s6655_s30 }
  0x15   : > { %s6757_s17 = scalar_select %p60_p0, %s6663_s11, %s62_s16  }
  0x16   : > { %p71_p4 = por %p70_p2, %p69_p1  ;;  %p76_p5 = scmp.eq.s32.totalorder %s6744_s13, 0 }
  0x17   : > { %7939 = sst [smem:[#allocation22_spill]] %s6757_s17  ;;  %p6337_p6 = scmp.lt.s32.totalorder %s6667_s12, 3 }
  0x18   : > { %p6761_p7 = por %p76_p5, %p75_p3  ;;  %s6766_s19 = sand.u32 1, %s6663_s11  }
  0x19   : > { %p6768_p8 = pnand %p6337_p6, %p71_p4  ;;  %s6773_s21 = sand.u32 1, %s6667_s12  }
  0x1a   : > { %s4184_s22 = sshll.u32 %s6766_s19, 1  ;;  %s4185_s23 = sshll.u32 %s6667_s12, 1 }
  0x1b   : > { %s334_s24 = scalar_lea.vmem [#allocation4], %s4184_s22  ;;  %s7942_s2 = sld [smem:[#allocation24_spill]] }
  0x1c   : > { %s342_s25 = sshll.u32 %s334_s24, 4  ;;  %p4199_p9 = scmp.ge.s32.totalorder %s6667_s12, 1  ;;  %s343_s25 = int_to_ptr.vmem [resolvable:$true] %s342_s25 }
  0x1d   : > { %p468_p10 = scmp.lt.s32.totalorder %s6667_s12, 4  ;;  %s7930_s30 = scalar_lea.sflag [#allocation5], %s6773_s21 }
  0x1e   : > { %p6785_p12 = pneg %p6768_p8 }
  0x21   : > { %s338_s28 = scalar_lea.hbm %s7942_s2, %s4185_s23  ;;  %s6384_s24 = scalar_lea.hbm %s7942_s2, 6 }
  0x22   : > { %s340_s29 = sshll.u32 %s338_s28, 4  ;;  %s341_s29 = int_to_ptr.hbm [resolvable:$true] %s340_s29 }
  0x23   : > { %s6377_s15 = sshra.s32 %s341_s29, 4  ;;  %s6378_s15 = int_to_ptr.hbm [resolvable:$true] %s6377_s15 }
  0x24   : > { %s6379_s16 = scalar_lea.hbm %s6378_s15, 2  ;;  %p6385_p1 = scmp.lt.s32.totalorder %s6378_s15, %s7942_s2 }
  0x25   : > { %p6380_p11 = scmp.ne.s32.totalorder %s6378_s15, %s6379_s16  ;;  %p6386_p2 = scmp.lt.s32.totalorder %s6384_s24, %s6379_s16 }
  0x27   : > { %p6382_p13 = pnand %p6785_p12, %p6380_p11  ;;  %p6387_p3 = por %p6386_p2, %p6385_p1 }
  0x29   : > { %p6383_p0 = pneg %p6382_p13 }
  0x2b   : > { %p6388_p4 = pnand %p6387_p3, %p6383_p0 }
  0x2d   : > { %6391 = shalt.err (!%p6388_p4)
}
  0x2e   : > { %6318 = dma.hbm_to_vmem [thread:$0]  (!%p6768_p8), %s341_s29, 32, %s343_s25, %s7930_s30  }
  0x2f   : > { %p6805_p5 = pnand %p4199_p9, %p468_p10  ;;  %s4189_s15 = sshll.u32 %s6766_s19, 3 }
  0x30   : > { %s4190_s16 = sshll.u32 %s6667_s12, 3  ;;  %s7945_s4 = sld [smem:[#allocation25_spill]] }
  0x31   : > { %s375_s27 = scalar_lea.vmem [#allocation7], %s4189_s15  ;;  %s7931_s11 = scalar_lea.sflag [#allocation8], %s6773_s21 }
  0x32   : > { %s383_s2 = sshll.u32 %s375_s27, 4  ;;  %s384_s2 = int_to_ptr.vmem [resolvable:$true] %s383_s2 }
  0x36   : > { %s379_s24 = scalar_lea.hbm %s7945_s4, %s4190_s16  ;;  %s6414_s9 = scalar_lea.hbm %s7945_s4, 24 }
  0x37   : > { %s381_s26 = sshll.u32 %s379_s24, 4  ;;  %s382_s26 = int_to_ptr.hbm [resolvable:$true] %s381_s26 }
  0x38   : > { %s6407_s14 = sshra.s32 %s382_s26, 4  ;;  %s6408_s14 = int_to_ptr.hbm [resolvable:$true] %s6407_s14 }
  0x39   : > { %s6409_s25 = scalar_lea.hbm %s6408_s14, 8  ;;  %p6415_p11 = scmp.lt.s32.totalorder %s6408_s14, %s7945_s4 }
  0x3a   : > { %p6410_p6 = scmp.ne.s32.totalorder %s6408_s14, %s6409_s25  ;;  %p6416_p13 = scmp.lt.s32.totalorder %s6414_s9, %s6409_s25 }
  0x3c   : > { %p6412_p9 = pnand %p6410_p6, %p6785_p12  ;;  %p6417_p0 = por %p6416_p13, %p6415_p11 }
  0x3e   : > { %p6413_p10 = pneg %p6412_p9 }
  0x40   : > { %p6418_p1 = pnand %p6417_p0, %p6413_p10 }
  0x42   : > { %6421 = shalt.err (!%p6418_p1)
}
  0x43   : > { %6324 = dma.hbm_to_vmem [thread:$0]  (!%p6768_p8), %s382_s26, 128, %s384_s2, %s7931_s11  }
  0x44   : > { %s4181_s15 = sshll.u32 %s6766_s19, 2  ;;  %s5876_s30 = sshll.u32 %s6667_s12, 2 }
  0x45   : > { %s420_s0 = scalar_lea.hbm %s7923_s6, %s5876_s30  ;;  %s416_s14 = scalar_lea.vmem [#allocation10], %s4181_s15 }
  0x46   : > { %s424_s9 = sshll.u32 %s416_s14, 4  ;;  %s422_s24 = sshll.u32 %s420_s0, 4  ;;  %s425_s9 = int_to_ptr.vmem [resolvable:$true] %s424_s9  ;;  %s423_s24 = int_to_ptr.hbm [resolvable:$true] %s422_s24 }
  0x47   : > { %s7932_s27 = scalar_lea.sflag [#allocation11], %s6773_s21  ;;  %s6437_s25 = sshra.s32 %s423_s24, 4  ;;  %s6438_s25 = int_to_ptr.hbm [resolvable:$true] %s6437_s25 }
  0x48   : > { %s6439_s29 = scalar_lea.hbm %s6438_s25, 4  ;;  %s6444_s22 = scalar_lea.hbm %s7923_s6, 12 }
  0x49   : > { %p6440_p2 = scmp.ne.s32.totalorder %s6438_s25, %s6439_s29  ;;  %p6445_p6 = scmp.lt.s32.totalorder %s6438_s25, %s7923_s6 }
  0x4a   : > { %p6446_p9 = scmp.lt.s32.totalorder %s6444_s22, %s6439_s29 }
  0x4b   : > { %p6442_p3 = pnand %p6440_p2, %p6785_p12 }
  0x4c   : > { %p6447_p10 = por %p6446_p9, %p6445_p6 }
  0x4d   : > { %p6443_p4 = pneg %p6442_p3 }
  0x4f   : > { %p6448_p11 = pnand %p6447_p10, %p6443_p4 }
  0x51   : > { %6451 = shalt.err (!%p6448_p11)
}
  0x52   : > { %6330 = dma.hbm_to_vmem [thread:$0]  (!%p6768_p8), %s423_s24, 64, %s425_s9, %s7932_s27  }
  0x53   : > { %s319_s14 = scalar_lea.hbm %s7918_s1, %s5876_s30  ;;  %s314_s26 = scalar_lea.vmem [#allocation2], %s4181_s15 }
  0x54   : > { %s321_s2 = sshll.u32 %s319_s14, 4  ;;  %s323_s4 = sshll.u32 %s314_s26, 4  ;;  %s322_s2 = int_to_ptr.hbm [resolvable:$true] %s321_s2  ;;  %s324_s4 = int_to_ptr.vmem [resolvable:$true] %s323_s4 }
  0x55   : > { %s311_s11 = scalar_lea.sflag [#allocation3], %s6766_s19  ;;  %s6467_s25 = sshra.s32 %s322_s2, 4  ;;  %s6468_s25 = int_to_ptr.hbm [resolvable:$true] %s6467_s25 }
  0x56   : > { %s6469_s29 = scalar_lea.hbm %s6468_s25, 4  ;;  %s6474_s9 = scalar_lea.hbm %s7918_s1, 12 }
  0x57   : > { %p6470_p13 = scmp.ne.s32.totalorder %s6468_s25, %s6469_s29  ;;  %p6475_p2 = scmp.lt.s32.totalorder %s6468_s25, %s7918_s1 }
  0x58   : > { %p6476_p3 = scmp.lt.s32.totalorder %s6474_s9, %s6469_s29 }
  0x59   : > { %p6472_p0 = pnand %p6470_p13, %p6785_p12 }
  0x5a   : > { %p6477_p4 = por %p6476_p3, %p6475_p2 }
  0x5b   : > { %p6473_p1 = pneg %p6472_p0 }
  0x5d   : > { %p6478_p6 = pnand %p6477_p4, %p6473_p1 }
  0x5f   : > { %6481 = shalt.err (!%p6478_p6)
}
  0x60   : > { %6315 = dma.hbm_to_vmem [thread:$0]  (!%p6768_p8), %s322_s2, 64, %s324_s4, %s311_s11  }
  0x61   : > { %s4186_s15 = sshll.u32 %s6766_s19, 10  ;;  %s5877_s30 = sshll.u32 %s6667_s12, 10 }
  0x62   : > { %s358_s26 = scalar_lea.hbm %s7920_s3, %s5877_s30  ;;  %s353_s16 = scalar_lea.vmem [#allocation6], %s4186_s15 }
  0x63   : > { %s359_s22 = sshll.u32 %s358_s26, 4  ;;  %s361_s24 = sshll.u32 %s353_s16, 4  ;;  %s360_s22 = int_to_ptr.hbm [resolvable:$true] %s359_s22  ;;  %s362_s24 = int_to_ptr.vmem [resolvable:$true] %s361_s24 }
  0x64   : > { %s6497_s25 = sshra.s32 %s360_s22, 4  ;;  %s6504_s2 = scalar_lea.hbm %s7920_s3, 3072  ;;  %s6498_s25 = int_to_ptr.hbm [resolvable:$true] %s6497_s25 }
  0x65   : > { %s6499_s29 = scalar_lea.hbm %s6498_s25, 1024  ;;  %p6505_p13 = scmp.lt.s32.totalorder %s6498_s25, %s7920_s3 }
  0x66   : > { %p6500_p9 = scmp.ne.s32.totalorder %s6498_s25, %s6499_s29  ;;  %p6506_p0 = scmp.lt.s32.totalorder %s6504_s2, %s6499_s29 }
  0x68   : > { %p6502_p10 = pnand %p6500_p9, %p6785_p12  ;;  %p6507_p1 = por %p6506_p0, %p6505_p13 }
  0x6a   : > { %p6503_p11 = pneg %p6502_p10 }
  0x6c   : > { %p6508_p2 = pnand %p6507_p1, %p6503_p11 }
  0x6e   : > { %6511 = shalt.err (!%p6508_p2)
}
  0x6f   : > { %s6669_s15 = smov 512   ;;  %s6670_s30 = smov 32  }
  0x70   : > { %s7946_s0 = scalar_lea.sflag [#allocation5], %s6773_s21  ;;  %s4191_s14 = sshll.u32 %s6766_s19, 11 }
  0x71   : > { %6321 = dma.hbm_to_vmem [thread:$0]  (!%p6768_p8), %s360_s22, 16384, %s362_s24, %s7946_s0, %s6669_s15, %s6669_s15, %s6670_s30  }
  0x72   : > { %s5878_s26 = sshll.u32 %s6667_s12, 11  ;;  %s394_s4 = scalar_lea.vmem [#allocation9], %s4191_s14 }
  0x73   : > { %s399_s25 = scalar_lea.hbm %s7922_s5, %s5878_s26  ;;  %s402_s2 = sshll.u32 %s394_s4, 4  ;;  %s403_s2 = int_to_ptr.vmem [resolvable:$true] %s402_s2 }
  0x74   : > { %s400_s29 = sshll.u32 %s399_s25, 4  ;;  %s6534_s24 = scalar_lea.hbm %s7922_s5, 6144  ;;  %s401_s29 = int_to_ptr.hbm [resolvable:$true] %s400_s29 }
  0x75   : > { %s6527_s11 = sshra.s32 %s401_s29, 4  ;;  %s6528_s11 = int_to_ptr.hbm [resolvable:$true] %s6527_s11 }
  0x76   : > { %s6529_s23 = scalar_lea.hbm %s6528_s11, 2048  ;;  %p6535_p9 = scmp.lt.s32.totalorder %s6528_s11, %s7922_s5 }
  0x77   : > { %p6530_p3 = scmp.ne.s32.totalorder %s6528_s11, %s6529_s23  ;;  %p6536_p10 = scmp.lt.s32.totalorder %s6534_s24, %s6529_s23 }
  0x79   : > { %p6532_p4 = pnand %p6530_p3, %p6785_p12  ;;  %p6537_p11 = por %p6536_p10, %p6535_p9 }
  0x7b   : > { %p6533_p6 = pneg %p6532_p4 }
  0x7d   : > { %p6538_p13 = pnand %p6537_p11, %p6533_p6 }
  0x7f   : > { %6541 = shalt.err (!%p6538_p13)
}
  0x80   : > { %s6671_s0 = smov 256   ;;  %s6672_s14 = smov 16  }
  0x81   : > { %s7947_s26 = scalar_lea.sflag [#allocation8], %s6773_s21  ;;  %s4196_s27 = sshll.u32 %s6766_s19, 8 }
  0x82   : > { %6327 = dma.hbm_to_vmem [thread:$0]  (!%p6768_p8), %s401_s29, 32768, %s403_s2, %s7947_s26, %s6671_s0, %s6671_s0, %s6672_s14  }
  0x83   : > { %s5879_s16 = sshll.u32 %s6667_s12, 8  ;;  %s435_s23 = scalar_lea.vmem [#allocation12], %s4196_s27 }
  0x84   : > { %s440_s4 = scalar_lea.hbm %s7924_s7, %s5879_s16  ;;  %s443_s22 = sshll.u32 %s435_s23, 4  ;;  %s444_s22 = int_to_ptr.vmem [resolvable:$true] %s443_s22 }
  0x85   : > { %s441_s11 = sshll.u32 %s440_s4, 4  ;;  %s6564_s2 = scalar_lea.hbm %s7924_s7, 768  ;;  %s442_s11 = int_to_ptr.hbm [resolvable:$true] %s441_s11 }
  0x86   : > { %s6557_s24 = sshra.s32 %s442_s11, 4  ;;  %s6558_s24 = int_to_ptr.hbm [resolvable:$true] %s6557_s24 }
  0x87   : > { %s6559_s15 = scalar_lea.hbm %s6558_s24, 256  ;;  %p6565_p3 = scmp.lt.s32.totalorder %s6558_s24, %s7924_s7 }
  0x88   : > { %p6560_p0 = scmp.ne.s32.totalorder %s6558_s24, %s6559_s15  ;;  %p6566_p4 = scmp.lt.s32.totalorder %s6564_s2, %s6559_s15 }
  0x8a   : > { %p6562_p1 = pnand %p6560_p0, %p6785_p12  ;;  %p6567_p6 = por %p6566_p4, %p6565_p3 }
  0x8c   : > { %p6563_p2 = pneg %p6562_p1 }
  0x8e   : > { %p6568_p9 = pnand %p6567_p6, %p6563_p2 }
  0x90   : > { %6571 = shalt.err (!%p6568_p9)
}
  0x91   : > { %s6673_s26 = smov 64   ;;  %s6674_s27 = smov 4  }
  0x92   : > { %s7948_s16 = scalar_lea.sflag [#allocation11], %s6773_s21  ;;  %s459_s4 = scalar_lea.hbm %s7925_s8, %s6667_s12 }
  0x93   : > { %6333 = dma.hbm_to_vmem [thread:$0]  (!%p6768_p8), %s442_s11, 4096, %s444_s22, %s7948_s16, %s6673_s26, %s6673_s26, %s6674_s27  }
  0x94   : > { %s456_s23 = scalar_lea.vmem [#allocation13], %s6766_s19  ;;  %s461_s15 = sshll.u32 %s459_s4, 4  ;;  %s462_s15 = int_to_ptr.hbm [resolvable:$true] %s461_s15 }
  0x95   : > { %s463_s24 = sshll.u32 %s456_s23, 4  ;;  %s454_s30 = scalar_lea.sflag [#allocation14], %s6766_s19  ;;  %s464_s24 = int_to_ptr.vmem [resolvable:$true] %s463_s24 }
  0x96   : > { %s6587_s29 = sshra.s32 %s462_s15, 4  ;;  %s6594_s11 = scalar_lea.hbm %s7925_s8, 3  ;;  %s6588_s29 = int_to_ptr.hbm [resolvable:$true] %s6587_s29 }
  0x97   : > { %s6589_s2 = scalar_lea.hbm %s6588_s29, 1  ;;  %p6595_p0 = scmp.lt.s32.totalorder %s6588_s29, %s7925_s8 }
  0x98   : > { %p6590_p10 = scmp.ne.s32.totalorder %s6588_s29, %s6589_s2  ;;  %p6596_p1 = scmp.lt.s32.totalorder %s6594_s11, %s6589_s2 }
  0x9a   : > { %p6592_p11 = pnand %p6590_p10, %p6785_p12  ;;  %p6597_p2 = por %p6596_p1, %p6595_p0 }
  0x9c   : > { %p6593_p13 = pneg %p6592_p11 }
  0x9e   : > { %p6598_p3 = pnand %p6597_p2, %p6593_p13 }
  0xa0   : > { %6601 = shalt.err (!%p6598_p3)
}
  0xa1   : > { %6336 = dma.hbm_to_vmem [thread:$0]  (!%p6768_p8), %s462_s15, 16, %s464_s24, %s454_s30  }
  0xa2   : > { %472 = sbr.rel (%p6805_p5) target bundleno = 961 (0x3c1), region = 56  ;;  %s6929_s12 = sand.u32 (!%p6805_p5), 1, %s6659_s10  }
  0xa3   : > { %s4200_s17 = sshll.u32 (!%p6805_p5), %s6929_s12, 2  ;;  %s475_s19 = scalar_lea.sflag (!%p6805_p5), [#allocation3], %s6929_s12 }
  0xa4   : > { %s478_s26 = scalar_lea.vmem (!%p6805_p5), [#allocation2], %s4200_s17 }
  0xa7   : > { %6634 = dma.done.wait (%p6761_p7), %s475_s19, 64  }
  0xa8   : > { %6636 = vsyncadd (%p6761_p7), %s475_s19, 4294967232  ;;  %s484_s20 = sand.u32 1, %s6744_s13   ;;  %s4201_s28 = sshll.u32 %s6929_s12, 1 }
  0xa9   : > { %s485_s27 = scalar_lea.sflag [#allocation5], %s484_s20  ;;  %s6939_s16 = scalar_lea.vmem [#allocation4], %s4201_s28 }
  0xaa   : > { %6638 = dma.done.wait (%p6761_p7), %s485_s27, 16416  }
  0xab   : > { %6640 = vsyncadd (%p6761_p7), %s485_s27, 4294950880  ;;  %s4202_s9 = sshll.u32 %s6929_s12, 10  ;;  %s4203_s25 = sshll.u32 %s6929_s12, 3 }
  0xac   : > { %s6947_s4 = scalar_lea.vmem [#allocation6], %s4202_s9  ;;  %s505_s23 = scalar_lea.sflag [#allocation8], %s484_s20 }
  0xad   : > { %s6949_s24 = scalar_lea.vmem [#allocation7], %s4203_s25 }
  0xae   : > { %6642 = dma.done.wait (%p6761_p7), %s505_s23, 32896  }
  0xaf   : > { %6644 = vsyncadd (%p6761_p7), %s505_s23, 4294934400  ;;  %s4204_s15 = sshll.u32 %s6929_s12, 11  ;;  %s525_s29 = scalar_lea.sflag [#allocation11], %s484_s20 }
  0xb0   : > { %s6956_s30 = scalar_lea.vmem [#allocation9], %s4204_s15  ;;  %s6958_s2 = scalar_lea.vmem [#allocation10], %s4200_s17 }
  0xb1   : > { %6646 = dma.done.wait (%p6761_p7), %s525_s29, 4160  }
  0xb2   : > { %6648 = vsyncadd (%p6761_p7), %s525_s29, 4294963136  ;;  %s4206_s0 = sshll.u32 %s6929_s12, 8  ;;  %s545_s11 = scalar_lea.sflag [#allocation14], %s6929_s12 }
  0xb3   : > { %s6965_s21 = scalar_lea.vmem [#allocation12], %s4206_s0  ;;  %s547_s22 = scalar_lea.vmem [#allocation13], %s6929_s12 }
  0xb4   : > { %6650 = dma.done.wait (%p6761_p7), %s545_s11, 16  }
  0xb5   : > { %6652 = vsyncadd (%p6761_p7), %s545_s11, 4294967280  ;;  %v622_v0 = vld [vmem:[%s478_s26] sm:$0xf]  ;;  %v4436_v1 = vld [vmem:[%s6947_s4 + $0x1c0] sm:$0xf]  ;;  %vm637_vm0 = vcmask 1041408  }
  0xb6   : > { %630 = vst [vmem:[#allocation1] ss:$4 sm:$0xff] %v622_v0  ;;  %v5940_v2 = vld [vmem:[%s6947_s4 + $0x1dc] sm:$0xf0]  ;;  %v5936_v6 = vld [vmem:[%s6947_s4 + $0x1c4] sm:$0xf] }
  0xb7   : > { %v4692_v3 = vld [vmem:[%s6947_s4 + $0x3c0] sm:$0xf]  ;;  %v4437_v4 = vor.u32 %v5940_v2, %v4436_v1  ;;  %v4438_v7 = vld [vmem:[%s6947_s4 + $0x1e0] sm:$0xf0]  ;;  %vm633_vm1 = vcmask 31744   ;;  %s7949_s17 = sld [smem:[#allocation23_spill]] }
  0xb8   : > { %v6004_v5 = vld [vmem:[%s6947_s4 + $0x3dc] sm:$0xf0]  ;;  %v6000_v9 = vld [vmem:[%s6947_s4 + $0x3c4] sm:$0xf]  ;;  %v4441_v22 = vor.u32 %v5936_v6, %v4438_v7  ;;  %p616_p7 = scmp.lt.s32.totalorder %s6744_s13, 2  ;;  %s7950_s28 = sld [smem:[#allocation26_spill]] }
  0xb9   : > { %v4693_v8 = vor.u32 %v6004_v5, %v4692_v3  ;;  %v4694_v10 = vld [vmem:[%s6947_s4 + $0x3e0] sm:$0xf0]  ;;  %v4404_v11 = vld [vmem:[%s6947_s4 + $0x180] sm:$0xf]  ;;  %1458 = vmatpush.bf16.msra.mxu2 %v4437_v4 }
  0xba   : > { %v5932_v12 = vld [vmem:[%s6947_s4 + $0x19c] sm:$0xf0]  ;;  %v5928_v17 = vld [vmem:[%s6947_s4 + $0x184] sm:$0xf]  ;;  %v4697_v23 = vor.u32 %v6000_v9, %v4694_v10  ;;  %s7957_s13 = smov (!%p616_p7, %s6744_s13), 2 }
  0xbb   : > { %v4660_v13 = vld [vmem:[%s6947_s4 + $0x380] sm:$0xf]  ;;  %1471 = vmatpush.bf16.msra.mxu3 %v4693_v8  ;;  %v4405_v15 = vor.u32 %v5932_v12, %v4404_v11  ;;  %v4406_v18 = vld [vmem:[%s6947_s4 + $0x1a0] sm:$0xf0]  ;;  %s4207_s19 = sshll.u32 %s7957_s13, 3 }
  0xbc   : > { %v5996_v14 = vld [vmem:[%s6947_s4 + $0x39c] sm:$0xf0]  ;;  %v5992_v19 = vld [vmem:[%s6947_s4 + $0x384] sm:$0xf]  ;;  %v4409_v36 = vor.u32 %v5928_v17, %v4406_v18 }
  0xbd   : > { %v4661_v16 = vor.u32 %v5996_v14, %v4660_v13  ;;  %v4372_v20 = vld [vmem:[%s6947_s4 + $0x140] sm:$0xf]  ;;  %v4662_v24 = vld [vmem:[%s6947_s4 + $0x3a0] sm:$0xf0]  ;;  %1459 = vmatpush.bf16.msra.mxu2 %v4405_v15  ;;  %v621_v32 = vld [vmem:[%s7949_s17] sm:$0xf] }
  0xbe   : > { %v5924_v21 = vld [vmem:[%s6947_s4 + $0x15c] sm:$0xf0]  ;;  %v631_v27 = vld.sshfl [vmem:[#allocation1] sm:$0xff pattern:$0x73625140]  ;;  %v4665_v37 = vor.u32 %v5992_v19, %v4662_v24  ;;  %s619_s27 = scalar_lea.vmem %s7950_s28, %s4207_s19 }
  0xbf   : > { %v4628_v25 = vld [vmem:[%s6947_s4 + $0x340] sm:$0xf]  ;;  %v632_v28 = vld.sshfl [vmem:[#allocation1 + $0x8] sm:$0xff pattern:$0x73625140]  ;;  %v4373_v29 = vor.u32 %v5924_v21, %v4372_v20  ;;  %v638_v30 = vsel %vm637_vm0, %v631_v27, 0  ;;  %1472 = vmatpush.bf16.msra.mxu3 %v4661_v16 }
  0xc0   : > { %v5988_v26 = vld [vmem:[%s6947_s4 + $0x35c] sm:$0xf0]  ;;  %v640_v31 = vsel %vm637_vm0, %v632_v28, 0  ;;  %649 = vmatpush.bf16.msra.mxu0 %v638_v30  ;;  %v5920_v38 = vld [vmem:[%s6947_s4 + $0x144] sm:$0xf] }
  0xc1   : > { %662 = vmatpush.bf16.msra.mxu1 %v640_v31  ;;  %v4629_v33 = vor.u32 %v5988_v26, %v4628_v25  ;;  %v4340_v34 = vld [vmem:[%s6947_s4 + $0x100] sm:$0xf]  ;;  %1460 = vmatpush.bf16.msra.mxu2 %v4373_v29  ;;  %v4374_v41 = vld [vmem:[%s6947_s4 + $0x160] sm:$0xf0]  ;;  %v4444_v20 = vld [vmem:[%s6947_s4 + $0x1c8] sm:$0xf] }
  0xc2   : > { %v5916_v35 = vld [vmem:[%s6947_s4 + $0x11c] sm:$0xf0]  ;;  %v5984_v42 = vld [vmem:[%s6947_s4 + $0x344] sm:$0xf]  ;;  %v4377_v48 = vor.u32 %v5920_v38, %v4374_v41  ;;  %v5941_v21 = vld [vmem:[%s6947_s4 + $0x1e4] sm:$0xf0] }
  0xc3   : > { %v4596_v39 = vld [vmem:[%s6947_s4 + $0x300] sm:$0xf]  ;;  %v4630_v43 = vld [vmem:[%s6947_s4 + $0x360] sm:$0xf0]  ;;  %v4341_v44 = vor.u32 %v5916_v35, %v4340_v34  ;;  %4208 = vmatmul.msk.bf16.vlgmr.msra.gmra.mxu0 %vm633_vm1, %v621_v32  ;;  %1473 = vmatpush.bf16.msra.mxu3 %v4629_v33  ;;  %v4445_v31 = vor.u32 %v5941_v21, %v4444_v20  ;;  %v6005_v33 = vld [vmem:[%s6947_s4 + $0x3e4] sm:$0xf0] }
  0xc4   : > { %1484 = vmatpush.bf16.msrb.mxu0 %v4441_v22  ;;  %v5980_v40 = vld [vmem:[%s6947_s4 + $0x31c] sm:$0xf0]  ;;  %4209 = vmatmul.msk.bf16.vlgmr.msra.gmra.mxu1 %vm633_vm1, %v621_v32  ;;  %v4633_v49 = vor.u32 %v5984_v42, %v4630_v43  ;;  %v5912_v50 = vld [vmem:[%s6947_s4 + $0x104] sm:$0xf]  ;;  %v4700_v32 = vld [vmem:[%s6947_s4 + $0x3c8] sm:$0xf] }
  0xc5   : > { %1497 = vmatpush.bf16.msrb.mxu1 %v4697_v23  ;;  %v4308_v45 = vld [vmem:[%s6947_s4 + $0xc0] sm:$0xf]  ;;  %v4597_v47 = vor.u32 %v5980_v40, %v4596_v39  ;;  %1461 = vmatpush.bf16.msra.mxu2 %v4341_v44  ;;  %v4342_v53 = vld [vmem:[%s6947_s4 + $0x120] sm:$0xf0]  ;;  %v4412_v35 = vld [vmem:[%s6947_s4 + $0x188] sm:$0xf]  ;;  %v4701_v43 = vor.u32 %v6005_v33, %v4700_v32 }
  0xc6   : > { %v5908_v46 = vld [vmem:[%s6947_s4 + $0xdc] sm:$0xf0]  ;;  %v5976_v54 = vld [vmem:[%s6947_s4 + $0x304] sm:$0xf]  ;;  %v4345_v60 = vor.u32 %v5912_v50, %v4342_v53  ;;  %v5937_v44 = vld [vmem:[%s6947_s4 + $0x1cc] sm:$0xf] }
  0xc7   : > { %v4564_v51 = vld [vmem:[%s6947_s4 + $0x2c0] sm:$0xf]  ;;  %v4598_v55 = vld [vmem:[%s6947_s4 + $0x320] sm:$0xf0]  ;;  %v4309_v56 = vor.u32 %v5908_v46, %v4308_v45  ;;  %1474 = vmatpush.bf16.msra.mxu3 %v4597_v47  ;;  %v4446_v45 = vld [vmem:[%s6947_s4 + $0x1e8] sm:$0xf0] }
  0xc8   : > { %1485 = vmatpush.bf16.msrb.mxu0 %v4409_v36  ;;  %v5972_v52 = vld [vmem:[%s6947_s4 + $0x2dc] sm:$0xf0]  ;;  %v4601_v61 = vor.u32 %v5976_v54, %v4598_v55  ;;  %v5904_v62 = vld [vmem:[%s6947_s4 + $0xc4] sm:$0xf]  ;;  %v5933_v36 = vld [vmem:[%s6947_s4 + $0x1a4] sm:$0xf0]  ;;  %v4449_v55 = vor.u32 %v5937_v44, %v4446_v45 }
  0xc9   : > { %1498 = vmatpush.bf16.msrb.mxu1 %v4665_v37  ;;  %v4276_v57 = vld [vmem:[%s6947_s4 + $0x80] sm:$0xf]  ;;  %v4565_v59 = vor.u32 %v5972_v52, %v4564_v51  ;;  %1462 = vmatpush.bf16.msra.mxu2 %v4309_v56  ;;  %v4310_v1 = vld [vmem:[%s6947_s4 + $0xe0] sm:$0xf0]  ;;  %v6001_v46 = vld [vmem:[%s6947_s4 + $0x3cc] sm:$0xf] }
  0xca   : > { %v5900_v58 = vld [vmem:[%s6947_s4 + $0x9c] sm:$0xf0]  ;;  %v5968_v2 = vld [vmem:[%s6947_s4 + $0x2c4] sm:$0xf]  ;;  %v4313_v8 = vor.u32 %v5904_v62, %v4310_v1  ;;  %v4702_v47 = vld [vmem:[%s6947_s4 + $0x3e8] sm:$0xf0] }
  0xcb   : > { %v4532_v63 = vld [vmem:[%s6947_s4 + $0x280] sm:$0xf]  ;;  %v4566_v3 = vld [vmem:[%s6947_s4 + $0x2e0] sm:$0xf0]  ;;  %v4277_v4 = vor.u32 %v5900_v58, %v4276_v57  ;;  %1475 = vmatpush.bf16.msra.mxu3 %v4565_v59  ;;  %v5997_v50 = vld [vmem:[%s6947_s4 + $0x3a4] sm:$0xf0]  ;;  %v4705_v56 = vor.u32 %v6001_v46, %v4702_v47 }
  0xcc   : > { %1486 = vmatpush.bf16.msrb.mxu0 %v4377_v48  ;;  %v5964_v0 = vld [vmem:[%s6947_s4 + $0x29c] sm:$0xf0]  ;;  %v4569_v9 = vor.u32 %v5968_v2, %v4566_v3  ;;  %v5896_v10 = vld [vmem:[%s6947_s4 + $0x84] sm:$0xf]  ;;  %v4413_v48 = vor.u32 %v5933_v36, %v4412_v35  ;;  %v4380_v51 = vld [vmem:[%s6947_s4 + $0x148] sm:$0xf] }
  0xcd   : > { %1499 = vmatpush.bf16.msrb.mxu1 %v4633_v49  ;;  %v4244_v5 = vld [vmem:[%s6947_s4 + $0x40] sm:$0xf]  ;;  %v4533_v7 = vor.u32 %v5964_v0, %v4532_v63  ;;  %1463 = vmatpush.bf16.msra.mxu2 %v4277_v4  ;;  %v4278_v13 = vld [vmem:[%s6947_s4 + $0xa0] sm:$0xf0]  ;;  %v4668_v49 = vld [vmem:[%s6947_s4 + $0x388] sm:$0xf] }
  0xce   : > { %v5892_v6 = vld [vmem:[%s6947_s4 + $0x5c] sm:$0xf0]  ;;  %v5960_v14 = vld [vmem:[%s6947_s4 + $0x284] sm:$0xf]  ;;  %v4281_v22 = vor.u32 %v5896_v10, %v4278_v13  ;;  %v5925_v52 = vld [vmem:[%s6947_s4 + $0x164] sm:$0xf0]  ;;  %v4669_v59 = vor.u32 %v5997_v50, %v4668_v49 }
  0xcf   : > { %v4500_v11 = vld [vmem:[%s6947_s4 + $0x240] sm:$0xf]  ;;  %v4534_v15 = vld [vmem:[%s6947_s4 + $0x2a0] sm:$0xf0]  ;;  %v4245_v16 = vor.u32 %v5892_v6, %v4244_v5  ;;  %1476 = vmatpush.bf16.msra.mxu3 %v4533_v7  ;;  %v5929_v57 = vld [vmem:[%s6947_s4 + $0x18c] sm:$0xf]  ;;  %v4381_v62 = vor.u32 %v5925_v52, %v4380_v51 }
  0xd0   : > { %1487 = vmatpush.bf16.msrb.mxu0 %v4345_v60  ;;  %v5956_v12 = vld [vmem:[%s6947_s4 + $0x25c] sm:$0xf0]  ;;  %v4537_v23 = vor.u32 %v5960_v14, %v4534_v15  ;;  %v5888_v24 = vld [vmem:[%s6947_s4 + $0x44] sm:$0xf]  ;;  %v4414_v58 = vld [vmem:[%s6947_s4 + $0x1a8] sm:$0xf0] }
  0xd1   : > { %1500 = vmatpush.bf16.msrb.mxu1 %v4601_v61  ;;  %v4212_v17 = vld [vmem:[%s6947_s4] sm:$0xf]  ;;  %v4501_v19 = vor.u32 %v5956_v12, %v4500_v11  ;;  %1464 = vmatpush.bf16.msra.mxu2 %v4245_v16  ;;  %v4246_v27 = vld [vmem:[%s6947_s4 + $0x60] sm:$0xf0]  ;;  %v5993_v60 = vld [vmem:[%s6947_s4 + $0x38c] sm:$0xf]  ;;  %v4417_v3 = vor.u32 %v5929_v57, %v4414_v58 }
  0xd2   : > { %v5884_v18 = vld [vmem:[%s6947_s4 + $0x1c] sm:$0xf0]  ;;  %v5952_v28 = vld [vmem:[%s6947_s4 + $0x244] sm:$0xf]  ;;  %v4249_v37 = vor.u32 %v5888_v24, %v4246_v27  ;;  %v4670_v61 = vld [vmem:[%s6947_s4 + $0x3a8] sm:$0xf0] }
  0xd3   : > { %v4468_v25 = vld [vmem:[%s6947_s4 + $0x200] sm:$0xf]  ;;  %v4502_v29 = vld [vmem:[%s6947_s4 + $0x260] sm:$0xf0]  ;;  %v4213_v30 = vor.u32 %v5884_v18, %v4212_v17  ;;  %1477 = vmatpush.bf16.msra.mxu3 %v4501_v19  ;;  %v4636_v63 = vld [vmem:[%s6947_s4 + $0x348] sm:$0xf]  ;;  %v4673_v4 = vor.u32 %v5993_v60, %v4670_v61 }
  0xd4   : > { %1488 = vmatpush.bf16.msrb.mxu0 %v4313_v8  ;;  %v5948_v26 = vld [vmem:[%s6947_s4 + $0x21c] sm:$0xf0]  ;;  %v4505_v38 = vor.u32 %v5952_v28, %v4502_v29  ;;  %v5880_v39 = vld [vmem:[%s6947_s4 + $0x4] sm:$0xf]  ;;  %v5989_v0 = vld [vmem:[%s6947_s4 + $0x364] sm:$0xf0] }
  0xd5   : > { %1501 = vmatpush.bf16.msrb.mxu1 %v4569_v9  ;;  %v4469_v34 = vor.u32 %v5948_v26, %v4468_v25  ;;  %v4214_v40 = vld [vmem:[%s6947_s4 + $0x20] sm:$0xf0]  ;;  %1465 = vmatpush.bf16.msra.mxu2 %v4213_v30  ;;  %v4348_v1 = vld [vmem:[%s6947_s4 + $0x108] sm:$0xf]  ;;  %v5921_v5 = vld [vmem:[%s6947_s4 + $0x14c] sm:$0xf]  ;;  %v4637_v7 = vor.u32 %v5989_v0, %v4636_v63 }
  0xd6   : > { %v5944_v41 = vld [vmem:[%s6947_s4 + $0x204] sm:$0xf]  ;;  %v4217_v53 = vor.u32 %v5880_v39, %v4214_v40  ;;  %v5917_v2 = vld [vmem:[%s6947_s4 + $0x124] sm:$0xf0]  ;;  %v4382_v6 = vld [vmem:[%s6947_s4 + $0x168] sm:$0xf0] }
  0xd7   : > { %v4470_v42 = vld [vmem:[%s6947_s4 + $0x220] sm:$0xf0]  ;;  %1478 = vmatpush.bf16.msra.mxu3 %v4469_v34  ;;  %v5985_v8 = vld [vmem:[%s6947_s4 + $0x34c] sm:$0xf]  ;;  %v4349_v10 = vor.u32 %v5917_v2, %v4348_v1  ;;  %v4604_v11 = vld [vmem:[%s6947_s4 + $0x308] sm:$0xf]  ;;  %v4385_v15 = vor.u32 %v5921_v5, %v4382_v6 }
  0xd8   : > { %1489 = vmatpush.bf16.msrb.mxu0 %v4281_v22  ;;  %v4473_v54 = vor.u32 %v5944_v41, %v4470_v42  ;;  %v4638_v9 = vld [vmem:[%s6947_s4 + $0x368] sm:$0xf0]  ;;  %v5981_v12 = vld [vmem:[%s6947_s4 + $0x324] sm:$0xf0]  ;;  %v623_v6 = vld [vmem:[%s6939_s16] sm:$0x3] }
  0xd9   : > { %1502 = vmatpush.bf16.msrb.mxu1 %v4537_v23  ;;  %1510 = vmatpush.bf16.msrb.mxu2 %v4445_v31  ;;  %v4316_v13 = vld [vmem:[%s6947_s4 + $0xc8] sm:$0xf]  ;;  %v4641_v16 = vor.u32 %v5985_v8, %v4638_v9  ;;  %v5913_v17 = vld [vmem:[%s6947_s4 + $0x10c] sm:$0xf]  ;;  %v4605_v19 = vor.u32 %v5981_v12, %v4604_v11  ;;  %v626_v8 = vperm.slane %v623_v6, 1 }
  0xda   : > { %v5909_v14 = vld [vmem:[%s6947_s4 + $0xe4] sm:$0xf0]  ;;  %v4350_v18 = vld [vmem:[%s6947_s4 + $0x128] sm:$0xf0] }
  0xdb   : > { %1523 = vmatpush.bf16.msrb.mxu3 %v4701_v43  ;;  %v5977_v20 = vld [vmem:[%s6947_s4 + $0x30c] sm:$0xf]  ;;  %v4317_v22 = vor.u32 %v5909_v14, %v4316_v13  ;;  %v4572_v23 = vld [vmem:[%s6947_s4 + $0x2c8] sm:$0xf]  ;;  %v4353_v27 = vor.u32 %v5913_v17, %v4350_v18  ;;  %v4452_v13 = vld [vmem:[%s6947_s4 + $0x1d0] sm:$0xf] }
  0xdc   : > { %1490 = vmatpush.bf16.msrb.mxu0 %v4249_v37  ;;  %v4606_v21 = vld [vmem:[%s6947_s4 + $0x328] sm:$0xf0]  ;;  %v5973_v24 = vld [vmem:[%s6947_s4 + $0x2e4] sm:$0xf0]  ;;  %v5942_v14 = vld [vmem:[%s6947_s4 + $0x1ec] sm:$0xf0] }
  0xdd   : > { %1503 = vmatpush.bf16.msrb.mxu1 %v4505_v38  ;;  %1511 = vmatpush.bf16.msrb.mxu2 %v4413_v48  ;;  %v4284_v25 = vld [vmem:[%s6947_s4 + $0x88] sm:$0xf]  ;;  %v4609_v28 = vor.u32 %v5977_v20, %v4606_v21  ;;  %v5905_v29 = vld [vmem:[%s6947_s4 + $0xcc] sm:$0xf]  ;;  %v4573_v30 = vor.u32 %v5973_v24, %v4572_v23  ;;  %v5938_v17 = vld [vmem:[%s6947_s4 + $0x1d4] sm:$0xf] }
  0xde   : > { %v5901_v26 = vld [vmem:[%s6947_s4 + $0xa4] sm:$0xf0]  ;;  %v4318_v31 = vld [vmem:[%s6947_s4 + $0xe8] sm:$0xf0]  ;;  %v4454_v18 = vld [vmem:[%s6947_s4 + $0x1f0] sm:$0xf0] }
  0xdf   : > { %1524 = vmatpush.bf16.msrb.mxu3 %v4669_v59  ;;  %v5969_v32 = vld [vmem:[%s6947_s4 + $0x2cc] sm:$0xf]  ;;  %v4285_v34 = vor.u32 %v5901_v26, %v4284_v25  ;;  %v4540_v35 = vld [vmem:[%s6947_s4 + $0x288] sm:$0xf]  ;;  %v4321_v37 = vor.u32 %v5905_v29, %v4318_v31  ;;  %v6002_v21 = vld [vmem:[%s6947_s4 + $0x3d4] sm:$0xf]  ;;  %v4453_v25 = vor.u32 %v5942_v14, %v4452_v13  ;;  %v4457_v29 = vor.u32 %v5938_v17, %v4454_v18 }
  0xe0   : > { %1491 = vmatpush.bf16.msrb.mxu0 %v4217_v53  ;;  %v4574_v33 = vld [vmem:[%s6947_s4 + $0x2e8] sm:$0xf0]  ;;  %v5965_v36 = vld [vmem:[%s6947_s4 + $0x2a4] sm:$0xf0]  ;;  %v4676_v31 = vld [vmem:[%s6947_s4 + $0x390] sm:$0xf] }
  0xe1   : > { %1504 = vmatpush.bf16.msrb.mxu1 %v4473_v54  ;;  %1512 = vmatpush.bf16.msrb.mxu2 %v4381_v62  ;;  %v4577_v38 = vor.u32 %v5969_v32, %v4574_v33  ;;  %v5897_v39 = vld [vmem:[%s6947_s4 + $0x8c] sm:$0xf]  ;;  %v4541_v40 = vor.u32 %v5965_v36, %v4540_v35  ;;  %v4252_v46 = vld [vmem:[%s6947_s4 + $0x48] sm:$0xf]  ;;  %v5998_v32 = vld [vmem:[%s6947_s4 + $0x3ac] sm:$0xf0] }
  0xe2   : > { %v4286_v41 = vld [vmem:[%s6947_s4 + $0xa8] sm:$0xf0]  ;;  %v5893_v47 = vld [vmem:[%s6947_s4 + $0x64] sm:$0xf0]  ;;  %v5930_v33 = vld [vmem:[%s6947_s4 + $0x194] sm:$0xf] }
  0xe3   : > { %1525 = vmatpush.bf16.msrb.mxu3 %v4637_v7  ;;  %v5961_v42 = vld [vmem:[%s6947_s4 + $0x28c] sm:$0xf]  ;;  %v4289_v44 = vor.u32 %v5897_v39, %v4286_v41  ;;  %v4253_v48 = vor.u32 %v5893_v47, %v4252_v46  ;;  %v4508_v49 = vld [vmem:[%s6947_s4 + $0x248] sm:$0xf]  ;;  %v625_v7 = vperm.slane %v623_v6, 0 }
  0xe4   : > { %1536 = vmatpush.bf16.msra.mxu0 %v4449_v55  ;;  %v4542_v43 = vld [vmem:[%s6947_s4 + $0x2a8] sm:$0xf0]  ;;  %v5957_v50 = vld [vmem:[%s6947_s4 + $0x264] sm:$0xf0]  ;;  %v5994_v35 = vld [vmem:[%s6947_s4 + $0x394] sm:$0xf] }
  0xe5   : > { %1549 = vmatpush.bf16.msra.mxu1 %v4705_v56  ;;  %1513 = vmatpush.bf16.msrb.mxu2 %v4349_v10  ;;  %v4545_v45 = vor.u32 %v5961_v42, %v4542_v43  ;;  %v5889_v51 = vld [vmem:[%s6947_s4 + $0x4c] sm:$0xf]  ;;  %v4509_v52 = vor.u32 %v5957_v50, %v4508_v49  ;;  %v4220_v58 = vld [vmem:[%s6947_s4 + $0x8] sm:$0xf]  ;;  %v4678_v36 = vld [vmem:[%s6947_s4 + $0x3b0] sm:$0xf0] }
  0xe6   : > { %v4254_v53 = vld [vmem:[%s6947_s4 + $0x68] sm:$0xf0]  ;;  %v5885_v59 = vld [vmem:[%s6947_s4 + $0x24] sm:$0xf0]  ;;  %v4388_v41 = vld [vmem:[%s6947_s4 + $0x150] sm:$0xf] }
  0xe7   : > { %1526 = vmatpush.bf16.msrb.mxu3 %v4605_v19  ;;  %v5953_v54 = vld [vmem:[%s6947_s4 + $0x24c] sm:$0xf]  ;;  %v4257_v56 = vor.u32 %v5889_v51, %v4254_v53  ;;  %v4476_v60 = vld [vmem:[%s6947_s4 + $0x208] sm:$0xf]  ;;  %v4221_v61 = vor.u32 %v5885_v59, %v4220_v58  ;;  %v5926_v42 = vld [vmem:[%s6947_s4 + $0x16c] sm:$0xf0] }
  0xe8   : > { %1537 = vmatpush.bf16.msra.mxu0 %v4417_v3  ;;  %v4510_v55 = vld [vmem:[%s6947_s4 + $0x268] sm:$0xf0]  ;;  %v5949_v62 = vld [vmem:[%s6947_s4 + $0x224] sm:$0xf0]  ;;  %v5990_v46 = vld [vmem:[%s6947_s4 + $0x36c] sm:$0xf0]  ;;  %v4389_v51 = vor.u32 %v5926_v42, %v4388_v41 }
  0xe9   : > { %1550 = vmatpush.bf16.msra.mxu1 %v4673_v4  ;;  %1514 = vmatpush.bf16.msrb.mxu2 %v4317_v22  ;;  %v4513_v57 = vor.u32 %v5953_v54, %v4510_v55  ;;  %v5881_v63 = vld [vmem:[%s6947_s4 + $0xc] sm:$0xf]  ;;  %v4477_v1 = vor.u32 %v5949_v62, %v4476_v60  ;;  %v4710_v22 = vld [vmem:[%s6947_s4 + $0x3f0] sm:$0xf0]  ;;  %v4356_v53 = vld [vmem:[%s6947_s4 + $0x110] sm:$0xf] }
  0xea   : > { %v4222_v0 = vld [vmem:[%s6947_s4 + $0x28] sm:$0xf0]  ;;  %v5922_v47 = vld [vmem:[%s6947_s4 + $0x154] sm:$0xf]  ;;  %v5918_v54 = vld [vmem:[%s6947_s4 + $0x12c] sm:$0xf0] }
  0xeb   : > { %1527 = vmatpush.bf16.msrb.mxu3 %v4573_v30  ;;  %v4225_v2 = vor.u32 %v5881_v63, %v4222_v0  ;;  %v5945_v3 = vld [vmem:[%s6947_s4 + $0x20c] sm:$0xf]  ;;  %v4713_v30 = vor.u32 %v6002_v21, %v4710_v22  ;;  %v5986_v49 = vld [vmem:[%s6947_s4 + $0x354] sm:$0xf]  ;;  %v5982_v58 = vld [vmem:[%s6947_s4 + $0x32c] sm:$0xf0]  ;;  %v4357_v63 = vor.u32 %v5918_v54, %v4356_v53 }
  0xec   : > { %1538 = vmatpush.bf16.msra.mxu0 %v4385_v15  ;;  %v4478_v4 = vld [vmem:[%s6947_s4 + $0x228] sm:$0xf0]  ;;  %v4708_v15 = vld [vmem:[%s6947_s4 + $0x3d0] sm:$0xf]  ;;  %v4646_v50 = vld [vmem:[%s6947_s4 + $0x370] sm:$0xf0] }
  0xed   : > { %1551 = vmatpush.bf16.msra.mxu1 %v4641_v16  ;;  %1515 = vmatpush.bf16.msrb.mxu2 %v4285_v34  ;;  %v4481_v5 = vor.u32 %v5945_v3, %v4478_v4  ;;  %v6006_v16 = vld [vmem:[%s6947_s4 + $0x3ec] sm:$0xf0]  ;;  %v4422_v34 = vld [vmem:[%s6947_s4 + $0x1b0] sm:$0xf0]  ;;  %v5939_v53 = vld [vmem:[%s6947_s4 + $0x1dc] sm:$0xf] }
  0xee   : > { %v4709_v26 = vor.u32 %v6006_v16, %v4708_v15  ;;  %v4425_v43 = vor.u32 %v5930_v33, %v4422_v34  ;;  %v5914_v59 = vld [vmem:[%s6947_s4 + $0x114] sm:$0xf]  ;;  %v5974_v6 = vld [vmem:[%s6947_s4 + $0x2ec] sm:$0xf0] }
  0xef   : > { %1528 = vmatpush.bf16.msrb.mxu3 %v4541_v40  ;;  %v4677_v40 = vor.u32 %v5998_v32, %v4676_v31  ;;  %v4358_v60 = vld [vmem:[%s6947_s4 + $0x130] sm:$0xf0]  ;;  %v4292_v13 = vld [vmem:[%s6947_s4 + $0x90] sm:$0xf] }
  0xf0   : > { %1539 = vmatpush.bf16.msra.mxu0 %v4353_v27  ;;  %v4420_v27 = vld [vmem:[%s6947_s4 + $0x190] sm:$0xf]  ;;  %v4614_v62 = vld [vmem:[%s6947_s4 + $0x330] sm:$0xf0]  ;;  %v4361_v3 = vor.u32 %v5914_v59, %v4358_v60 }
  0xf1   : > { %1552 = vmatpush.bf16.msra.mxu1 %v4609_v28  ;;  %1516 = vmatpush.bf16.msrb.mxu2 %v4253_v48  ;;  %v5934_v28 = vld [vmem:[%s6947_s4 + $0x1ac] sm:$0xf0]  ;;  %v4390_v48 = vld [vmem:[%s6947_s4 + $0x170] sm:$0xf0] }
  0xf2   : > { %v4421_v39 = vor.u32 %v5934_v28, %v4420_v27  ;;  %v4393_v55 = vor.u32 %v5922_v47, %v4390_v48  ;;  %v5902_v14 = vld [vmem:[%s6947_s4 + $0xac] sm:$0xf0]  ;;  %v5962_v21 = vld [vmem:[%s6947_s4 + $0x294] sm:$0xf] }
  0xf3   : > { %1529 = vmatpush.bf16.msrb.mxu3 %v4509_v52  ;;  %v4548_v17 = vld [vmem:[%s6947_s4 + $0x290] sm:$0xf]  ;;  %v4550_v22 = vld [vmem:[%s6947_s4 + $0x2b0] sm:$0xf0] }
  0xf4   : > { %1540 = vmatpush.bf16.msra.mxu0 %v4321_v37  ;;  %v5966_v18 = vld [vmem:[%s6947_s4 + $0x2ac] sm:$0xf0]  ;;  %v5890_v33 = vld [vmem:[%s6947_s4 + $0x54] sm:$0xf] }
  0xf5   : > { %1553 = vmatpush.bf16.msra.mxu1 %v4577_v38  ;;  %1517 = vmatpush.bf16.msrb.mxu2 %v4221_v61  ;;  %v5978_v61 = vld [vmem:[%s6947_s4 + $0x314] sm:$0xf]  ;;  %v4260_v27 = vld [vmem:[%s6947_s4 + $0x50] sm:$0xf] }
  0xf6   : > { %v4617_v4 = vor.u32 %v5978_v61, %v4614_v62  ;;  %v5894_v28 = vld [vmem:[%s6947_s4 + $0x6c] sm:$0xf0]  ;;  %v4262_v34 = vld [vmem:[%s6947_s4 + $0x70] sm:$0xf0] }
  0xf7   : > { %1530 = vmatpush.bf16.msrb.mxu3 %v4477_v1  ;;  %v4324_v1 = vld [vmem:[%s6947_s4 + $0xd0] sm:$0xf]  ;;  %v5946_v47 = vld [vmem:[%s6947_s4 + $0x214] sm:$0xf] }
  0xf8   : > { %1541 = vmatpush.bf16.msra.mxu0 %v4289_v44  ;;  %v4681_v44 = vor.u32 %v5994_v35, %v4678_v36  ;;  %v4516_v31 = vld [vmem:[%s6947_s4 + $0x250] sm:$0xf]  ;;  %v5954_v35 = vld [vmem:[%s6947_s4 + $0x254] sm:$0xf] }
  0xf9   : > { %1554 = vmatpush.bf16.msra.mxu1 %v4545_v45  ;;  %v4644_v45 = vld [vmem:[%s6947_s4 + $0x350] sm:$0xf]  ;;  %v4518_v36 = vld [vmem:[%s6947_s4 + $0x270] sm:$0xf0] }
  0xfa   : > { %v4645_v52 = vor.u32 %v5990_v46, %v4644_v45  ;;  %v5958_v32 = vld [vmem:[%s6947_s4 + $0x26c] sm:$0xf0]  ;;  %v5882_v45 = vld [vmem:[%s6947_s4 + $0x14] sm:$0xf] }
  0xfb   : > { %v4484_v41 = vld [vmem:[%s6947_s4 + $0x210] sm:$0xf]  ;;  %v4230_v46 = vld [vmem:[%s6947_s4 + $0x30] sm:$0xf0] }
  0xfc   : > { %1542 = vmatpush.bf16.msra.mxu0 %v4257_v56  ;;  %v4649_v56 = vor.u32 %v5986_v49, %v4646_v50  ;;  %v5950_v42 = vld [vmem:[%s6947_s4 + $0x22c] sm:$0xf0]  ;;  %v4486_v48 = vld [vmem:[%s6947_s4 + $0x230] sm:$0xf0]  ;;  %v4460_v49 = vld [vmem:[%s6947_s4 + $0x1d8] sm:$0xf]  ;;  %v4233_v59 = vor.u32 %v5882_v45, %v4230_v46 }
  0xfd   : > { %1555 = vmatpush.bf16.msra.mxu1 %v4513_v57  ;;  %v4612_v57 = vld [vmem:[%s6947_s4 + $0x310] sm:$0xf]  ;;  %v5943_v50 = vld [vmem:[%s6947_s4 + $0x1f4] sm:$0xf0]  ;;  %v4489_v60 = vor.u32 %v5946_v47, %v4486_v48  ;;  %v5971_v45 = vld [vmem:[%s6947_s4 + $0x2dc] sm:$0xf] }
  0xfe   : > { %v4613_v0 = vor.u32 %v5982_v58, %v4612_v57  ;;  %v6003_v57 = vld [vmem:[%s6947_s4 + $0x3dc] sm:$0xf]  ;;  %v4461_v61 = vor.u32 %v5943_v50, %v4460_v49  ;;  %v4300_v49 = vld [vmem:[%s6947_s4 + $0x98] sm:$0xf] }
  0xff   : > { %v4718_v58 = vld [vmem:[%s6947_s4 + $0x3f8] sm:$0xf0]  ;;  %v5903_v50 = vld [vmem:[%s6947_s4 + $0xb4] sm:$0xf0] }
 0x100   : > { %1543 = vmatpush.bf16.msra.mxu0 %v4225_v2  ;;  %v5910_v2 = vld [vmem:[%s6947_s4 + $0xec] sm:$0xf0]  ;;  %v4590_v46 = vld [vmem:[%s6947_s4 + $0x2f8] sm:$0xf0] }
 0x101   : > { %1556 = vmatpush.bf16.msra.mxu1 %v4481_v5  ;;  %v4580_v5 = vld [vmem:[%s6947_s4 + $0x2d0] sm:$0xf] }
 0x140   : > { %v651_v9 = vpop.f32.mrf.mxu0 }
 0x141   : > { %v664_v10 = vpop.f32.mrf.mxu1  ;;  %v652_v11 = vadd.f32 %v651_v9, %v625_v7  ;;  %v5906_v7 = vld [vmem:[%s6947_s4 + $0xd4] sm:$0xf] }
 0x142   : > { %v665_v12 = vadd.f32 %v664_v10, %v626_v8  ;;  %v4326_v8 = vld [vmem:[%s6947_s4 + $0xf0] sm:$0xf0] }
 0x143   : > { %v668_v19 = vmax.f32 %v652_v11, 0.0  ;;  %v5970_v9 = vld [vmem:[%s6947_s4 + $0x2d4] sm:$0xf]  ;;  %v4325_v11 = vor.u32 %v5910_v2, %v4324_v1  ;;  %v4329_v15 = vor.u32 %v5906_v7, %v4326_v8  ;;  %v4721_v2 = vor.u32 %v6003_v57, %v4718_v58  ;;  %v5995_v7 = vld [vmem:[%s6947_s4 + $0x39c] sm:$0xf] }
 0x144   : > { %v669_v20 = vmax.f32 %v665_v12, 0.0  ;;  %v4582_v10 = vld [vmem:[%s6947_s4 + $0x2f0] sm:$0xf0]  ;;  %v4581_v12 = vor.u32 %v5974_v6, %v4580_v5  ;;  %v5931_v5 = vld [vmem:[%s6947_s4 + $0x19c] sm:$0xf] }
 0x145   : > { %v7117_v23 = vpack.c.bf16 %v668_v19, %v668_v19  ;;  %v4585_v16 = vor.u32 %v5970_v9, %v4582_v10  ;;  %v5898_v19 = vld [vmem:[%s6947_s4 + $0x94] sm:$0xf]  ;;  %v4430_v6 = vld [vmem:[%s6947_s4 + $0x1b8] sm:$0xf0] }
 0x146   : > { %v7119_v24 = vpack.c.bf16 %v669_v20, %v669_v20  ;;  %v4294_v20 = vld [vmem:[%s6947_s4 + $0xb0] sm:$0xf0]  ;;  %v4686_v8 = vld [vmem:[%s6947_s4 + $0x3b8] sm:$0xf0] }
 0x147   : > { %1466 = vmatmul.bf16.vlgmr.msra.gmra.mxu2 %v7117_v23  ;;  %1492 = vmatmul.bf16.vlgmr.msrb.gmra.mxu0 %v7117_v23  ;;  %v5963_v57 = vld [vmem:[%s6947_s4 + $0x29c] sm:$0xf] }
 0x148   : > { %1479 = vmatmul.bf16.vlgmr.msra.gmra.mxu3 %v7119_v24  ;;  %1505 = vmatmul.bf16.vlgmr.msrb.gmra.mxu1 %v7119_v24  ;;  %v653_v37 = vpop.f32.mrf.mxu0  ;;  %v4558_v58 = vld [vmem:[%s6947_s4 + $0x2b8] sm:$0xf0] }
 0x149   : > { %v666_v38 = vpop.f32.mrf.mxu1  ;;  %1562 = vmatpush.bf16.msra.mxu2 %v4453_v25  ;;  %1575 = vmatpush.bf16.msra.mxu3 %v4709_v26  ;;  %v4293_v25 = vor.u32 %v5902_v14, %v4292_v13  ;;  %v4549_v26 = vor.u32 %v5966_v18, %v4548_v17  ;;  %v4228_v37 = vld [vmem:[%s6947_s4 + $0x10] sm:$0xf]  ;;  %v4433_v13 = vor.u32 %v5931_v5, %v4430_v6  ;;  %v5923_v17 = vld [vmem:[%s6947_s4 + $0x15c] sm:$0xf] }
 0x14a   : > { %1588 = vmatpush.bf16.msrb.mxu0 %v4457_v29  ;;  %1601 = vmatpush.bf16.msrb.mxu1 %v4713_v30  ;;  %v4297_v29 = vor.u32 %v5898_v19, %v4294_v20  ;;  %v4553_v30 = vor.u32 %v5962_v21, %v4550_v22  ;;  %v4261_v38 = vor.u32 %v5894_v28, %v4260_v27  ;;  %v4398_v18 = vld [vmem:[%s6947_s4 + $0x178] sm:$0xf0] }
 0x14b   : > { %v4689_v14 = vor.u32 %v5995_v7, %v4686_v8  ;;  %v5987_v19 = vld [vmem:[%s6947_s4 + $0x35c] sm:$0xf]  ;;  %v4401_v27 = vor.u32 %v5923_v17, %v4398_v18 }
 0x14c   : > { %v4654_v20 = vld [vmem:[%s6947_s4 + $0x378] sm:$0xf0] }
 0x14d   : > { %1563 = vmatpush.bf16.msra.mxu2 %v4421_v39  ;;  %1576 = vmatpush.bf16.msra.mxu3 %v4677_v40  ;;  %v4517_v39 = vor.u32 %v5958_v32, %v4516_v31  ;;  %v5886_v40 = vld [vmem:[%s6947_s4 + $0x2c] sm:$0xf0]  ;;  %v4657_v28 = vor.u32 %v5987_v19, %v4654_v20  ;;  %v5915_v31 = vld [vmem:[%s6947_s4 + $0x11c] sm:$0xf]  ;;  %v6070_v20 = vld [vmem:[%s6956_s30 + $0x1ec] sm:$0xf0] }
 0x14e   : > { %1589 = vmatpush.bf16.msrb.mxu0 %v4425_v43  ;;  %1602 = vmatpush.bf16.msrb.mxu1 %v4681_v44  ;;  %v4265_v43 = vor.u32 %v5890_v33, %v4262_v34  ;;  %v4521_v44 = vor.u32 %v5954_v35, %v4518_v36  ;;  %v4229_v54 = vor.u32 %v5886_v40, %v4228_v37  ;;  %v4366_v32 = vld [vmem:[%s6947_s4 + $0x138] sm:$0xf0]  ;;  %v4332_v37 = vld [vmem:[%s6947_s4 + $0xd8] sm:$0xf]  ;;  %v4964_v19 = vld [vmem:[%s6956_s30 + $0x1e0] sm:$0xf] }
 0x14f   : > { %v5979_v33 = vld [vmem:[%s6947_s4 + $0x31c] sm:$0xf] }
 0x150   : > { %v4622_v34 = vld [vmem:[%s6947_s4 + $0x338] sm:$0xf0] }
 0x151   : > { %1564 = vmatpush.bf16.msra.mxu2 %v4389_v51  ;;  %1577 = vmatpush.bf16.msra.mxu3 %v4645_v52  ;;  %v4716_v51 = vld [vmem:[%s6947_s4 + $0x3d8] sm:$0xf]  ;;  %v4625_v40 = vor.u32 %v5979_v33, %v4622_v34  ;;  %v5955_v5 = vld [vmem:[%s6947_s4 + $0x25c] sm:$0xf]  ;;  %v6134_v33 = vld [vmem:[%s6956_s30 + $0x3ec] sm:$0xf0] }
 0x152   : > { %1590 = vmatpush.bf16.msrb.mxu0 %v4393_v55  ;;  %1603 = vmatpush.bf16.msrb.mxu1 %v4649_v56  ;;  %v6007_v52 = vld [vmem:[%s6947_s4 + $0x3f4] sm:$0xf0]  ;;  %v4485_v55 = vor.u32 %v5950_v42, %v4484_v41  ;;  %v4462_v56 = vld [vmem:[%s6947_s4 + $0x1f8] sm:$0xf0]  ;;  %v6066_v34 = vld [vmem:[%s6956_s30 + $0x1cc] sm:$0xf0] }
 0x153   : > { %v4717_v62 = vor.u32 %v6007_v52, %v4716_v51  ;;  %v4465_v1 = vor.u32 %v5939_v53, %v4462_v56  ;;  %v4588_v41 = vld [vmem:[%s6947_s4 + $0x2d8] sm:$0xf]  ;;  %v4593_v52 = vor.u32 %v5971_v45, %v4590_v46  ;;  %v4302_v56 = vld [vmem:[%s6947_s4 + $0xb8] sm:$0xf0]  ;;  %v6030_v45 = vld [vmem:[%s6956_s30 + $0xac] sm:$0xf0] }
 0x154   : > { %v5975_v42 = vld [vmem:[%s6947_s4 + $0x2f4] sm:$0xf0]  ;;  %v4526_v6 = vld [vmem:[%s6947_s4 + $0x278] sm:$0xf0]  ;;  %v5092_v46 = vld [vmem:[%s6956_s30 + $0x2e0] sm:$0xf] }
 0x155   : > { %1565 = vmatpush.bf16.msra.mxu2 %v4357_v63  ;;  %1578 = vmatpush.bf16.msra.mxu3 %v4613_v0  ;;  %v4428_v63 = vld [vmem:[%s6947_s4 + $0x198] sm:$0xf]  ;;  %v4589_v48 = vor.u32 %v5975_v42, %v4588_v41  ;;  %v5947_v17 = vld [vmem:[%s6947_s4 + $0x21c] sm:$0xf]  ;;  %v5204_v42 = vld [vmem:[%s6956_s30 + $0x3c0] sm:$0xf] }
 0x156   : > { %1591 = vmatpush.bf16.msrb.mxu0 %v4361_v3  ;;  %1604 = vmatpush.bf16.msrb.mxu1 %v4617_v4  ;;  %v5935_v0 = vld [vmem:[%s6947_s4 + $0x1b4] sm:$0xf0]  ;;  %v4494_v18 = vld [vmem:[%s6947_s4 + $0x238] sm:$0xf0] }
 0x157   : > { %1518 = vmatmul.bf16.vlgmr.msrb.gmra.mxu2 %v7117_v23  ;;  %1544 = vmatmul.bf16.vlgmr.msra.gmra.mxu0 %v7117_v23  ;;  %v4684_v3 = vld [vmem:[%s6947_s4 + $0x398] sm:$0xf]  ;;  %v4429_v9 = vor.u32 %v5935_v0, %v4428_v63  ;;  %v4561_v0 = vor.u32 %v5963_v57, %v4558_v58  ;;  %v6098_v57 = vld [vmem:[%s6956_s30 + $0x2cc] sm:$0xf0] }
 0x158   : > { %1531 = vmatmul.bf16.vlgmr.msrb.gmra.mxu3 %v7119_v24  ;;  %1557 = vmatmul.bf16.vlgmr.msra.gmra.mxu1 %v7119_v24  ;;  %v5999_v4 = vld [vmem:[%s6947_s4 + $0x3b4] sm:$0xf0] }
 0x159   : > { %1566 = vmatpush.bf16.msra.mxu2 %v4325_v11  ;;  %1579 = vmatpush.bf16.msra.mxu3 %v4581_v12  ;;  %v4685_v10 = vor.u32 %v5999_v4, %v4684_v3  ;;  %v4396_v11 = vld [vmem:[%s6947_s4 + $0x158] sm:$0xf]  ;;  %v5891_v3 = vld [vmem:[%s6947_s4 + $0x5c] sm:$0xf] }
 0x15a   : > { %1592 = vmatpush.bf16.msrb.mxu0 %v4329_v15  ;;  %1605 = vmatpush.bf16.msrb.mxu1 %v4585_v16  ;;  %v5927_v12 = vld [vmem:[%s6947_s4 + $0x174] sm:$0xf0]  ;;  %v4270_v4 = vld [vmem:[%s6947_s4 + $0x78] sm:$0xf0] }
 0x15b   : > { %v4652_v15 = vld [vmem:[%s6947_s4 + $0x358] sm:$0xf]  ;;  %v4397_v21 = vor.u32 %v5927_v12, %v4396_v11  ;;  %v4273_v12 = vor.u32 %v5891_v3, %v4270_v4  ;;  %v6022_v3 = vld [vmem:[%s6956_s30 + $0x6c] sm:$0xf0]  ;;  %v5060_v4 = vld [vmem:[%s6956_s30 + $0x2a0] sm:$0xf] }
 0x15c   : > { %v5991_v16 = vld [vmem:[%s6947_s4 + $0x374] sm:$0xf0] }
 0x15d   : > { %1567 = vmatpush.bf16.msra.mxu2 %v4293_v25  ;;  %1580 = vmatpush.bf16.msra.mxu3 %v4549_v26  ;;  %v4653_v22 = vor.u32 %v5991_v16, %v4652_v15  ;;  %v4364_v25 = vld [vmem:[%s6947_s4 + $0x118] sm:$0xf]  ;;  %v5883_v15 = vld [vmem:[%s6947_s4 + $0x1c] sm:$0xf] }
 0x15e   : > { %1593 = vmatpush.bf16.msrb.mxu0 %v4297_v29  ;;  %1606 = vmatpush.bf16.msrb.mxu1 %v4553_v30  ;;  %v5919_v26 = vld [vmem:[%s6947_s4 + $0x134] sm:$0xf0]  ;;  %v4238_v16 = vld [vmem:[%s6947_s4 + $0x38] sm:$0xf0] }
 0x15f   : > { %v4620_v29 = vld [vmem:[%s6947_s4 + $0x318] sm:$0xf]  ;;  %v4365_v35 = vor.u32 %v5919_v26, %v4364_v25 }
 0x160   : > { %v5983_v30 = vld [vmem:[%s6947_s4 + $0x334] sm:$0xf0] }
 0x161   : > { %1568 = vmatpush.bf16.msra.mxu2 %v4261_v38  ;;  %1581 = vmatpush.bf16.msra.mxu3 %v4517_v39  ;;  %v4621_v36 = vor.u32 %v5983_v30, %v4620_v29  ;;  %v5911_v38 = vld [vmem:[%s6947_s4 + $0xf4] sm:$0xf0]  ;;  %v4369_v39 = vor.u32 %v5915_v31, %v4366_v32  ;;  %v4965_v29 = vor.u32 %v6070_v20, %v4964_v19  ;;  %v4948_v30 = vld [vmem:[%s6956_s30 + $0x1c0] sm:$0xf]  ;;  %v6046_v20 = vld [vmem:[%s6956_s30 + $0x12c] sm:$0xf0] }
 0x162   : > { %1594 = vmatpush.bf16.msrb.mxu0 %v4265_v43  ;;  %1607 = vmatpush.bf16.msrb.mxu1 %v4521_v44  ;;  %v5907_v43 = vld [vmem:[%s6947_s4 + $0xdc] sm:$0xf]  ;;  %v4333_v47 = vor.u32 %v5911_v38, %v4332_v37  ;;  %v4556_v53 = vld [vmem:[%s6947_s4 + $0x298] sm:$0xf]  ;;  %v5220_v32 = vld [vmem:[%s6956_s30 + $0x3e0] sm:$0xf] }
 0x163   : > { %v4334_v44 = vld [vmem:[%s6947_s4 + $0xf8] sm:$0xf0]  ;;  %v4492_v11 = vld [vmem:[%s6947_s4 + $0x218] sm:$0xf]  ;;  %v4932_v37 = vld [vmem:[%s6956_s30 + $0x1a0] sm:$0xf]  ;;  %v5221_v38 = vor.u32 %v6134_v33, %v5220_v32 }
 0x164   : > { %v4337_v51 = vor.u32 %v5907_v43, %v4334_v44  ;;  %v6130_v43 = vld [vmem:[%s6956_s30 + $0x3cc] sm:$0xf0]  ;;  %v4804_v44 = vld [vmem:[%s6956_s30 + $0xa0] sm:$0xf] }
 0x165   : > { %1569 = vmatpush.bf16.msra.mxu2 %v4229_v54  ;;  %1582 = vmatpush.bf16.msra.mxu3 %v4485_v55  ;;  %v5967_v54 = vld [vmem:[%s6947_s4 + $0x2b4] sm:$0xf0]  ;;  %v5899_v55 = vld [vmem:[%s6947_s4 + $0x9c] sm:$0xf]  ;;  %v6198_v32 = vld [vmem:[%s6956_s30 + $0x5ec] sm:$0xf0] }
 0x166   : > { %1595 = vmatpush.bf16.msrb.mxu0 %v4233_v59  ;;  %1608 = vmatpush.bf16.msrb.mxu1 %v4489_v60  ;;  %v4301_v59 = vor.u32 %v5903_v50, %v4300_v49  ;;  %v4557_v60 = vor.u32 %v5967_v54, %v4556_v53  ;;  %v4305_v63 = vor.u32 %v5899_v55, %v4302_v56  ;;  %v6058_v49 = vld [vmem:[%s6956_s30 + $0x18c] sm:$0xf0]  ;;  %v4788_v54 = vld [vmem:[%s6956_s30 + $0x80] sm:$0xf] }
 0x167   : > { %v5205_v50 = vor.u32 %v6130_v43, %v5204_v42  ;;  %v4805_v53 = vor.u32 %v6030_v45, %v4804_v44  ;;  %v5188_v55 = vld [vmem:[%s6956_s30 + $0x3a0] sm:$0xf]  ;;  %v6162_v42 = vld [vmem:[%s6956_s30 + $0x4cc] sm:$0xf0] }
 0x168   : > { %1570 = vmatmul.bf16.vlgmr.msra.gmra.mxu2 %v7117_v23  ;;  %1583 = vmatmul.bf16.vlgmr.msra.gmra.mxu3 %v7119_v24  ;;  %v5076_v56 = vld [vmem:[%s6956_s30 + $0x2c0] sm:$0xf] }
 0x169   : > { %1614 = vmatpush.bf16.msrb.mxu2 %v4461_v61  ;;  %1627 = vmatpush.bf16.msrb.mxu3 %v4717_v62  ;;  %v4268_v61 = vld [vmem:[%s6947_s4 + $0x58] sm:$0xf]  ;;  %v5077_v58 = vor.u32 %v6098_v57, %v5076_v56  ;;  %v5348_v33 = vld [vmem:[%s6956_s30 + $0x4e0] sm:$0xf]  ;;  %v6114_v57 = vld [vmem:[%s6956_s30 + $0x34c] sm:$0xf0] }
 0x16a   : > { %1640 = vmatpush.bf16.msra.mxu0 %v4465_v1  ;;  %1653 = vmatpush.bf16.msra.mxu1 %v4721_v2  ;;  %v5895_v62 = vld [vmem:[%s6947_s4 + $0x74] sm:$0xf0]  ;;  %v5444_v44 = vld [vmem:[%s6956_s30 + $0x5a0] sm:$0xf] }
 0x16b   : > { %1596 = vmatmul.bf16.vlgmr.msrb.gmra.mxu0 %v7117_v23  ;;  %1609 = vmatmul.bf16.vlgmr.msrb.gmra.mxu1 %v7119_v24  ;;  %v4524_v1 = vld [vmem:[%s6947_s4 + $0x258] sm:$0xf]  ;;  %v4269_v7 = vor.u32 %v5895_v62, %v4268_v61  ;;  %v5140_v56 = vld [vmem:[%s6956_s30 + $0x340] sm:$0xf] }
 0x16c   : > { %v5959_v2 = vld [vmem:[%s6947_s4 + $0x274] sm:$0xf0] }
 0x16d   : > { %1615 = vmatpush.bf16.msrb.mxu2 %v4429_v9  ;;  %1628 = vmatpush.bf16.msrb.mxu3 %v4685_v10  ;;  %v4525_v8 = vor.u32 %v5959_v2, %v4524_v1  ;;  %v4236_v9 = vld [vmem:[%s6947_s4 + $0x18] sm:$0xf]  ;;  %v5172_v1 = vld [vmem:[%s6956_s30 + $0x380] sm:$0xf]  ;;  %v6122_v2 = vld [vmem:[%s6956_s30 + $0x38c] sm:$0xf0] }
 0x16e   : > { %1641 = vmatpush.bf16.msra.mxu0 %v4433_v13  ;;  %1654 = vmatpush.bf16.msra.mxu1 %v4689_v14  ;;  %v5887_v10 = vld [vmem:[%s6947_s4 + $0x34] sm:$0xf0]  ;;  %v4529_v13 = vor.u32 %v5955_v5, %v4526_v6  ;;  %v6094_v5 = vld [vmem:[%s6956_s30 + $0x2ac] sm:$0xf0] }
 0x16f   : > { %v5951_v14 = vld [vmem:[%s6947_s4 + $0x234] sm:$0xf0]  ;;  %v4237_v25 = vor.u32 %v5887_v10, %v4236_v9  ;;  %v5061_v6 = vor.u32 %v6094_v5, %v5060_v4  ;;  %v4884_v9 = vld [vmem:[%s6956_s30 + $0x140] sm:$0xf]  ;;  %v6110_v5 = vld [vmem:[%s6956_s30 + $0x32c] sm:$0xf0] }
 0x170   : > { %v4493_v26 = vor.u32 %v5951_v14, %v4492_v11  ;;  %v5156_v11 = vld [vmem:[%s6956_s30 + $0x360] sm:$0xf] }
 0x171   : > { %1616 = vmatpush.bf16.msrb.mxu2 %v4397_v21  ;;  %1629 = vmatpush.bf16.msrb.mxu3 %v4653_v22  ;;  %v4836_v21 = vld [vmem:[%s6956_s30 + $0xe0] sm:$0xf]  ;;  %v6038_v22 = vld [vmem:[%s6956_s30 + $0xec] sm:$0xf0] }
 0x172   : > { %1642 = vmatpush.bf16.msra.mxu0 %v4401_v27  ;;  %1655 = vmatpush.bf16.msra.mxu1 %v4657_v28  ;;  %v4241_v27 = vor.u32 %v5883_v15, %v4238_v16  ;;  %v4497_v28 = vor.u32 %v5947_v17, %v4494_v18  ;;  %v4837_v31 = vor.u32 %v6038_v22, %v4836_v21  ;;  %v4756_v14 = vld [vmem:[%s6956_s30 + $0x40] sm:$0xf]  ;;  %v6018_v15 = vld [vmem:[%s6956_s30 + $0x4c] sm:$0xf0] }
 0x173   : > { %v4868_v18 = vld [vmem:[%s6956_s30 + $0x120] sm:$0xf]  ;;  %v4757_v19 = vor.u32 %v6018_v15, %v4756_v14  ;;  %v6014_v22 = vld [vmem:[%s6956_s30 + $0x2c] sm:$0xf0] }
 0x174   : > { %v4740_v21 = vld [vmem:[%s6956_s30 + $0x20] sm:$0xf]  ;;  %v6146_v15 = vld [vmem:[%s6956_s30 + $0x44c] sm:$0xf0] }
 0x175   : > { %1617 = vmatpush.bf16.msrb.mxu2 %v4365_v35  ;;  %1630 = vmatpush.bf16.msrb.mxu3 %v4621_v36  ;;  %v4820_v35 = vld [vmem:[%s6956_s30 + $0xc0] sm:$0xf]  ;;  %v6034_v36 = vld [vmem:[%s6956_s30 + $0xcc] sm:$0xf0] }
 0x176   : > { %1643 = vmatpush.bf16.msra.mxu0 %v4369_v39  ;;  %1656 = vmatpush.bf16.msra.mxu1 %v4625_v40  ;;  %v4949_v39 = vor.u32 %v6066_v34, %v4948_v30  ;;  %v6062_v40 = vld [vmem:[%s6956_s30 + $0x1ac] sm:$0xf0]  ;;  %v4821_v41 = vor.u32 %v6034_v36, %v4820_v35  ;;  %v4724_v30 = vld [vmem:[%s6956_s30] sm:$0xf] }
 0x177   : > { %v6166_v34 = vld [vmem:[%s6956_s30 + $0x4ec] sm:$0xf0]  ;;  %v5124_v4 = vld [vmem:[%s6956_s30 + $0x320] sm:$0xf] }
 0x178   : > { %v5268_v14 = vld [vmem:[%s6956_s30 + $0x440] sm:$0xf] }
 0x179   : > { %1618 = vmatpush.bf16.msrb.mxu2 %v4333_v47  ;;  %1631 = vmatpush.bf16.msrb.mxu3 %v4589_v48  ;;  %v6102_v47 = vld [vmem:[%s6956_s30 + $0x2ec] sm:$0xf0]  ;;  %v4916_v48 = vld [vmem:[%s6956_s30 + $0x180] sm:$0xf] }
 0x17a   : > { %1644 = vmatpush.bf16.msra.mxu0 %v4337_v51  ;;  %1657 = vmatpush.bf16.msra.mxu1 %v4593_v52  ;;  %v5093_v51 = vor.u32 %v6102_v47, %v5092_v46  ;;  %v4933_v52 = vor.u32 %v6062_v40, %v4932_v37  ;;  %v4917_v62 = vor.u32 %v6058_v49, %v4916_v48  ;;  %v6194_v40 = vld [vmem:[%s6956_s30 + $0x5cc] sm:$0xf0]  ;;  %v5316_v47 = vld [vmem:[%s6956_s30 + $0x4a0] sm:$0xf] }
 0x17b   : > { %v6190_v46 = vld [vmem:[%s6956_s30 + $0x5ac] sm:$0xf0]  ;;  %v5044_v49 = vld [vmem:[%s6956_s30 + $0x280] sm:$0xf] }
 0x17c   : > { %v6158_v48 = vld [vmem:[%s6956_s30 + $0x4ac] sm:$0xf0] }
 0x17d   : > { %1619 = vmatpush.bf16.msrb.mxu2 %v4301_v59  ;;  %1632 = vmatpush.bf16.msrb.mxu3 %v4557_v60  ;;  %v4900_v59 = vld [vmem:[%s6956_s30 + $0x160] sm:$0xf]  ;;  %v6054_v60 = vld [vmem:[%s6956_s30 + $0x16c] sm:$0xf0] }
 0x17e   : > { %1645 = vmatpush.bf16.msra.mxu0 %v4305_v63  ;;  %1658 = vmatpush.bf16.msra.mxu1 %v4561_v0  ;;  %v4772_v0 = vld [vmem:[%s6956_s30 + $0x60] sm:$0xf] }
 0x17f   : > { %v4773_v10 = vor.u32 %v6022_v3, %v4772_v0  ;;  %v6150_v3 = vld [vmem:[%s6956_s30 + $0x46c] sm:$0xf0] }
 0x181   : > { %1620 = vmatpush.bf16.msrb.mxu2 %v4269_v7  ;;  %1633 = vmatpush.bf16.msrb.mxu3 %v4525_v8  ;;  %v5173_v7 = vor.u32 %v6122_v2, %v5172_v1  ;;  %v4901_v8 = vor.u32 %v6054_v60, %v4900_v59  ;;  %v5028_v59 = vld [vmem:[%s6956_s30 + $0x260] sm:$0xf]  ;;  %v6086_v60 = vld [vmem:[%s6956_s30 + $0x26c] sm:$0xf0] }
 0x182   : > { %1646 = vmatpush.bf16.msra.mxu0 %v4273_v12  ;;  %1659 = vmatpush.bf16.msra.mxu1 %v4529_v13  ;;  %v6118_v12 = vld [vmem:[%s6956_s30 + $0x36c] sm:$0xf0]  ;;  %v5029_v1 = vor.u32 %v6086_v60, %v5028_v59  ;;  %v5284_v2 = vld [vmem:[%s6956_s30 + $0x460] sm:$0xf] }
 0x183   : > { %v6050_v13 = vld [vmem:[%s6956_s30 + $0x14c] sm:$0xf0]  ;;  %v5157_v16 = vor.u32 %v6118_v12, %v5156_v11  ;;  %v5285_v12 = vor.u32 %v6150_v3, %v5284_v2 }
 0x184   : > { %v4885_v17 = vor.u32 %v6050_v13, %v4884_v9  ;;  %v6178_v11 = vld [vmem:[%s6956_s30 + $0x54c] sm:$0xf0] }
 0x185   : > { %1621 = vmatpush.bf16.msrb.mxu2 %v4237_v25  ;;  %1634 = vmatpush.bf16.msrb.mxu3 %v4493_v26  ;;  %v4869_v25 = vor.u32 %v6046_v20, %v4868_v18  ;;  %v4852_v26 = vld [vmem:[%s6956_s30 + $0x100] sm:$0xf]  ;;  %v7368_v59 = vld [vmem:[%s6949_s24] sm:$0xff] }
 0x186   : > { %1647 = vmatpush.bf16.msra.mxu0 %v4241_v27  ;;  %1660 = vmatpush.bf16.msra.mxu1 %v4497_v28  ;;  %v6042_v27 = vld [vmem:[%s6956_s30 + $0x10c] sm:$0xf0]  ;;  %v4741_v28 = vor.u32 %v6014_v22, %v4740_v21  ;;  %v4996_v22 = vld [vmem:[%s6956_s30 + $0x220] sm:$0xf] }
 0x187   : > { %v4853_v35 = vor.u32 %v6042_v27, %v4852_v26  ;;  %v6262_v21 = vld [vmem:[%s6956_s30 + $0x7ec] sm:$0xf0]  ;;  %v5380_v26 = vld [vmem:[%s6956_s30 + $0x520] sm:$0xf] }
 0x188   : > { %1622 = vmatmul.bf16.vlgmr.msrb.gmra.mxu2 %v7117_v23  ;;  %1635 = vmatmul.bf16.vlgmr.msrb.gmra.mxu3 %v7119_v24  ;;  %v6174_v27 = vld [vmem:[%s6956_s30 + $0x52c] sm:$0xf0] }
 0x189   : > { %3241 = vmatpush.bf16.msra.mxu3 %v4965_v29  ;;  %3228 = vmatpush.bf16.msra.mxu2 %v4837_v31  ;;  %v5476_v29 = vld [vmem:[%s6956_s30 + $0x5e0] sm:$0xf]  ;;  %v6010_v31 = vld [vmem:[%s6956_s30 + $0xc] sm:$0xf0] }
 0x18a   : > { %1648 = vmatmul.bf16.vlgmr.msra.gmra.mxu0 %v7117_v23  ;;  %1661 = vmatmul.bf16.vlgmr.msra.gmra.mxu1 %v7119_v24  ;;  %v6126_v23 = vld [vmem:[%s6956_s30 + $0x3ac] sm:$0xf0]  ;;  %v4725_v36 = vor.u32 %v6010_v31, %v4724_v30  ;;  %v5477_v37 = vor.u32 %v6198_v32, %v5476_v29  ;;  %v5252_v31 = vld [vmem:[%s6956_s30 + $0x420] sm:$0xf] }
 0x18b   : > { %3267 = vmatpush.bf16.msrb.mxu1 %v5221_v38  ;;  %v6026_v24 = vld [vmem:[%s6956_s30 + $0x8c] sm:$0xf0]  ;;  %3254 = vmatpush.bf16.msrb.mxu0 %v5093_v51  ;;  %v5189_v61 = vor.u32 %v6126_v23, %v5188_v55  ;;  %v5460_v38 = vld [vmem:[%s6956_s30 + $0x5c0] sm:$0xf]  ;;  %v5445_v51 = vor.u32 %v6190_v46, %v5444_v44 }
 0x18c   : > { %v4789_v63 = vor.u32 %v6026_v24, %v4788_v54  ;;  %v5461_v43 = vor.u32 %v6194_v40, %v5460_v38  ;;  %v5317_v54 = vor.u32 %v6158_v48, %v5316_v47  ;;  %v5300_v23 = vld [vmem:[%s6956_s30 + $0x480] sm:$0xf]  ;;  %v6154_v24 = vld [vmem:[%s6956_s30 + $0x48c] sm:$0xf0]  ;;  %v5381_v38 = vor.u32 %v6174_v27, %v5380_v26 }
 0x18d   : > { %3242 = vmatpush.bf16.msra.mxu3 %v4949_v39  ;;  %3229 = vmatpush.bf16.msra.mxu2 %v4821_v41  ;;  %v5349_v39 = vor.u32 %v6166_v34, %v5348_v33  ;;  %v5332_v41 = vld [vmem:[%s6956_s30 + $0x4c0] sm:$0xf]  ;;  %v5301_v0 = vor.u32 %v6154_v24, %v5300_v23  ;;  %v6142_v32 = vld [vmem:[%s6956_s30 + $0x42c] sm:$0xf0] }
 0x18e   : > { %v5333_v45 = vor.u32 %v6162_v42, %v5332_v41  ;;  %v5716_v33 = vld [vmem:[%s6956_s30 + $0x7c0] sm:$0xf]  ;;  %v6258_v34 = vld [vmem:[%s6956_s30 + $0x7cc] sm:$0xf0]  ;;  %v5253_v41 = vor.u32 %v6142_v32, %v5252_v31  ;;  %v4950_v32 = vld [vmem:[%s6956_s30 + $0x1d0] sm:$0xf0] }
 0x18f   : > { %3268 = vmatpush.bf16.msrb.mxu1 %v5205_v50  ;;  %3255 = vmatpush.bf16.msrb.mxu0 %v5077_v58  ;;  %v6090_v50 = vld [vmem:[%s6956_s30 + $0x28c] sm:$0xf0]  ;;  %v5141_v58 = vor.u32 %v6114_v57, %v5140_v56  ;;  %v5700_v48 = vld [vmem:[%s6956_s30 + $0x7a0] sm:$0xf] }
 0x190   : > { %v5045_v55 = vor.u32 %v6090_v50, %v5044_v49  ;;  %v6170_v40 = vld [vmem:[%s6956_s30 + $0x50c] sm:$0xf0]  ;;  %v5684_v23 = vld [vmem:[%s6956_s30 + $0x780] sm:$0xf] }
 0x191   : > { %3243 = vmatpush.bf16.msra.mxu3 %v4933_v52  ;;  %3230 = vmatpush.bf16.msra.mxu2 %v4805_v53  ;;  %v5428_v52 = vld [vmem:[%s6956_s30 + $0x580] sm:$0xf]  ;;  %v6186_v53 = vld [vmem:[%s6956_s30 + $0x58c] sm:$0xf0] }
 0x192   : > { %v6138_v44 = vld [vmem:[%s6956_s30 + $0x40c] sm:$0xf0]  ;;  %v5572_v57 = vld [vmem:[%s6956_s30 + $0x6a0] sm:$0xf] }
 0x193   : > { %3269 = vmatpush.bf16.msrb.mxu1 %v5189_v61  ;;  %3256 = vmatpush.bf16.msrb.mxu0 %v5061_v6  ;;  %v5429_v61 = vor.u32 %v6186_v53, %v5428_v52  ;;  %v5125_v6 = vor.u32 %v6110_v5, %v5124_v4  ;;  %v6230_v46 = vld [vmem:[%s6956_s30 + $0x6ec] sm:$0xf0]  ;;  %v5588_v53 = vld [vmem:[%s6956_s30 + $0x6c0] sm:$0xf] }
 0x194   : > { %v6254_v49 = vld [vmem:[%s6956_s30 + $0x7ac] sm:$0xf0]  ;;  %v5652_v4 = vld [vmem:[%s6956_s30 + $0x740] sm:$0xf] }
 0x195   : > { %3244 = vmatpush.bf16.msra.mxu3 %v4917_v62  ;;  %3231 = vmatpush.bf16.msra.mxu2 %v4789_v63  ;;  %v5412_v62 = vld [vmem:[%s6956_s30 + $0x560] sm:$0xf]  ;;  %v6182_v63 = vld [vmem:[%s6956_s30 + $0x56c] sm:$0xf0]  ;;  %v5701_v50 = vor.u32 %v6254_v49, %v5700_v48 }
 0x196   : > { %v5413_v9 = vor.u32 %v6182_v63, %v5412_v62  ;;  %v6250_v24 = vld [vmem:[%s6956_s30 + $0x78c] sm:$0xf0] }
 0x197   : > { %3270 = vmatpush.bf16.msrb.mxu1 %v5173_v7  ;;  %3257 = vmatpush.bf16.msrb.mxu0 %v5045_v55  ;;  %v5012_v7 = vld [vmem:[%s6956_s30 + $0x240] sm:$0xf]  ;;  %v5685_v56 = vor.u32 %v6250_v24, %v5684_v23  ;;  %v6246_v62 = vld [vmem:[%s6956_s30 + $0x76c] sm:$0xf0] }
 0x198   : > { %v6218_v2 = vld [vmem:[%s6956_s30 + $0x68c] sm:$0xf0] }
 0x199   : > { %3245 = vmatpush.bf16.msra.mxu3 %v4901_v8  ;;  %3232 = vmatpush.bf16.msra.mxu2 %v4773_v10  ;;  %v6082_v8 = vld [vmem:[%s6956_s30 + $0x24c] sm:$0xf0]  ;;  %v5396_v10 = vld [vmem:[%s6956_s30 + $0x540] sm:$0xf] }
 0x19a   : > { %v5013_v13 = vor.u32 %v6082_v8, %v5012_v7  ;;  %v5397_v20 = vor.u32 %v6178_v11, %v5396_v10  ;;  %v6242_v5 = vld [vmem:[%s6956_s30 + $0x74c] sm:$0xf0]  ;;  %v5540_v10 = vld [vmem:[%s6956_s30 + $0x660] sm:$0xf] }
 0x19b   : > { %3271 = vmatpush.bf16.msrb.mxu1 %v5157_v16  ;;  %3258 = vmatpush.bf16.msrb.mxu0 %v5029_v1  ;;  %v5108_v16 = vld [vmem:[%s6956_s30 + $0x300] sm:$0xf]  ;;  %v803_v1 = vperm.slane %v7368_v59, 1  ;;  %v6214_v11 = vld [vmem:[%s6956_s30 + $0x66c] sm:$0xf0] }
 0x19c   : > { %v6210_v26 = vld [vmem:[%s6956_s30 + $0x64c] sm:$0xf0] }
 0x19d   : > { %3246 = vmatpush.bf16.msra.mxu3 %v4885_v17  ;;  %3233 = vmatpush.bf16.msra.mxu2 %v4757_v19  ;;  %v6106_v17 = vld [vmem:[%s6956_s30 + $0x30c] sm:$0xf0]  ;;  %v5732_v19 = vld [vmem:[%s6956_s30 + $0x7e0] sm:$0xf] }
 0x19e   : > { %v5109_v18 = vor.u32 %v6106_v17, %v5108_v16  ;;  %v5733_v29 = vor.u32 %v6262_v21, %v5732_v19  ;;  %v4966_v16 = vld [vmem:[%s6956_s30 + $0x1f0] sm:$0xf0]  ;;  %v5636_v17 = vld [vmem:[%s6956_s30 + $0x720] sm:$0xf]  ;;  %v6202_v23 = vld [vmem:[%s6956_s30 + $0x60c] sm:$0xf0] }
 0x19f   : > { %3272 = vmatpush.bf16.msrb.mxu1 %v5141_v58  ;;  %3259 = vmatpush.bf16.msrb.mxu0 %v5013_v13  ;;  %v6222_v58 = vld [vmem:[%s6956_s30 + $0x6ac] sm:$0xf0]  ;;  %v6068_v13 = vld [vmem:[%s6956_s30 + $0x1e4] sm:$0xf] }
 0x1a0   : > { %v5573_v60 = vor.u32 %v6222_v58, %v5572_v57  ;;  %v6056_v57 = vld [vmem:[%s6956_s30 + $0x184] sm:$0xf]  ;;  %v4918_v58 = vld [vmem:[%s6956_s30 + $0x190] sm:$0xf0] }
 0x1a1   : > { %3247 = vmatpush.bf16.msra.mxu3 %v4869_v25  ;;  %3234 = vmatpush.bf16.msra.mxu2 %v4741_v28  ;;  %v6078_v25 = vld [vmem:[%s6956_s30 + $0x22c] sm:$0xf0]  ;;  %v5269_v28 = vor.u32 %v6146_v15, %v5268_v14  ;;  %v5541_v14 = vor.u32 %v6214_v11, %v5540_v10  ;;  %v6024_v10 = vld [vmem:[%s6956_s30 + $0x84] sm:$0xf]  ;;  %v4790_v11 = vld [vmem:[%s6956_s30 + $0x90] sm:$0xf0] }
 0x1a2   : > { %v4997_v30 = vor.u32 %v6078_v25, %v4996_v22  ;;  %v5524_v25 = vld [vmem:[%s6956_s30 + $0x640] sm:$0xf] }
 0x1a3   : > { %3273 = vmatpush.bf16.msrb.mxu1 %v5125_v6  ;;  %v5653_v6 = vor.u32 %v6242_v5, %v5652_v4  ;;  %v6052_v4 = vld [vmem:[%s6956_s30 + $0x164] sm:$0xf] }
 0x1a4   : > { %3260 = vmatpush.bf16.msrb.mxu0 %v4997_v30  ;;  %v5525_v30 = vor.u32 %v6210_v26, %v5524_v25 }
 0x1a5   : > { %3248 = vmatpush.bf16.msra.mxu3 %v4853_v35  ;;  %3235 = vmatpush.bf16.msra.mxu2 %v4725_v36  ;;  %v5717_v35 = vor.u32 %v6258_v34, %v5716_v33  ;;  %v4980_v36 = vld [vmem:[%s6956_s30 + $0x200] sm:$0xf]  ;;  %v6234_v34 = vld [vmem:[%s6956_s30 + $0x70c] sm:$0xf0] }
 0x1a6   : > { %v5620_v33 = vld [vmem:[%s6956_s30 + $0x700] sm:$0xf] }
 0x1a7   : > { %3274 = vmatpush.bf16.msrb.mxu1 %v5109_v18  ;;  %v6238_v18 = vld [vmem:[%s6956_s30 + $0x72c] sm:$0xf0] }
 0x1a8   : > { %v5637_v19 = vor.u32 %v6238_v18, %v5636_v17 }
 0x1a9   : > { %3293 = vmatpush.bf16.msrb.mxu3 %v5477_v37  ;;  %3280 = vmatpush.bf16.msrb.mxu2 %v5349_v39  ;;  %v6074_v37 = vld [vmem:[%s6956_s30 + $0x20c] sm:$0xf0]  ;;  %v5364_v39 = vld [vmem:[%s6956_s30 + $0x500] sm:$0xf] }
 0x1aa   : > { %v4981_v42 = vor.u32 %v6074_v37, %v4980_v36 }
 0x1ab   : > { %3319 = vmatpush.bf16.msra.mxu1 %v5733_v29  ;;  %v6064_v29 = vld [vmem:[%s6956_s30 + $0x1c4] sm:$0xf] }
 0x1ac   : > { %3261 = vmatpush.bf16.msrb.mxu0 %v4981_v42 }
 0x1ad   : > { %3294 = vmatpush.bf16.msrb.mxu3 %v5461_v43  ;;  %3281 = vmatpush.bf16.msrb.mxu2 %v5333_v45  ;;  %v5236_v43 = vld [vmem:[%s6956_s30 + $0x400] sm:$0xf] }
 0x1ae   : > { %v5604_v45 = vld [vmem:[%s6956_s30 + $0x6e0] sm:$0xf]  ;;  %v5237_v52 = vor.u32 %v6138_v44, %v5236_v43  ;;  %v4953_v43 = vor.u32 %v6064_v29, %v4950_v32  ;;  %v6206_v44 = vld [vmem:[%s6956_s30 + $0x62c] sm:$0xf0]  ;;  %v6128_v29 = vld [vmem:[%s6956_s30 + $0x3c4] sm:$0xf] }
 0x1af   : > { %3320 = vmatpush.bf16.msra.mxu1 %v5717_v35  ;;  %v5605_v47 = vor.u32 %v6230_v46, %v5604_v45  ;;  %v6060_v46 = vld [vmem:[%s6956_s30 + $0x1a4] sm:$0xf] }
 0x1b0   : > { %v6100_v32 = vld [vmem:[%s6956_s30 + $0x2e4] sm:$0xf] }
 0x1b1   : > { %3295 = vmatpush.bf16.msrb.mxu3 %v5445_v51  ;;  %3282 = vmatpush.bf16.msrb.mxu2 %v5317_v54  ;;  %v5365_v51 = vor.u32 %v6170_v40, %v5364_v39  ;;  %v6226_v54 = vld [vmem:[%s6956_s30 + $0x6cc] sm:$0xf0]  ;;  %v4838_v39 = vld [vmem:[%s6956_s30 + $0xf0] sm:$0xf0]  ;;  %v5621_v40 = vor.u32 %v6234_v34, %v5620_v33 }
 0x1b2   : > { %3306 = vmatpush.bf16.msra.mxu0 %v5605_v47  ;;  %v5589_v55 = vor.u32 %v6226_v54, %v5588_v53  ;;  %v4934_v47 = vld [vmem:[%s6956_s30 + $0x1b0] sm:$0xf0]  ;;  %v805_v54 = vperm.slane %v7368_v59, 3 }
 0x1b3   : > { %3321 = vmatpush.bf16.msra.mxu1 %v5701_v50  ;;  %v6032_v50 = vld [vmem:[%s6956_s30 + $0xc4] sm:$0xf]  ;;  %v4937_v24 = vor.u32 %v6060_v46, %v4934_v47  ;;  %v5094_v33 = vld [vmem:[%s6956_s30 + $0x2f0] sm:$0xf0] }
 0x1b5   : > { %3296 = vmatpush.bf16.msrb.mxu3 %v5429_v61  ;;  %3283 = vmatpush.bf16.msrb.mxu2 %v5301_v0  ;;  %v5668_v61 = vld [vmem:[%s6956_s30 + $0x760] sm:$0xf] }
 0x1b6   : > { %3307 = vmatpush.bf16.msra.mxu0 %v5589_v55  ;;  %v5669_v63 = vor.u32 %v6246_v62, %v5668_v61  ;;  %v5556_v0 = vld [vmem:[%s6956_s30 + $0x680] sm:$0xf] }
 0x1b7   : > { %3322 = vmatpush.bf16.msra.mxu1 %v5685_v56  ;;  %v5557_v3 = vor.u32 %v6218_v2, %v5556_v0  ;;  %v5492_v55 = vld [vmem:[%s6956_s30 + $0x600] sm:$0xf]  ;;  %v4806_v0 = vld [vmem:[%s6956_s30 + $0xb0] sm:$0xf0]  ;;  %v804_v2 = vperm.slane %v7368_v59, 2 }
 0x1b9   : > { %3297 = vmatpush.bf16.msrb.mxu3 %v5413_v9  ;;  %3284 = vmatpush.bf16.msrb.mxu2 %v5285_v12  ;;  %v802_v12 = vperm.slane %v7368_v59, 0 }
 0x1ba   : > { %3308 = vmatpush.bf16.msra.mxu0 %v5573_v60  ;;  %v5493_v60 = vor.u32 %v6202_v23, %v5492_v55  ;;  %v4854_v55 = vld [vmem:[%s6956_s30 + $0x110] sm:$0xf0]  ;;  %v6012_v23 = vld [vmem:[%s6956_s30 + $0x24] sm:$0xf] }
 0x1bb   : > { %3323 = vmatpush.bf16.msra.mxu1 %v5669_v63  ;;  %v6028_v63 = vld [vmem:[%s6956_s30 + $0xa4] sm:$0xf] }
 0x1bd   : > { %3298 = vmatpush.bf16.msrb.mxu3 %v5397_v20  ;;  %3285 = vmatpush.bf16.msrb.mxu2 %v5269_v28  ;;  %v4969_v28 = vor.u32 %v6068_v13, %v4966_v16 }
 0x1be   : > { %3309 = vmatpush.bf16.msra.mxu0 %v5557_v3  ;;  %v4921_v3 = vor.u32 %v6056_v57, %v4918_v58  ;;  %v6120_v58 = vld [vmem:[%s6956_s30 + $0x384] sm:$0xf] }
 0x1bf   : > { %3324 = vmatpush.bf16.msra.mxu1 %v5653_v6  ;;  %v4809_v6 = vor.u32 %v6028_v63, %v4806_v0 }
 0x1c1   : > { %3299 = vmatpush.bf16.msrb.mxu3 %v5381_v38  ;;  %3286 = vmatpush.bf16.msrb.mxu2 %v5253_v41  ;;  %v6036_v38 = vld [vmem:[%s6956_s30 + $0xe4] sm:$0xf]  ;;  %v5508_v41 = vld [vmem:[%s6956_s30 + $0x620] sm:$0xf] }
 0x1c2   : > { %3310 = vmatpush.bf16.msra.mxu0 %v5541_v14  ;;  %v4841_v45 = vor.u32 %v6036_v38, %v4838_v39  ;;  %v5509_v48 = vor.u32 %v6206_v44, %v5508_v41  ;;  %v4870_v38 = vld [vmem:[%s6956_s30 + $0x130] sm:$0xf0]  ;;  %v6016_v39 = vld [vmem:[%s6956_s30 + $0x44] sm:$0xf] }
 0x1c3   : > { %3325 = vmatpush.bf16.msra.mxu1 %v5637_v19  ;;  %v4793_v19 = vor.u32 %v6024_v10, %v4790_v11  ;;  %v6124_v44 = vld [vmem:[%s6956_s30 + $0x3a4] sm:$0xf]  ;;  %v5478_v11 = vld [vmem:[%s6956_s30 + $0x5f0] sm:$0xf0] }
 0x1c4   : > { %v1493_v7 = vpop.f32.mrf.mxu0 }
 0x1c5   : > { %3300 = vmatpush.bf16.msrb.mxu3 %v5365_v51  ;;  %3287 = vmatpush.bf16.msrb.mxu2 %v5237_v52  ;;  %v1506_v8 = vpop.f32.mrf.mxu1  ;;  %v1494_v9 = vadd.f32 %v1493_v7, %v803_v1  ;;  %v4822_v51 = vld [vmem:[%s6956_s30 + $0xd0] sm:$0xf0] }
 0x1c6   : > { %3311 = vmatpush.bf16.msra.mxu0 %v5525_v30  ;;  %v4825_v56 = vor.u32 %v6032_v50, %v4822_v51  ;;  %v4902_v7 = vld [vmem:[%s6956_s30 + $0x170] sm:$0xf0]  ;;  %v807_v51 = vperm.slane %v7368_v59, 5 }
 0x1c7   : > { %v1507_v15 = vadd.f32 %v1506_v8, %v1494_v9  ;;  %3326 = vmatpush.bf16.msra.mxu1 %v5621_v40  ;;  %v6132_v8 = vld [vmem:[%s6956_s30 + $0x3e4] sm:$0xf]  ;;  %v5222_v9 = vld [vmem:[%s6956_s30 + $0x3f0] sm:$0xf0]  ;;  %v4905_v16 = vor.u32 %v6052_v4, %v4902_v7 }
 0x1c8   : > { %v5225_v17 = vor.u32 %v6132_v8, %v5222_v9  ;;  %v5206_v30 = vld [vmem:[%s6956_s30 + $0x3d0] sm:$0xf0]  ;;  %v6008_v7 = vld [vmem:[%s6956_s30 + $0x4] sm:$0xf] }
 0x1c9   : > { %v1667_v20 = vmax.f32 %v1507_v15, 0.0  ;;  %v5209_v40 = vor.u32 %v6128_v29, %v5206_v30  ;;  %v5078_v50 = vld [vmem:[%s6956_s30 + $0x2d0] sm:$0xf0]  ;;  %v6164_v29 = vld [vmem:[%s6956_s30 + $0x4e4] sm:$0xf] }
 0x1ca   : > { %v1467_v21 = vpop.f32.mrf.mxu2  ;;  %3312 = vmatpush.bf16.msra.mxu0 %v5509_v48  ;;  %v6096_v48 = vld [vmem:[%s6956_s30 + $0x2c4] sm:$0xf]  ;;  %v4726_v8 = vld [vmem:[%s6956_s30 + $0x10] sm:$0xf0] }
 0x1cb   : > { %v1480_v22 = vpop.f32.mrf.mxu3  ;;  %v1468_v27 = vadd.f32 %v1467_v21, %v802_v12  ;;  %v7387_v31 = vpack.c.bf16 %v1667_v20, %v1667_v20  ;;  %v6048_v20 = vld [vmem:[%s6956_s30 + $0x144] sm:$0xf]  ;;  %v4886_v21 = vld [vmem:[%s6956_s30 + $0x150] sm:$0xf0]  ;;  %v5081_v57 = vor.u32 %v6096_v48, %v5078_v50 }
 0x1cc   : > { %v1495_v36 = vpop.f32.mrf.mxu0  ;;  %v5334_v50 = vld [vmem:[%s6956_s30 + $0x4d0] sm:$0xf0] }
 0x1cd   : > { %v1481_v35 = vadd.f32 %v1480_v22, %v1468_v27  ;;  %v1508_v37 = vpop.f32.mrf.mxu1  ;;  %3249 = vmatmul.bf16.vlgmr.msra.gmra.mxu3 %v7387_v31  ;;  %v6020_v22 = vld [vmem:[%s6956_s30 + $0x64] sm:$0xf] }
 0x1ce   : > { %3345 = vmatpush.bf16.msra.mxu3 %v4969_v28  ;;  %3313 = vmatpush.bf16.msra.mxu0 %v5493_v60  ;;  %v4774_v28 = vld [vmem:[%s6956_s30 + $0x70] sm:$0xf0]  ;;  %v6044_v37 = vld [vmem:[%s6956_s30 + $0x124] sm:$0xf] }
 0x1cf   : > { %v1666_v42 = vmax.f32 %v1481_v35, 0.0  ;;  %v4889_v35 = vor.u32 %v6048_v20, %v4886_v21  ;;  %v4777_v36 = vor.u32 %v6020_v22, %v4774_v28  ;;  %v5174_v60 = vld [vmem:[%s6956_s30 + $0x390] sm:$0xf0]  ;;  %v4729_v20 = vor.u32 %v6008_v7, %v4726_v8  ;;  %v6180_v7 = vld [vmem:[%s6956_s30 + $0x564] sm:$0xf] }
 0x1d0   : > { %v5462_v28 = vld [vmem:[%s6956_s30 + $0x5d0] sm:$0xf0] }
 0x1d1   : > { %v7399_v49 = vpack.c.bf16 %v1666_v42, %v1666_v42  ;;  %v4758_v42 = vld [vmem:[%s6956_s30 + $0x50] sm:$0xf0] }
 0x1d2   : > { %v1469_v52 = vpop.f32.mrf.mxu2  ;;  %3346 = vmatpush.bf16.msra.mxu3 %v4953_v43  ;;  %v5097_v43 = vor.u32 %v6100_v32, %v5094_v33  ;;  %v5414_v8 = vld [vmem:[%s6956_s30 + $0x570] sm:$0xf0] }
 0x1d3   : > { %v1482_v53 = vpop.f32.mrf.mxu3  ;;  %3236 = vmatmul.bf16.vlgmr.msra.gmra.mxu2 %v7399_v49  ;;  %v4873_v52 = vor.u32 %v6044_v37, %v4870_v38  ;;  %v5142_v37 = vld [vmem:[%s6956_s30 + $0x350] sm:$0xf0]  ;;  %v6084_v38 = vld [vmem:[%s6956_s30 + $0x264] sm:$0xf] }
 0x1d4   : > { %3332 = vmatpush.bf16.msra.mxu2 %v4841_v45  ;;  %v1545_v61 = vpop.f32.mrf.mxu0  ;;  %v5190_v45 = vld [vmem:[%s6956_s30 + $0x3b0] sm:$0xf0]  ;;  %v4761_v53 = vor.u32 %v6016_v39, %v4758_v42 }
 0x1d5   : > { %v1558_v62 = vpop.f32.mrf.mxu1  ;;  %v1546_v1 = vadd.f32 %v1545_v61, %v805_v54  ;;  %v6040_v54 = vld [vmem:[%s6956_s30 + $0x104] sm:$0xf]  ;;  %v5030_v39 = vld [vmem:[%s6956_s30 + $0x270] sm:$0xf0] }
 0x1d6   : > { %3347 = vmatpush.bf16.msra.mxu3 %v4937_v24  ;;  %v5193_v24 = vor.u32 %v6124_v44, %v5190_v45  ;;  %v6092_v61 = vld [vmem:[%s6956_s30 + $0x2a4] sm:$0xf]  ;;  %v5446_v45 = vld [vmem:[%s6956_s30 + $0x5b0] sm:$0xf0] }
 0x1d7   : > { %v1559_v5 = vadd.f32 %v1558_v62, %v1546_v1  ;;  %v5062_v62 = vld [vmem:[%s6956_s30 + $0x2b0] sm:$0xf0]  ;;  %v4857_v1 = vor.u32 %v6040_v54, %v4854_v55  ;;  %v6188_v44 = vld [vmem:[%s6956_s30 + $0x5a4] sm:$0xf] }
 0x1d8   : > { %3333 = vmatpush.bf16.msra.mxu2 %v4825_v56  ;;  %v4742_v56 = vld [vmem:[%s6956_s30 + $0x30] sm:$0xf0]  ;;  %v5065_v9 = vor.u32 %v6092_v61, %v5062_v62  ;;  %v6156_v61 = vld [vmem:[%s6956_s30 + $0x4a4] sm:$0xf] }
 0x1d9   : > { %v1669_v12 = vmax.f32 %v1559_v5, 0.0  ;;  %v4745_v4 = vor.u32 %v6012_v23, %v4742_v56  ;;  %v5177_v5 = vor.u32 %v6120_v58, %v5174_v60  ;;  %v6080_v23 = vld [vmem:[%s6956_s30 + $0x244] sm:$0xf]  ;;  %v5449_v56 = vor.u32 %v6188_v44, %v5446_v45  ;;  %v5430_v60 = vld [vmem:[%s6956_s30 + $0x590] sm:$0xf0] }
 0x1da   : > { %v1519_v13 = vpop.f32.mrf.mxu2  ;;  %3348 = vmatpush.bf16.msra.mxu3 %v4921_v3  ;;  %v806_v3 = vperm.slane %v7368_v59, 4  ;;  %v6184_v58 = vld [vmem:[%s6956_s30 + $0x584] sm:$0xf]  ;;  %v5734_v45 = vld [vmem:[%s6956_s30 + $0x7f0] sm:$0xf0] }
 0x1db   : > { %v1532_v14 = vpop.f32.mrf.mxu3  ;;  %v1520_v15 = vadd.f32 %v1519_v13, %v804_v2  ;;  %v7418_v18 = vpack.c.bf16 %v1669_v12, %v1669_v12  ;;  %v6116_v12 = vld [vmem:[%s6956_s30 + $0x364] sm:$0xf]  ;;  %v5158_v13 = vld [vmem:[%s6956_s30 + $0x370] sm:$0xf0] }
 0x1dc   : > { %3334 = vmatpush.bf16.msra.mxu2 %v4809_v6  ;;  %v1547_v26 = vpop.f32.mrf.mxu0  ;;  %v6196_v6 = vld [vmem:[%s6956_s30 + $0x5e4] sm:$0xf] }
 0x1dd   : > { %v1533_v25 = vadd.f32 %v1532_v14, %v1520_v15  ;;  %v1560_v27 = vpop.f32.mrf.mxu1  ;;  %3275 = vmatmul.bf16.vlgmr.msrb.gmra.mxu1 %v7418_v18  ;;  %v6088_v14 = vld [vmem:[%s6956_s30 + $0x284] sm:$0xf]  ;;  %v5046_v15 = vld [vmem:[%s6956_s30 + $0x290] sm:$0xf0]  ;;  %v5481_v22 = vor.u32 %v6196_v6, %v5478_v11 }
 0x1de   : > { %3349 = vmatpush.bf16.msra.mxu3 %v4905_v16  ;;  %3371 = vmatpush.bf16.msrb.mxu1 %v5225_v17  ;;  %v6192_v27 = vld [vmem:[%s6956_s30 + $0x5c4] sm:$0xf]  ;;  %v5049_v30 = vor.u32 %v6088_v14, %v5046_v15  ;;  %v5302_v11 = vld [vmem:[%s6956_s30 + $0x490] sm:$0xf0]  ;;  %v5417_v15 = vor.u32 %v6180_v7, %v5414_v8  ;;  %v6039_v7 = vld [vmem:[%s6956_s30 + $0xf4] sm:$0xf0] }
 0x1df   : > { %v1668_v34 = vmax.f32 %v1533_v25, 0.0  ;;  %v5161_v25 = vor.u32 %v6116_v12, %v5158_v13  ;;  %v5465_v42 = vor.u32 %v6192_v27, %v5462_v28  ;;  %v6072_v13 = vld [vmem:[%s6956_s30 + $0x204] sm:$0xf]  ;;  %v4982_v14 = vld [vmem:[%s6956_s30 + $0x210] sm:$0xf0] }
 0x1e0   : > { %3335 = vmatpush.bf16.msra.mxu2 %v4793_v19 }
 0x1e1   : > { %v7432_v41 = vpack.c.bf16 %v1668_v34, %v1668_v34 }
 0x1e2   : > { %v1521_v46 = vpop.f32.mrf.mxu2  ;;  %3350 = vmatpush.bf16.msra.mxu3 %v4889_v35  ;;  %3372 = vmatpush.bf16.msrb.mxu1 %v5209_v40  ;;  %v5350_v35 = vld [vmem:[%s6956_s30 + $0x4f0] sm:$0xf0] }
 0x1e3   : > { %v1534_v47 = vpop.f32.mrf.mxu3  ;;  %3262 = vmatmul.bf16.vlgmr.msrb.gmra.mxu0 %v7432_v41  ;;  %v6160_v46 = vld [vmem:[%s6956_s30 + $0x4c4] sm:$0xf] }
 0x1e4   : > { %3336 = vmatpush.bf16.msra.mxu2 %v4777_v36  ;;  %3358 = vmatpush.bf16.msrb.mxu0 %v5097_v43  ;;  %v6112_v36 = vld [vmem:[%s6956_s30 + $0x344] sm:$0xf]  ;;  %v5353_v43 = vor.u32 %v6164_v29, %v5350_v35 }
 0x1e5   : > { %v5145_v47 = vor.u32 %v6112_v36, %v5142_v37  ;;  %v6172_v29 = vld [vmem:[%s6956_s30 + $0x524] sm:$0xf] }
 0x1e6   : > { %3351 = vmatpush.bf16.msra.mxu3 %v4873_v52  ;;  %3373 = vmatpush.bf16.msrb.mxu1 %v5193_v24  ;;  %v6108_v52 = vld [vmem:[%s6956_s30 + $0x324] sm:$0xf]  ;;  %v5014_v24 = vld [vmem:[%s6956_s30 + $0x250] sm:$0xf0] }
 0x1e8   : > { %v1597_v63 = vpop.f32.mrf.mxu0  ;;  %v1610_v0 = vpop.f32.mrf.mxu1  ;;  %3337 = vmatpush.bf16.msra.mxu2 %v4761_v53  ;;  %3359 = vmatpush.bf16.msrb.mxu0 %v5081_v57  ;;  %v5126_v53 = vld [vmem:[%s6956_s30 + $0x330] sm:$0xf0]  ;;  %v5337_v57 = vor.u32 %v6160_v46, %v5334_v50  ;;  %v4972_v46 = vld [vmem:[%s6956_s30 + $0x1e8] sm:$0xf]  ;;  %v6140_v50 = vld [vmem:[%s6956_s30 + $0x424] sm:$0xf] }
 0x1e9   : > { %v1598_v2 = vadd.f32 %v1597_v63, %v807_v51  ;;  %v5033_v51 = vor.u32 %v6084_v38, %v5030_v39  ;;  %v5129_v62 = vor.u32 %v6108_v52, %v5126_v53  ;;  %v5318_v63 = vld [vmem:[%s6956_s30 + $0x4b0] sm:$0xf0]  ;;  %v808_v38 = vperm.slane %v7368_v59, 6 }
 0x1ea   : > { %3352 = vmatpush.bf16.msra.mxu3 %v4857_v1  ;;  %3374 = vmatpush.bf16.msrb.mxu1 %v5177_v5  ;;  %v6104_v1 = vld [vmem:[%s6956_s30 + $0x304] sm:$0xf]  ;;  %v5433_v5 = vor.u32 %v6184_v58, %v5430_v60  ;;  %v5321_v6 = vor.u32 %v6156_v61, %v5318_v63  ;;  %v5718_v60 = vld [vmem:[%s6956_s30 + $0x7d0] sm:$0xf0]  ;;  %v4956_v61 = vld [vmem:[%s6956_s30 + $0x1c8] sm:$0xf] }
 0x1eb   : > { %v1611_v10 = vadd.f32 %v1610_v0, %v1598_v2  ;;  %v1571_v17 = vpop.f32.mrf.mxu2  ;;  %v1584_v19 = vpop.f32.mrf.mxu3  ;;  %v5017_v0 = vor.u32 %v6080_v23, %v5014_v24  ;;  %v5110_v2 = vld [vmem:[%s6956_s30 + $0x310] sm:$0xf0] }
 0x1ec   : > { %3338 = vmatpush.bf16.msra.mxu2 %v4745_v4  ;;  %v1572_v21 = vadd.f32 %v1571_v17, %v806_v3  ;;  %3360 = vmatpush.bf16.msrb.mxu0 %v5065_v9  ;;  %v6076_v3 = vld [vmem:[%s6956_s30 + $0x224] sm:$0xf]  ;;  %v4998_v4 = vld [vmem:[%s6956_s30 + $0x230] sm:$0xf0]  ;;  %v5113_v9 = vor.u32 %v6104_v1, %v5110_v2 }
 0x1ed   : > { %v1671_v16 = vmax.f32 %v1611_v10, 0.0  ;;  %v6152_v10 = vld [vmem:[%s6956_s30 + $0x484] sm:$0xf]  ;;  %v5001_v12 = vor.u32 %v6076_v3, %v4998_v4  ;;  %v5238_v3 = vld [vmem:[%s6956_s30 + $0x410] sm:$0xf0] }
 0x1ee   : > { %v1585_v32 = vadd.f32 %v1584_v19, %v1572_v21  ;;  %3375 = vmatpush.bf16.msrb.mxu1 %v5161_v25  ;;  %v6176_v17 = vld [vmem:[%s6956_s30 + $0x544] sm:$0xf]  ;;  %v5398_v19 = vld [vmem:[%s6956_s30 + $0x550] sm:$0xf0]  ;;  %v809_v25 = vperm.slane %v7368_v59, 7 }
 0x1ef   : > { %v7458_v26 = vpack.c.bf16 %v1671_v16, %v1671_v16  ;;  %v5305_v16 = vor.u32 %v6152_v10, %v5302_v11  ;;  %v5286_v21 = vld [vmem:[%s6956_s30 + $0x470] sm:$0xf0]  ;;  %v5401_v27 = vor.u32 %v6176_v17, %v5398_v19  ;;  %v6136_v2 = vld [vmem:[%s6956_s30 + $0x404] sm:$0xf] }
 0x1f0   : > { %v1599_v33 = vpop.f32.mrf.mxu0  ;;  %v1612_v34 = vpop.f32.mrf.mxu1  ;;  %3339 = vmatpush.bf16.msra.mxu2 %v4729_v20  ;;  %v1670_v40 = vmax.f32 %v1585_v32, 0.0  ;;  %3361 = vmatpush.bf16.msrb.mxu0 %v5049_v30  ;;  %v6148_v20 = vld [vmem:[%s6956_s30 + $0x464] sm:$0xf]  ;;  %v5382_v30 = vld [vmem:[%s6956_s30 + $0x530] sm:$0xf0] }
 0x1f1   : > { %3301 = vmatmul.bf16.vlgmr.msrb.gmra.mxu3 %v7458_v26  ;;  %v5289_v28 = vor.u32 %v6148_v20, %v5286_v21  ;;  %v6144_v32 = vld [vmem:[%s6956_s30 + $0x444] sm:$0xf]  ;;  %v5270_v33 = vld [vmem:[%s6956_s30 + $0x450] sm:$0xf0]  ;;  %v5385_v37 = vor.u32 %v6172_v29, %v5382_v30 }
 0x1f2   : > { %3397 = vmatpush.bf16.msrb.mxu3 %v5481_v22  ;;  %v7472_v48 = vpack.c.bf16 %v1670_v40, %v1670_v40  ;;  %3376 = vmatpush.bf16.msrb.mxu1 %v5145_v47  ;;  %v4985_v22 = vor.u32 %v6072_v13, %v4982_v14  ;;  %v5273_v39 = vor.u32 %v6144_v32, %v5270_v33  ;;  %v6168_v40 = vld [vmem:[%s6956_s30 + $0x504] sm:$0xf]  ;;  %v6071_v47 = vld [vmem:[%s6956_s30 + $0x1f4] sm:$0xf0]  ;;  %v5702_v13 = vld [vmem:[%s6956_s30 + $0x7b0] sm:$0xf0] }
 0x1f3   : > { %v1573_v54 = vpop.f32.mrf.mxu2  ;;  %v1586_v55 = vpop.f32.mrf.mxu3  ;;  %v4973_v24 = vor.u32 %v6071_v47, %v4972_v46  ;;  %v6228_v4 = vld [vmem:[%s6956_s30 + $0x6e4] sm:$0xf]  ;;  %v4940_v14 = vld [vmem:[%s6956_s30 + $0x1a8] sm:$0xf]  ;;  %v5686_v33 = vld [vmem:[%s6956_s30 + $0x790] sm:$0xf0] }
 0x1f4   : > { %3288 = vmatmul.bf16.vlgmr.msrb.gmra.mxu2 %v7472_v48  ;;  %3362 = vmatpush.bf16.msrb.mxu0 %v5033_v51  ;;  %v5254_v51 = vld [vmem:[%s6956_s30 + $0x430] sm:$0xf0]  ;;  %v6252_v11 = vld [vmem:[%s6956_s30 + $0x7a4] sm:$0xf]  ;;  %v4908_v47 = vld [vmem:[%s6956_s30 + $0x168] sm:$0xf] }
 0x1f5   : > { %3384 = vmatpush.bf16.msrb.mxu2 %v5353_v43  ;;  %v6260_v43 = vld [vmem:[%s6956_s30 + $0x7e4] sm:$0xf]  ;;  %v5257_v58 = vor.u32 %v6140_v50, %v5254_v51  ;;  %v5705_v29 = vor.u32 %v6252_v11, %v5702_v13  ;;  %v5670_v46 = vld [vmem:[%s6956_s30 + $0x770] sm:$0xf0]  ;;  %v6055_v50 = vld [vmem:[%s6956_s30 + $0x174] sm:$0xf0] }
 0x1f6   : > { %3398 = vmatpush.bf16.msrb.mxu3 %v5465_v42  ;;  %3377 = vmatpush.bf16.msrb.mxu1 %v5129_v62  ;;  %v5366_v42 = vld [vmem:[%s6956_s30 + $0x510] sm:$0xf0]  ;;  %v5737_v23 = vor.u32 %v6260_v43, %v5734_v45  ;;  %v6067_v62 = vld [vmem:[%s6956_s30 + $0x1d4] sm:$0xf0]  ;;  %v6224_v20 = vld [vmem:[%s6956_s30 + $0x6c4] sm:$0xf] }
 0x1f7   : > { %v5369_v54 = vor.u32 %v6168_v40, %v5366_v42  ;;  %v4957_v10 = vor.u32 %v6067_v62, %v4956_v61  ;;  %v6248_v32 = vld [vmem:[%s6956_s30 + $0x784] sm:$0xf]  ;;  %v4812_v40 = vld [vmem:[%s6956_s30 + $0xa8] sm:$0xf]  ;;  %v6031_v42 = vld [vmem:[%s6956_s30 + $0xb4] sm:$0xf0] }
 0x1f8   : > { %3363 = vmatpush.bf16.msrb.mxu0 %v5017_v0  ;;  %v5689_v43 = vor.u32 %v6248_v32, %v5686_v33  ;;  %v6244_v45 = vld [vmem:[%s6956_s30 + $0x764] sm:$0xf]  ;;  %v6051_v61 = vld [vmem:[%s6956_s30 + $0x154] sm:$0xf0]  ;;  %v5526_v13 = vld [vmem:[%s6956_s30 + $0x650] sm:$0xf0] }
 0x1f9   : > { %3385 = vmatpush.bf16.msrb.mxu2 %v5337_v57  ;;  %v6204_v32 = vld [vmem:[%s6956_s30 + $0x624] sm:$0xf]  ;;  %v5484_v33 = vld [vmem:[%s6956_s30 + $0x5e8] sm:$0xf] }
 0x1fa   : > { %3399 = vmatpush.bf16.msrb.mxu3 %v5449_v56  ;;  %3378 = vmatpush.bf16.msrb.mxu1 %v5113_v9  ;;  %v6256_v56 = vld [vmem:[%s6956_s30 + $0x7c4] sm:$0xf] }
 0x1fb   : > { %v5721_v9 = vor.u32 %v6256_v56, %v5718_v60  ;;  %v6240_v56 = vld [vmem:[%s6956_s30 + $0x744] sm:$0xf]  ;;  %v4892_v60 = vld [vmem:[%s6956_s30 + $0x148] sm:$0xf] }
 0x1fc   : > { %3364 = vmatpush.bf16.msrb.mxu0 %v5001_v12  ;;  %v5241_v12 = vor.u32 %v6136_v2, %v5238_v3  ;;  %v4780_v2 = vld [vmem:[%s6956_s30 + $0x68] sm:$0xf]  ;;  %v6023_v3 = vld [vmem:[%s6956_s30 + $0x74] sm:$0xf0] }
 0x1fd   : > { %3386 = vmatpush.bf16.msrb.mxu2 %v5321_v6  ;;  %v4844_v6 = vld [vmem:[%s6956_s30 + $0xe8] sm:$0xf]  ;;  %v4781_v11 = vor.u32 %v6023_v3, %v4780_v2  ;;  %v6191_v3 = vld [vmem:[%s6956_s30 + $0x5b4] sm:$0xf0] }
 0x1fe   : > { %3400 = vmatpush.bf16.msrb.mxu3 %v5433_v5  ;;  %v5606_v5 = vld [vmem:[%s6956_s30 + $0x6f0] sm:$0xf0]  ;;  %v4845_v19 = vor.u32 %v6039_v7, %v4844_v6  ;;  %v6236_v6 = vld [vmem:[%s6956_s30 + $0x724] sm:$0xf]  ;;  %v5452_v2 = vld [vmem:[%s6956_s30 + $0x5a8] sm:$0xf] }
 0x1ff   : > { %v5609_v17 = vor.u32 %v6228_v4, %v5606_v5  ;;  %v4893_v5 = vor.u32 %v6051_v61, %v4892_v60  ;;  %v5638_v7 = vld [vmem:[%s6956_s30 + $0x730] sm:$0xf0] }
 0x200   : > { %3365 = vmatpush.bf16.msrb.mxu0 %v4985_v22 }
 0x201   : > { %3353 = vmatmul.bf16.vlgmr.msra.gmra.mxu3 %v7387_v31  ;;  %3387 = vmatpush.bf16.msrb.mxu2 %v5305_v16 }
 0x202   : > { %3401 = vmatpush.bf16.msrb.mxu3 %v5417_v15  ;;  %v6063_v15 = vld [vmem:[%s6956_s30 + $0x1b4] sm:$0xf0] }
 0x203   : > { %v4941_v30 = vor.u32 %v6063_v15, %v4940_v14  ;;  %v4764_v14 = vld [vmem:[%s6956_s30 + $0x48] sm:$0xf]  ;;  %v6019_v15 = vld [vmem:[%s6956_s30 + $0x54] sm:$0xf0] }
 0x204   : > { %3340 = vmatmul.bf16.vlgmr.msra.gmra.mxu2 %v7399_v49 }
 0x205   : > { %3388 = vmatpush.bf16.msrb.mxu2 %v5289_v28  ;;  %v6035_v28 = vld [vmem:[%s6956_s30 + $0xd4] sm:$0xf0] }
 0x206   : > { %3402 = vmatpush.bf16.msrb.mxu3 %v5401_v27  ;;  %v4828_v27 = vld [vmem:[%s6956_s30 + $0xc8] sm:$0xf] }
 0x207   : > { %v1649_v34 = vpop.f32.mrf.mxu0  ;;  %v1662_v35 = vpop.f32.mrf.mxu1 }
 0x208   : > { %v1650_v36 = vadd.f32 %v1649_v34, %v809_v25  ;;  %v5590_v25 = vld [vmem:[%s6956_s30 + $0x6d0] sm:$0xf0]  ;;  %v4924_v34 = vld [vmem:[%s6956_s30 + $0x188] sm:$0xf] }
 0x209   : > { %3389 = vmatpush.bf16.msrb.mxu2 %v5273_v39  ;;  %v5574_v39 = vld [vmem:[%s6956_s30 + $0x6b0] sm:$0xf0] }
 0x20a   : > { %v1663_v44 = vadd.f32 %v1662_v35, %v1650_v36  ;;  %3403 = vmatpush.bf16.msrb.mxu3 %v5385_v37  ;;  %v6059_v35 = vld [vmem:[%s6956_s30 + $0x194] sm:$0xf0]  ;;  %v5593_v36 = vor.u32 %v6224_v20, %v5590_v25  ;;  %v4829_v37 = vor.u32 %v6035_v28, %v4828_v27  ;;  %v6232_v20 = vld [vmem:[%s6956_s30 + $0x704] sm:$0xf]  ;;  %v5228_v27 = vld [vmem:[%s6956_s30 + $0x3e8] sm:$0xf] }
 0x20b   : > { %v1623_v53 = vpop.f32.mrf.mxu2  ;;  %v1636_v59 = vpop.f32.mrf.mxu3  ;;  %v6043_v25 = vld [vmem:[%s6956_s30 + $0x114] sm:$0xf0] }
 0x20c   : > { %v1673_v52 = vmax.f32 %v1663_v44, 0.0  ;;  %v1624_v55 = vadd.f32 %v1623_v53, %v808_v38  ;;  %v6220_v38 = vld [vmem:[%s6956_s30 + $0x6a4] sm:$0xf]  ;;  %v4925_v44 = vor.u32 %v6059_v35, %v4924_v34  ;;  %v6135_v28 = vld [vmem:[%s6956_s30 + $0x3f4] sm:$0xf0] }
 0x20d   : > { %3390 = vmatpush.bf16.msrb.mxu2 %v5257_v58  ;;  %v5577_v51 = vor.u32 %v6220_v38, %v5574_v39  ;;  %v6216_v53 = vld [vmem:[%s6956_s30 + $0x684] sm:$0xf]  ;;  %v5654_v58 = vld [vmem:[%s6956_s30 + $0x750] sm:$0xf0]  ;;  %v6199_v34 = vld [vmem:[%s6956_s30 + $0x5f4] sm:$0xf0] }
 0x20e   : > { %v7515_v57 = vpack.c.bf16 %v1673_v52, %v1673_v52  ;;  %v1637_v63 = vadd.f32 %v1636_v59, %v1624_v55  ;;  %3404 = vmatpush.bf16.msrb.mxu3 %v5369_v54  ;;  %v4813_v52 = vor.u32 %v6031_v42, %v4812_v40  ;;  %v5558_v59 = vld [vmem:[%s6956_s30 + $0x690] sm:$0xf0]  ;;  %v4796_v54 = vld [vmem:[%s6956_s30 + $0x88] sm:$0xf]  ;;  %v6027_v55 = vld [vmem:[%s6956_s30 + $0x94] sm:$0xf0]  ;;  %v5657_v4 = vor.u32 %v6240_v56, %v5654_v58 }
 0x20f   : > { %v1651_v0 = vpop.f32.mrf.mxu0  ;;  %v1664_v1 = vpop.f32.mrf.mxu1  ;;  %v5561_v62 = vor.u32 %v6216_v53, %v5558_v59  ;;  %v5510_v35 = vld [vmem:[%s6956_s30 + $0x630] sm:$0xf0]  ;;  %v5229_v40 = vor.u32 %v6135_v28, %v5228_v27  ;;  %v5485_v42 = vor.u32 %v6199_v34, %v5484_v33  ;;  %v4732_v53 = vld [vmem:[%s6956_s30 + $0x8] sm:$0xf]  ;;  %v6011_v59 = vld [vmem:[%s6956_s30 + $0x14] sm:$0xf0] }
 0x210   : > { %3327 = vmatmul.bf16.vlgmr.msra.gmra.mxu1 %v7515_v57  ;;  %v1672_v8 = vmax.f32 %v1637_v63, 0.0  ;;  %v4797_v63 = vor.u32 %v6027_v55, %v4796_v54  ;;  %v6212_v0 = vld [vmem:[%s6956_s30 + $0x664] sm:$0xf]  ;;  %v5542_v1 = vld [vmem:[%s6956_s30 + $0x670] sm:$0xf0]  ;;  %v4733_v61 = vor.u32 %v6011_v59, %v4732_v53 }
 0x211   : > { %3423 = vmatpush.bf16.msra.mxu1 %v5737_v23  ;;  %3405 = vmatmul.bf16.vlgmr.msrb.gmra.mxu3 %v7458_v26  ;;  %v5673_v23 = vor.u32 %v6244_v45, %v5670_v46  ;;  %v6200_v45 = vld [vmem:[%s6956_s30 + $0x604] sm:$0xf]  ;;  %v5513_v46 = vor.u32 %v6204_v32, %v5510_v35  ;;  %v5100_v54 = vld [vmem:[%s6956_s30 + $0x2e8] sm:$0xf]  ;;  %v6103_v55 = vld [vmem:[%s6956_s30 + $0x2f4] sm:$0xf0] }
 0x212   : > { %3449 = vmatpush.bf16.msra.mxu3 %v4973_v24  ;;  %v7531_v16 = vpack.c.bf16 %v1672_v8, %v1672_v8  ;;  %3391 = vmatpush.bf16.msrb.mxu2 %v5241_v12  ;;  %v4909_v24 = vor.u32 %v6055_v50, %v4908_v47  ;;  %v4876_v8 = vld [vmem:[%s6956_s30 + $0x128] sm:$0xf]  ;;  %v6208_v12 = vld [vmem:[%s6956_s30 + $0x644] sm:$0xf]  ;;  %v5494_v50 = vld [vmem:[%s6956_s30 + $0x610] sm:$0xf0] }
 0x213   : > { %v1625_v21 = vpop.f32.mrf.mxu2  ;;  %v1638_v22 = vpop.f32.mrf.mxu3  ;;  %v5497_v60 = vor.u32 %v6200_v45, %v5494_v50  ;;  %v5164_v27 = vld [vmem:[%s6956_s30 + $0x368] sm:$0xf]  ;;  %v6119_v28 = vld [vmem:[%s6956_s30 + $0x374] sm:$0xf0] }
 0x214   : > { %3314 = vmatmul.bf16.vlgmr.msra.gmra.mxu0 %v7531_v16  ;;  %v5622_v21 = vld [vmem:[%s6956_s30 + $0x710] sm:$0xf0]  ;;  %v4860_v22 = vld [vmem:[%s6956_s30 + $0x108] sm:$0xf]  ;;  %v6183_v33 = vld [vmem:[%s6956_s30 + $0x574] sm:$0xf0] }
 0x215   : > { %3424 = vmatpush.bf16.msra.mxu1 %v5721_v9  ;;  %3410 = vmatpush.bf16.msra.mxu0 %v5609_v17  ;;  %v6047_v9 = vld [vmem:[%s6956_s30 + $0x134] sm:$0xf0]  ;;  %v5641_v17 = vor.u32 %v6236_v6, %v5638_v7  ;;  %v5625_v38 = vor.u32 %v6232_v20, %v5622_v21  ;;  %v4861_v39 = vor.u32 %v6043_v25, %v4860_v22  ;;  %v5340_v6 = vld [vmem:[%s6956_s30 + $0x4c8] sm:$0xf] }
 0x216   : > { %3450 = vmatpush.bf16.msra.mxu3 %v4957_v10  ;;  %3436 = vmatpush.bf16.msra.mxu2 %v4845_v19  ;;  %v5545_v10 = vor.u32 %v6212_v0, %v5542_v1  ;;  %v4877_v19 = vor.u32 %v6047_v9, %v4876_v8  ;;  %v5101_v0 = vor.u32 %v6103_v55, %v5100_v54  ;;  %v6163_v7 = vld [vmem:[%s6956_s30 + $0x4d4] sm:$0xf0]  ;;  %v5324_v20 = vld [vmem:[%s6956_s30 + $0x4a8] sm:$0xf] }
 0x217   : > { %3392 = vmatmul.bf16.vlgmr.msrb.gmra.mxu2 %v7472_v48  ;;  %v5453_v9 = vor.u32 %v6191_v3, %v5452_v2  ;;  %v6159_v21 = vld [vmem:[%s6956_s30 + $0x4b4] sm:$0xf0]  ;;  %v5420_v32 = vld [vmem:[%s6956_s30 + $0x568] sm:$0xf] }
 0x218   : > { %v5052_v34 = vld [vmem:[%s6956_s30 + $0x288] sm:$0xf]  ;;  %v6091_v35 = vld [vmem:[%s6956_s30 + $0x294] sm:$0xf0] }
 0x219   : > { %3425 = vmatpush.bf16.msra.mxu1 %v5705_v29  ;;  %3411 = vmatpush.bf16.msra.mxu0 %v5593_v36  ;;  %v5529_v29 = vor.u32 %v6208_v12, %v5526_v13  ;;  %v4748_v36 = vld [vmem:[%s6956_s30 + $0x28] sm:$0xf]  ;;  %v5341_v13 = vor.u32 %v6163_v7, %v5340_v6  ;;  %v6087_v50 = vld [vmem:[%s6956_s30 + $0x274] sm:$0xf0] }
 0x21a   : > { %3451 = vmatpush.bf16.msra.mxu3 %v4941_v30  ;;  %3437 = vmatpush.bf16.msra.mxu2 %v4829_v37  ;;  %v4765_v30 = vor.u32 %v6019_v15, %v4764_v14  ;;  %v6015_v37 = vld [vmem:[%s6956_s30 + $0x34] sm:$0xf0]  ;;  %v5436_v14 = vld [vmem:[%s6956_s30 + $0x588] sm:$0xf] }
 0x21b   : > { %v4749_v47 = vor.u32 %v6015_v37, %v4748_v36  ;;  %v6187_v15 = vld [vmem:[%s6956_s30 + $0x594] sm:$0xf0]  ;;  %v5308_v36 = vld [vmem:[%s6956_s30 + $0x488] sm:$0xf] }
 0x21c   : > { %v5437_v25 = vor.u32 %v6187_v15, %v5436_v14  ;;  %v6155_v37 = vld [vmem:[%s6956_s30 + $0x494] sm:$0xf0]  ;;  %v5404_v45 = vld [vmem:[%s6956_s30 + $0x548] sm:$0xf] }
 0x21d   : > { %3426 = vmatpush.bf16.msra.mxu1 %v5689_v43  ;;  %3412 = vmatpush.bf16.msra.mxu0 %v5577_v51  ;;  %v5212_v43 = vld [vmem:[%s6956_s30 + $0x3c8] sm:$0xf]  ;;  %v6111_v55 = vld [vmem:[%s6956_s30 + $0x334] sm:$0xf0] }
 0x21e   : > { %3452 = vmatpush.bf16.msra.mxu3 %v4925_v44  ;;  %3438 = vmatpush.bf16.msra.mxu2 %v4813_v52  ;;  %v6131_v44 = vld [vmem:[%s6956_s30 + $0x3d4] sm:$0xf0]  ;;  %v5468_v51 = vld [vmem:[%s6956_s30 + $0x5c8] sm:$0xf] }
 0x21f   : > { %v6195_v52 = vld [vmem:[%s6956_s30 + $0x5d4] sm:$0xf0]  ;;  %v5213_v56 = vor.u32 %v6131_v44, %v5212_v43  ;;  %v5053_v43 = vor.u32 %v6091_v35, %v5052_v34  ;;  %v5309_v44 = vor.u32 %v6155_v37, %v5308_v36  ;;  %v5132_v54 = vld [vmem:[%s6956_s30 + $0x328] sm:$0xf] }
 0x220   : > { %3379 = vmatmul.bf16.vlgmr.msrb.gmra.mxu1 %v7418_v18  ;;  %v5469_v58 = vor.u32 %v6195_v52, %v5468_v51  ;;  %v5292_v51 = vld [vmem:[%s6956_s30 + $0x468] sm:$0xf]  ;;  %v6151_v52 = vld [vmem:[%s6956_s30 + $0x474] sm:$0xf0] }
 0x221   : > { %3427 = vmatpush.bf16.msra.mxu1 %v5673_v23  ;;  %3413 = vmatpush.bf16.msra.mxu0 %v5561_v62  ;;  %v5356_v23 = vld [vmem:[%s6956_s30 + $0x4e8] sm:$0xf]  ;;  %v6107_v3 = vld [vmem:[%s6956_s30 + $0x314] sm:$0xf0] }
 0x222   : > { %3453 = vmatpush.bf16.msra.mxu3 %v4909_v24  ;;  %3439 = vmatpush.bf16.msra.mxu2 %v4797_v63  ;;  %v6167_v24 = vld [vmem:[%s6956_s30 + $0x4f4] sm:$0xf0]  ;;  %v5196_v62 = vld [vmem:[%s6956_s30 + $0x3a8] sm:$0xf] }
 0x223   : > { %v6127_v63 = vld [vmem:[%s6956_s30 + $0x3b4] sm:$0xf0]  ;;  %v5357_v1 = vor.u32 %v6167_v24, %v5356_v23  ;;  %v5293_v24 = vor.u32 %v6151_v52, %v5292_v51  ;;  %v5260_v15 = vld [vmem:[%s6956_s30 + $0x428] sm:$0xf]  ;;  %v4942_v51 = vld [vmem:[%s6956_s30 + $0x1b8] sm:$0xf0] }
 0x224   : > { %3366 = vmatmul.bf16.vlgmr.msrb.gmra.mxu0 %v7432_v41  ;;  %v5197_v8 = vor.u32 %v6127_v63, %v5196_v62  ;;  %v5276_v62 = vld [vmem:[%s6956_s30 + $0x448] sm:$0xf]  ;;  %v6147_v63 = vld [vmem:[%s6956_s30 + $0x454] sm:$0xf0] }
 0x225   : > { %3428 = vmatpush.bf16.msra.mxu1 %v5657_v4  ;;  %3414 = vmatpush.bf16.msra.mxu0 %v5545_v10  ;;  %v5084_v4 = vld [vmem:[%s6956_s30 + $0x2c8] sm:$0xf]  ;;  %v5277_v7 = vor.u32 %v6147_v63, %v5276_v62  ;;  %v6139_v35 = vld [vmem:[%s6956_s30 + $0x414] sm:$0xf0]  ;;  %v4926_v62 = vld [vmem:[%s6956_s30 + $0x198] sm:$0xf0] }
 0x226   : > { %3454 = vmatpush.bf16.msra.mxu3 %v4893_v5  ;;  %3440 = vmatpush.bf16.msra.mxu2 %v4781_v11  ;;  %v6099_v5 = vld [vmem:[%s6956_s30 + $0x2d4] sm:$0xf0]  ;;  %v5180_v10 = vld [vmem:[%s6956_s30 + $0x388] sm:$0xf] }
 0x227   : > { %v6123_v11 = vld [vmem:[%s6956_s30 + $0x394] sm:$0xf0]  ;;  %v5085_v12 = vor.u32 %v6099_v5, %v5084_v4  ;;  %v5372_v4 = vld [vmem:[%s6956_s30 + $0x508] sm:$0xf] }
 0x228   : > { %v5181_v22 = vor.u32 %v6123_v11, %v5180_v10  ;;  %v6171_v5 = vld [vmem:[%s6956_s30 + $0x514] sm:$0xf0]  ;;  %v5004_v10 = vld [vmem:[%s6956_s30 + $0x228] sm:$0xf] }
 0x229   : > { %3429 = vmatpush.bf16.msra.mxu1 %v5641_v17  ;;  %3415 = vmatpush.bf16.msra.mxu0 %v5529_v29  ;;  %v5068_v17 = vld [vmem:[%s6956_s30 + $0x2a8] sm:$0xf]  ;;  %v6079_v11 = vld [vmem:[%s6956_s30 + $0x234] sm:$0xf0] }
 0x22a   : > { %3455 = vmatpush.bf16.msra.mxu3 %v4877_v19  ;;  %3441 = vmatpush.bf16.msra.mxu2 %v4765_v30  ;;  %v6095_v19 = vld [vmem:[%s6956_s30 + $0x2b4] sm:$0xf0]  ;;  %v5325_v30 = vor.u32 %v6159_v21, %v5324_v20  ;;  %v5724_v21 = vld [vmem:[%s6956_s30 + $0x7c8] sm:$0xf] }
 0x22b   : > { %v5069_v29 = vor.u32 %v6095_v19, %v5068_v17  ;;  %v6143_v17 = vld [vmem:[%s6956_s30 + $0x434] sm:$0xf0]  ;;  %v5373_v19 = vor.u32 %v6171_v5, %v5372_v4  ;;  %v5244_v34 = vld [vmem:[%s6956_s30 + $0x408] sm:$0xf]  ;;  %v4814_v4 = vld [vmem:[%s6956_s30 + $0xb8] sm:$0xf0] }
 0x22c   : > { %v5612_v36 = vld [vmem:[%s6956_s30 + $0x6e8] sm:$0xf]  ;;  %v6231_v37 = vld [vmem:[%s6956_s30 + $0x6f4] sm:$0xf0] }
 0x22d   : > { %3430 = vmatpush.bf16.msra.mxu1 %v5625_v38  ;;  %3416 = vmatpush.bf16.msra.mxu0 %v5513_v46  ;;  %v5165_v38 = vor.u32 %v6119_v28, %v5164_v27  ;;  %v6179_v46 = vld [vmem:[%s6956_s30 + $0x554] sm:$0xf0]  ;;  %v4988_v28 = vld [vmem:[%s6956_s30 + $0x208] sm:$0xf] }
 0x22e   : > { %3456 = vmatpush.bf16.msra.mxu3 %v4861_v39  ;;  %3442 = vmatpush.bf16.msra.mxu2 %v4749_v47  ;;  %v5421_v39 = vor.u32 %v6183_v33, %v5420_v32  ;;  %v5036_v47 = vld [vmem:[%s6956_s30 + $0x268] sm:$0xf]  ;;  %v5405_v59 = vor.u32 %v6179_v46, %v5404_v45  ;;  %v6259_v27 = vld [vmem:[%s6956_s30 + $0x7d4] sm:$0xf0]  ;;  %v6065_v32 = vld [vmem:[%s6956_s30 + $0x1cc] sm:$0xf]  ;;  %v5245_v46 = vor.u32 %v6139_v35, %v5244_v34 }
 0x22f   : > { %v5037_v23 = vor.u32 %v6087_v50, %v5036_v47  ;;  %v4958_v33 = vld [vmem:[%s6956_s30 + $0x1d8] sm:$0xf0]  ;;  %v6255_v45 = vld [vmem:[%s6956_s30 + $0x7b4] sm:$0xf0]  ;;  %v5613_v47 = vor.u32 %v6231_v37, %v5612_v36  ;;  %v6061_v50 = vld [vmem:[%s6956_s30 + $0x1ac] sm:$0xf] }
 0x230   : > { %3431 = vmatmul.bf16.vlgmr.msra.gmra.mxu1 %v7515_v57  ;;  %v6021_v35 = vld [vmem:[%s6956_s30 + $0x6c] sm:$0xf]  ;;  %v4782_v36 = vld [vmem:[%s6956_s30 + $0x78] sm:$0xf0] }
 0x231   : > { %3475 = vmatpush.bf16.msrb.mxu1 %v5229_v40  ;;  %3457 = vmatmul.bf16.vlgmr.msra.gmra.mxu3 %v7387_v31  ;;  %v5148_v40 = vld [vmem:[%s6956_s30 + $0x348] sm:$0xf] }
 0x232   : > { %3501 = vmatpush.bf16.msrb.mxu3 %v5485_v42  ;;  %3417 = vmatpush.bf16.msra.mxu0 %v5497_v60  ;;  %v6115_v42 = vld [vmem:[%s6956_s30 + $0x354] sm:$0xf0]  ;;  %v5020_v60 = vld [vmem:[%s6956_s30 + $0x248] sm:$0xf] }
 0x233   : > { %3443 = vmatpush.bf16.msra.mxu2 %v4733_v61  ;;  %v5149_v53 = vor.u32 %v6115_v42, %v5148_v40  ;;  %v6083_v61 = vld [vmem:[%s6956_s30 + $0x254] sm:$0xf0]  ;;  %v4846_v40 = vld [vmem:[%s6956_s30 + $0xf8] sm:$0xf0] }
 0x234   : > { %v5021_v6 = vor.u32 %v6083_v61, %v5020_v60  ;;  %v6057_v61 = vld [vmem:[%s6956_s30 + $0x18c] sm:$0xf] }
 0x235   : > { %3476 = vmatpush.bf16.msrb.mxu1 %v5213_v56  ;;  %3418 = vmatmul.bf16.vlgmr.msra.gmra.mxu0 %v7531_v16  ;;  %v5388_v56 = vld [vmem:[%s6956_s30 + $0x528] sm:$0xf] }
 0x236   : > { %3502 = vmatpush.bf16.msrb.mxu3 %v5469_v58  ;;  %3462 = vmatpush.bf16.msrb.mxu0 %v5101_v0  ;;  %v6175_v58 = vld [vmem:[%s6956_s30 + $0x534] sm:$0xf0]  ;;  %v5133_v0 = vor.u32 %v6111_v55, %v5132_v54  ;;  %v6033_v55 = vld [vmem:[%s6956_s30 + $0xcc] sm:$0xf] }
 0x237   : > { %3488 = vmatpush.bf16.msrb.mxu2 %v5357_v1  ;;  %v5116_v1 = vld [vmem:[%s6956_s30 + $0x308] sm:$0xf]  ;;  %v5389_v2 = vor.u32 %v6175_v58, %v5388_v56  ;;  %v6251_v58 = vld [vmem:[%s6956_s30 + $0x794] sm:$0xf0] }
 0x238   : > { %3444 = vmatmul.bf16.vlgmr.msra.gmra.mxu2 %v7399_v49  ;;  %v5117_v14 = vor.u32 %v6107_v3, %v5116_v1  ;;  %v5692_v56 = vld [vmem:[%s6956_s30 + $0x788] sm:$0xf]  ;;  %v6223_v1 = vld [vmem:[%s6956_s30 + $0x6b4] sm:$0xf0]  ;;  %v6029_v3 = vld [vmem:[%s6956_s30 + $0xac] sm:$0xf] }
 0x239   : > { %3477 = vmatpush.bf16.msrb.mxu1 %v5197_v8  ;;  %v5740_v8 = vld [vmem:[%s6956_s30 + $0x7e8] sm:$0xf] }
 0x23a   : > { %3503 = vmatpush.bf16.msrb.mxu3 %v5453_v9  ;;  %3463 = vmatpush.bf16.msrb.mxu0 %v5085_v12  ;;  %v6263_v9 = vld [vmem:[%s6956_s30 + $0x7f4] sm:$0xf0]  ;;  %v6069_v12 = vld [vmem:[%s6956_s30 + $0x1ec] sm:$0xf] }
 0x23b   : > { %3489 = vmatpush.bf16.msrb.mxu2 %v5341_v13  ;;  %v4974_v13 = vld [vmem:[%s6956_s30 + $0x1f8] sm:$0xf0]  ;;  %v5741_v20 = vor.u32 %v6263_v9, %v5740_v8  ;;  %v6247_v8 = vld [vmem:[%s6956_s30 + $0x774] sm:$0xf0] }
 0x23d   : > { %3478 = vmatpush.bf16.msrb.mxu1 %v5181_v22  ;;  %v5005_v22 = vor.u32 %v6079_v11, %v5004_v10  ;;  %v6053_v10 = vld [vmem:[%s6956_s30 + $0x16c] sm:$0xf]  ;;  %v4910_v11 = vld [vmem:[%s6956_s30 + $0x178] sm:$0xf0] }
 0x23e   : > { %3504 = vmatpush.bf16.msrb.mxu3 %v5437_v25  ;;  %3464 = vmatpush.bf16.msrb.mxu0 %v5069_v29  ;;  %v4977_v25 = vor.u32 %v6069_v12, %v4974_v13  ;;  %v6075_v29 = vld [vmem:[%s6956_s30 + $0x214] sm:$0xf0]  ;;  %v4817_v12 = vor.u32 %v6029_v3, %v4814_v4  ;;  %v5564_v13 = vld [vmem:[%s6956_s30 + $0x688] sm:$0xf] }
 0x23f   : > { %3490 = vmatpush.bf16.msrb.mxu2 %v5325_v30  ;;  %v5261_v30 = vor.u32 %v6143_v17, %v5260_v15  ;;  %v4989_v42 = vor.u32 %v6075_v29, %v4988_v28  ;;  %v6025_v17 = vld [vmem:[%s6956_s30 + $0x8c] sm:$0xf]  ;;  %v4894_v29 = vld [vmem:[%s6956_s30 + $0x158] sm:$0xf0] }
 0x240   : > { %v6049_v28 = vld [vmem:[%s6956_s30 + $0x14c] sm:$0xf] }
 0x241   : > { %3479 = vmatpush.bf16.msrb.mxu1 %v5165_v38  ;;  %v5725_v38 = vor.u32 %v6259_v27, %v5724_v21  ;;  %v5660_v21 = vld [vmem:[%s6956_s30 + $0x748] sm:$0xf] }
 0x242   : > { %3505 = vmatpush.bf16.msrb.mxu3 %v5421_v39  ;;  %3465 = vmatpush.bf16.msrb.mxu0 %v5053_v43  ;;  %v6037_v39 = vld [vmem:[%s6956_s30 + $0xec] sm:$0xf]  ;;  %v4961_v43 = vor.u32 %v6065_v32, %v4958_v33  ;;  %v5548_v32 = vld [vmem:[%s6956_s30 + $0x668] sm:$0xf]  ;;  %v6215_v33 = vld [vmem:[%s6956_s30 + $0x674] sm:$0xf0] }
 0x243   : > { %3491 = vmatpush.bf16.msrb.mxu2 %v5309_v44  ;;  %v5708_v44 = vld [vmem:[%s6956_s30 + $0x7a8] sm:$0xf]  ;;  %v4849_v52 = vor.u32 %v6037_v39, %v4846_v40  ;;  %v6239_v40 = vld [vmem:[%s6956_s30 + $0x734] sm:$0xf0] }
 0x244   : > { %v5709_v54 = vor.u32 %v6255_v45, %v5708_v44  ;;  %v5644_v39 = vld [vmem:[%s6956_s30 + $0x728] sm:$0xf]  ;;  %v4878_v44 = vld [vmem:[%s6956_s30 + $0x138] sm:$0xf0] }
 0x245   : > { %3480 = vmatpush.bf16.msrb.mxu1 %v5149_v53  ;;  %v5596_v53 = vld [vmem:[%s6956_s30 + $0x6c8] sm:$0xf] }
 0x246   : > { %3506 = vmatpush.bf16.msrb.mxu3 %v5405_v59  ;;  %3466 = vmatpush.bf16.msrb.mxu0 %v5037_v23  ;;  %v6227_v59 = vld [vmem:[%s6956_s30 + $0x6d4] sm:$0xf0]  ;;  %v4830_v23 = vld [vmem:[%s6956_s30 + $0xd8] sm:$0xf0] }
 0x247   : > { %3492 = vmatpush.bf16.msrb.mxu2 %v5293_v24  ;;  %v4945_v24 = vor.u32 %v6061_v50, %v4942_v51  ;;  %v5597_v60 = vor.u32 %v6227_v59, %v5596_v53  ;;  %v4833_v63 = vor.u32 %v6033_v55, %v4830_v23  ;;  %v6211_v50 = vld [vmem:[%s6956_s30 + $0x654] sm:$0xf0]  ;;  %v5645_v51 = vor.u32 %v6239_v40, %v5644_v39  ;;  %v4766_v53 = vld [vmem:[%s6956_s30 + $0x58] sm:$0xf0]  ;;  %v5628_v59 = vld [vmem:[%s6956_s30 + $0x708] sm:$0xf] }
 0x248   : > { %v6235_v55 = vld [vmem:[%s6956_s30 + $0x714] sm:$0xf0]  ;;  %v6041_v23 = vld [vmem:[%s6956_s30 + $0x10c] sm:$0xf] }
 0x249   : > { %3481 = vmatpush.bf16.msrb.mxu1 %v5133_v0  ;;  %v5580_v0 = vld [vmem:[%s6956_s30 + $0x6a8] sm:$0xf]  ;;  %v5629_v3 = vor.u32 %v6235_v55, %v5628_v59  ;;  %v6189_v40 = vld [vmem:[%s6956_s30 + $0x5ac] sm:$0xf] }
 0x24a   : > { %3507 = vmatpush.bf16.msrb.mxu3 %v5389_v2  ;;  %3467 = vmatpush.bf16.msrb.mxu0 %v5021_v6  ;;  %v5693_v2 = vor.u32 %v6251_v58, %v5692_v56  ;;  %v4929_v6 = vor.u32 %v6057_v61, %v4926_v62  ;;  %v5581_v9 = vor.u32 %v6223_v1, %v5580_v0  ;;  %v5230_v61 = vld [vmem:[%s6956_s30 + $0x3f8] sm:$0xf0]  ;;  %v5516_v62 = vld [vmem:[%s6956_s30 + $0x628] sm:$0xf]  ;;  %v6207_v0 = vld [vmem:[%s6956_s30 + $0x634] sm:$0xf0] }
 0x24b   : > { %3493 = vmatpush.bf16.msrb.mxu2 %v5277_v7  ;;  %v5676_v7 = vld [vmem:[%s6956_s30 + $0x768] sm:$0xf]  ;;  %v6197_v1 = vld [vmem:[%s6956_s30 + $0x5ec] sm:$0xf] }
 0x24c   : > { %v5677_v15 = vor.u32 %v6247_v8, %v5676_v7  ;;  %v4750_v7 = vld [vmem:[%s6956_s30 + $0x38] sm:$0xf0]  ;;  %v6121_v59 = vld [vmem:[%s6956_s30 + $0x38c] sm:$0xf] }
 0x24d   : > { %3482 = vmatpush.bf16.msrb.mxu1 %v5117_v14  ;;  %v6219_v14 = vld [vmem:[%s6956_s30 + $0x694] sm:$0xf0]  ;;  %v6185_v55 = vld [vmem:[%s6956_s30 + $0x58c] sm:$0xf] }
 0x24e   : > { %3508 = vmatpush.bf16.msrb.mxu3 %v5373_v19  ;;  %3468 = vmatpush.bf16.msrb.mxu0 %v5005_v22  ;;  %v4798_v19 = vld [vmem:[%s6956_s30 + $0x98] sm:$0xf0]  ;;  %v6243_v22 = vld [vmem:[%s6956_s30 + $0x754] sm:$0xf0] }
 0x24f   : > { %3494 = vmatpush.bf16.msrb.mxu2 %v5261_v30  ;;  %v4801_v30 = vor.u32 %v6025_v17, %v4798_v19  ;;  %v5661_v34 = vor.u32 %v6243_v22, %v5660_v21  ;;  %v5470_v21 = vld [vmem:[%s6956_s30 + $0x5d8] sm:$0xf0]  ;;  %v6009_v22 = vld [vmem:[%s6956_s30 + $0xc] sm:$0xf] }
 0x250   : > { %3483 = vmatmul.bf16.vlgmr.msrb.gmra.mxu1 %v7418_v18  ;;  %v7686_v5 = vpop.f32.mrf.mxu3 }
 0x251   : > { %3527 = vmatpush.bf16.msra.mxu1 %v5741_v20  ;;  %3509 = vmatmul.bf16.vlgmr.msrb.gmra.mxu3 %v7458_v26  ;;  %v4913_v20 = vor.u32 %v6053_v10, %v4910_v11  ;;  %v6129_v10 = vld [vmem:[%s6956_s30 + $0x3cc] sm:$0xf]  ;;  %v5517_v11 = vor.u32 %v6207_v0, %v5516_v62  ;;  %v5326_v62 = vld [vmem:[%s6956_s30 + $0x4b8] sm:$0xf0] }
 0x252   : > { %3553 = vmatpush.bf16.msra.mxu3 %v4977_v25  ;;  %3469 = vmatpush.bf16.msrb.mxu0 %v4989_v42  ;;  %v5565_v25 = vor.u32 %v6219_v14, %v5564_v13  ;;  %v5549_v42 = vor.u32 %v6215_v33, %v5548_v32  ;;  %v5214_v13 = vld [vmem:[%s6956_s30 + $0x3d8] sm:$0xf0]  ;;  %v5500_v14 = vld [vmem:[%s6956_s30 + $0x608] sm:$0xf]  ;;  %v6165_v32 = vld [vmem:[%s6956_s30 + $0x4ec] sm:$0xf] }
 0x253   : > { %3495 = vmatpush.bf16.msrb.mxu2 %v5245_v46  ;;  %v4785_v46 = vor.u32 %v6021_v35, %v4782_v36  ;;  %v5358_v33 = vld [vmem:[%s6956_s30 + $0x4f8] sm:$0xf0]  ;;  %v6125_v36 = vld [vmem:[%s6956_s30 + $0x3ac] sm:$0xf] }
 0x254   : > { %v6117_v0 = vld [vmem:[%s6956_s30 + $0x36c] sm:$0xf] }
 0x255   : > { %3528 = vmatpush.bf16.msra.mxu1 %v5725_v38  ;;  %3470 = vmatmul.bf16.vlgmr.msrb.gmra.mxu0 %v7432_v41  ;;  %v4897_v38 = vor.u32 %v6049_v28, %v4894_v29  ;;  %v6101_v28 = vld [vmem:[%s6956_s30 + $0x2ec] sm:$0xf]  ;;  %v5102_v29 = vld [vmem:[%s6956_s30 + $0x2f8] sm:$0xf0] }
 0x256   : > { %3554 = vmatpush.bf16.msra.mxu3 %v4961_v43  ;;  %3514 = vmatpush.bf16.msra.mxu0 %v5613_v47  ;;  %v7698_v27 = vpop.f32.mrf.mxu2  ;;  %v6045_v43 = vld [vmem:[%s6956_s30 + $0x12c] sm:$0xf]  ;;  %v5532_v47 = vld [vmem:[%s6956_s30 + $0x648] sm:$0xf]  ;;  %v5105_v39 = vor.u32 %v6101_v28, %v5102_v29 }
 0x257   : > { %3540 = vmatpush.bf16.msra.mxu2 %v4849_v52  ;;  %v6017_v52 = vld [vmem:[%s6956_s30 + $0x4c] sm:$0xf]  ;;  %v5533_v56 = vor.u32 %v6211_v50, %v5532_v47  ;;  %v5086_v47 = vld [vmem:[%s6956_s30 + $0x2d8] sm:$0xf0] }
 0x258   : > { %3496 = vmatmul.bf16.vlgmr.msrb.gmra.mxu2 %v7472_v48  ;;  %v3252_v37 = vpop.f32.mrf.mxu3  ;;  %v6149_v29 = vld [vmem:[%s6956_s30 + $0x46c] sm:$0xf] }
 0x259   : > { %3529 = vmatpush.bf16.msra.mxu1 %v5709_v54  ;;  %v4881_v54 = vor.u32 %v6045_v43, %v4878_v44  ;;  %v5198_v37 = vld [vmem:[%s6956_s30 + $0x3b8] sm:$0xf0]  ;;  %v5361_v43 = vor.u32 %v6165_v32, %v5358_v33  ;;  %v6109_v33 = vld [vmem:[%s6956_s30 + $0x32c] sm:$0xf] }
 0x25a   : > { %3555 = vmatpush.bf16.msra.mxu3 %v4945_v24  ;;  %3515 = vmatpush.bf16.msra.mxu0 %v5597_v60  ;;  %v7710_v45 = vpop.f32.mrf.mxu1  ;;  %v4862_v24 = vld [vmem:[%s6956_s30 + $0x118] sm:$0xf0]  ;;  %v6133_v60 = vld [vmem:[%s6956_s30 + $0x3ec] sm:$0xf]  ;;  %v5201_v50 = vor.u32 %v6125_v36, %v5198_v37 }
 0x25b   : > { %3541 = vmatpush.bf16.msra.mxu2 %v4833_v63  ;;  %v4769_v63 = vor.u32 %v6017_v52, %v4766_v53  ;;  %v4865_v8 = vor.u32 %v6041_v23, %v4862_v24  ;;  %v5342_v52 = vld [vmem:[%s6956_s30 + $0x4d8] sm:$0xf0]  ;;  %v6173_v36 = vld [vmem:[%s6956_s30 + $0x52c] sm:$0xf] }
 0x25c   : > { %v5438_v23 = vld [vmem:[%s6956_s30 + $0x598] sm:$0xf0] }
 0x25d   : > { %3530 = vmatpush.bf16.msra.mxu1 %v5693_v2  ;;  %v5486_v2 = vld [vmem:[%s6956_s30 + $0x5f8] sm:$0xf0] }
 0x25e   : > { %3556 = vmatpush.bf16.msra.mxu3 %v4929_v6  ;;  %3516 = vmatpush.bf16.msra.mxu0 %v5581_v9  ;;  %v3239_v58 = vpop.f32.mrf.mxu2  ;;  %v6013_v6 = vld [vmem:[%s6956_s30 + $0x2c] sm:$0xf]  ;;  %v5233_v9 = vor.u32 %v6133_v60, %v5230_v61  ;;  %v5390_v37 = vld [vmem:[%s6956_s30 + $0x538] sm:$0xf0] }
 0x25f   : > { %3542 = vmatpush.bf16.msra.mxu2 %v4817_v12  ;;  %v5489_v12 = vor.u32 %v6197_v1, %v5486_v2  ;;  %v4753_v19 = vor.u32 %v6013_v6, %v4750_v7  ;;  %v5070_v58 = vld [vmem:[%s6956_s30 + $0x2b8] sm:$0xf0]  ;;  %v6157_v61 = vld [vmem:[%s6956_s30 + $0x4ac] sm:$0xf] }
 0x260   : > { %v7726_v4 = vpop.f32.mrf.mxu0  ;;  %v5166_v1 = vld [vmem:[%s6956_s30 + $0x378] sm:$0xf0]  ;;  %v5329_v7 = vor.u32 %v6157_v61, %v5326_v62 }
 0x261   : > { %3531 = vmatpush.bf16.msra.mxu1 %v5677_v15  ;;  %v6203_v15 = vld [vmem:[%s6956_s30 + $0x614] sm:$0xf0]  ;;  %v5422_v6 = vld [vmem:[%s6956_s30 + $0x578] sm:$0xf0] }
 0x262   : > { %3557 = vmatpush.bf16.msra.mxu3 %v4913_v20  ;;  %3517 = vmatpush.bf16.msra.mxu0 %v5565_v25  ;;  %v3278_v17 = vpop.f32.mrf.mxu1  ;;  %v6193_v20 = vld [vmem:[%s6956_s30 + $0x5cc] sm:$0xf]  ;;  %v4734_v25 = vld [vmem:[%s6956_s30 + $0x18] sm:$0xf0] }
 0x263   : > { %3543 = vmatpush.bf16.msra.mxu2 %v4801_v30  ;;  %v5217_v30 = vor.u32 %v6129_v10, %v5214_v13  ;;  %v5473_v35 = vor.u32 %v6193_v20, %v5470_v21  ;;  %v6153_v10 = vld [vmem:[%s6956_s30 + $0x48c] sm:$0xf]  ;;  %v5406_v20 = vld [vmem:[%s6956_s30 + $0x558] sm:$0xf0] }
 0x264   : > { %v6113_v13 = vld [vmem:[%s6956_s30 + $0x34c] sm:$0xf]  ;;  %v5262_v61 = vld [vmem:[%s6956_s30 + $0x438] sm:$0xf0] }
 0x265   : > { %3532 = vmatpush.bf16.msra.mxu1 %v5661_v34  ;;  %v5501_v34 = vor.u32 %v6203_v15, %v5500_v14  ;;  %v5150_v14 = vld [vmem:[%s6956_s30 + $0x358] sm:$0xf0] }
 0x266   : > { %3558 = vmatpush.bf16.msra.mxu3 %v4897_v38  ;;  %3518 = vmatpush.bf16.msra.mxu0 %v5549_v42  ;;  %v4737_v38 = vor.u32 %v6009_v22, %v4734_v25  ;;  %v5454_v42 = vld [vmem:[%s6956_s30 + $0x5b8] sm:$0xf0]  ;;  %v6085_v22 = vld [vmem:[%s6956_s30 + $0x26c] sm:$0xf]  ;;  %v5153_v28 = vor.u32 %v6113_v13, %v5150_v14 }
 0x267   : > { %3544 = vmatpush.bf16.msra.mxu2 %v4785_v46  ;;  %v6097_v46 = vld [vmem:[%s6956_s30 + $0x2cc] sm:$0xf]  ;;  %v5457_v53 = vor.u32 %v6189_v40, %v5454_v42  ;;  %v5038_v25 = vld [vmem:[%s6956_s30 + $0x278] sm:$0xf0] }
 0x268   : > { %v3265_v44 = vpop.f32.mrf.mxu0  ;;  %v6081_v40 = vld [vmem:[%s6956_s30 + $0x24c] sm:$0xf]  ;;  %v5022_v42 = vld [vmem:[%s6956_s30 + $0x258] sm:$0xf0] }
 0x269   : > { %3533 = vmatpush.bf16.msra.mxu1 %v5645_v51  ;;  %v6161_v51 = vld [vmem:[%s6956_s30 + $0x4cc] sm:$0xf]  ;;  %v5614_v13 = vld [vmem:[%s6956_s30 + $0x6f8] sm:$0xf0] }
 0x26a   : > { %3559 = vmatpush.bf16.msra.mxu3 %v4881_v54  ;;  %3519 = vmatpush.bf16.msra.mxu0 %v5533_v56  ;;  %v5182_v54 = vld [vmem:[%s6956_s30 + $0x398] sm:$0xf0]  ;;  %v5345_v24 = vor.u32 %v6161_v51, %v5342_v52  ;;  %v6093_v56 = vld [vmem:[%s6956_s30 + $0x2ac] sm:$0xf] }
 0x26b   : > { %3545 = vmatpush.bf16.msra.mxu2 %v4769_v63  ;;  %v5185_v60 = vor.u32 %v6121_v59, %v5182_v54  ;;  %v5441_v63 = vor.u32 %v6185_v55, %v5438_v23  ;;  %v5073_v2 = vor.u32 %v6093_v56, %v5070_v58  ;;  %v6145_v44 = vld [vmem:[%s6956_s30 + $0x44c] sm:$0xf]  ;;  %v5118_v51 = vld [vmem:[%s6956_s30 + $0x318] sm:$0xf0]  ;;  %v5025_v59 = vor.u32 %v6081_v40, %v5022_v42 }
 0x26c   : > { %v6169_v52 = vld [vmem:[%s6956_s30 + $0x50c] sm:$0xf]  ;;  %v5374_v54 = vld [vmem:[%s6956_s30 + $0x518] sm:$0xf0] }
 0x26d   : > { %3534 = vmatpush.bf16.msra.mxu1 %v5629_v3  ;;  %v6181_v3 = vld [vmem:[%s6956_s30 + $0x56c] sm:$0xf]  ;;  %v5742_v55 = vld [vmem:[%s6956_s30 + $0x7f8] sm:$0xf0]  ;;  %v5377_v62 = vor.u32 %v6169_v52, %v5374_v54 }
 0x26e   : > { %3560 = vmatpush.bf16.msra.mxu3 %v4865_v8  ;;  %3520 = vmatpush.bf16.msra.mxu0 %v5517_v11  ;;  %v6089_v8 = vld [vmem:[%s6956_s30 + $0x28c] sm:$0xf]  ;;  %v5310_v11 = vld [vmem:[%s6956_s30 + $0x498] sm:$0xf0] }
 0x26f   : > { %3546 = vmatpush.bf16.msra.mxu2 %v4753_v19  ;;  %v6177_v19 = vld [vmem:[%s6956_s30 + $0x54c] sm:$0xf]  ;;  %v5313_v21 = vor.u32 %v6153_v10, %v5310_v11  ;;  %v5006_v56 = vld [vmem:[%s6956_s30 + $0x238] sm:$0xf0] }
 0x270   : > { %3535 = vmatmul.bf16.vlgmr.msra.gmra.mxu1 %v7515_v57  ;;  %v5409_v32 = vor.u32 %v6177_v19, %v5406_v20  ;;  %v6137_v10 = vld [vmem:[%s6956_s30 + $0x40c] sm:$0xf]  ;;  %v5246_v11 = vld [vmem:[%s6956_s30 + $0x418] sm:$0xf0] }
 0x271   : > { %3579 = vmatpush.bf16.msrb.mxu1 %v5233_v9  ;;  %3561 = vmatmul.bf16.vlgmr.msra.gmra.mxu3 %v7387_v31  ;;  %v5089_v31 = vor.u32 %v6097_v46, %v5086_v47  ;;  %v5054_v9 = vld [vmem:[%s6956_s30 + $0x298] sm:$0xf0]  ;;  %v5393_v47 = vor.u32 %v6173_v36, %v5390_v37  ;;  %v6253_v20 = vld [vmem:[%s6956_s30 + $0x7ac] sm:$0xf]  ;;  %v6277_v37 = vld [vmem:[%s6965_s21 + $0x68] sm:$0xff] }
 0x272   : > { %3605 = vmatpush.bf16.msrb.mxu3 %v5489_v12  ;;  %3521 = vmatpush.bf16.msra.mxu0 %v5501_v34  ;;  %v5425_v12 = vor.u32 %v6181_v3, %v5422_v6  ;;  %v5057_v17 = vor.u32 %v6089_v8, %v5054_v9  ;;  %v5134_v34 = vld [vmem:[%s6956_s30 + $0x338] sm:$0xf0]  ;;  %v6279_v6 = vld [vmem:[%s6965_s21 + $0x78] sm:$0xff]  ;;  %v6073_v9 = vld [vmem:[%s6956_s30 + $0x20c] sm:$0xf] }
 0x273   : > { %3547 = vmatpush.bf16.msra.mxu2 %v4737_v38  ;;  %v5278_v46 = vld [vmem:[%s6956_s30 + $0x458] sm:$0xf0]  ;;  %v6221_v42 = vld [vmem:[%s6956_s30 + $0x6ac] sm:$0xf] }
 0x274   : > { %v7772_v15 = vpop.f32.mrf.mxu3  ;;  %v5281_v23 = vor.u32 %v6145_v44, %v5278_v46  ;;  %v5726_v3 = vld [vmem:[%s6956_s30 + $0x7d8] sm:$0xf0] }
 0x275   : > { %3580 = vmatpush.bf16.msrb.mxu1 %v5217_v30  ;;  %3522 = vmatmul.bf16.vlgmr.msra.gmra.mxu0 %v7531_v16  ;;  %v5294_v30 = vld [vmem:[%s6956_s30 + $0x478] sm:$0xf0] }
 0x276   : > { %3606 = vmatpush.bf16.msrb.mxu3 %v5473_v35  ;;  %3566 = vmatpush.bf16.msrb.mxu0 %v5105_v39  ;;  %v5041_v35 = vor.u32 %v6085_v22, %v5038_v25  ;;  %v5297_v39 = vor.u32 %v6149_v29, %v5294_v30  ;;  %v6278_v22 = vld [vmem:[%s6965_s21 + $0x70] sm:$0xff]  ;;  %v6271_v30 = vld [vmem:[%s6965_s21 + $0x38] sm:$0xff] }
 0x277   : > { %3592 = vmatpush.bf16.msrb.mxu2 %v5361_v43  ;;  %v7784_v38 = vpop.f32.mrf.mxu2  ;;  %v5137_v43 = vor.u32 %v6109_v33, %v5134_v34  ;;  %v5598_v33 = vld [vmem:[%s6956_s30 + $0x6d8] sm:$0xf0] }
 0x278   : > { %3548 = vmatmul.bf16.vlgmr.msra.gmra.mxu2 %v7399_v49  ;;  %v5169_v49 = vor.u32 %v6117_v0, %v5166_v1  ;;  %v7801_v0 = vld [vmem:[%s6958_s2] sm:$0xf]  ;;  %v5694_v36 = vld [vmem:[%s6956_s30 + $0x798] sm:$0xf0] }
 0x279   : > { %3581 = vmatpush.bf16.msrb.mxu1 %v5201_v50  ;;  %v6105_v50 = vld [vmem:[%s6956_s30 + $0x30c] sm:$0xf]  ;;  %v1940_v25 = vperm.slane %v7801_v0, 0  ;;  %v6270_v40 = vld [vmem:[%s6965_s21 + $0x30] sm:$0xff] }
 0x27a   : > { %3607 = vmatpush.bf16.msrb.mxu3 %v5457_v53  ;;  %3567 = vmatpush.bf16.msrb.mxu0 %v5089_v31  ;;  %v6261_v31 = vld [vmem:[%s6956_s30 + $0x7ec] sm:$0xf]  ;;  %v5121_v58 = vor.u32 %v6105_v50, %v5118_v51  ;;  %v5678_v50 = vld [vmem:[%s6956_s30 + $0x778] sm:$0xf0] }
 0x27b   : > { %3593 = vmatpush.bf16.msrb.mxu2 %v5345_v24  ;;  %v6077_v24 = vld [vmem:[%s6956_s30 + $0x22c] sm:$0xf]  ;;  %v5566_v54 = vld [vmem:[%s6956_s30 + $0x698] sm:$0xf0] }
 0x27c   : > { %v3304_v53 = vpop.f32.mrf.mxu3  ;;  %v5009_v1 = vor.u32 %v6077_v24, %v5006_v56  ;;  %v6276_v51 = vld [vmem:[%s6965_s21 + $0x60] sm:$0xff]  ;;  %v6275_v24 = vld [vmem:[%s6965_s21 + $0x58] sm:$0xff] }
 0x27d   : > { %3582 = vmatpush.bf16.msrb.mxu1 %v5185_v60  ;;  %v6141_v60 = vld [vmem:[%s6956_s30 + $0x42c] sm:$0xf] }
 0x27e   : > { %3608 = vmatpush.bf16.msrb.mxu3 %v5441_v63  ;;  %3568 = vmatpush.bf16.msrb.mxu0 %v5073_v2  ;;  %v5745_v63 = vor.u32 %v6261_v31, %v5742_v55  ;;  %v6257_v2 = vld [vmem:[%s6956_s30 + $0x7cc] sm:$0xf]  ;;  %v5265_v8 = vor.u32 %v6141_v60, %v5262_v61 }
 0x27f   : > { %3594 = vmatpush.bf16.msrb.mxu2 %v5329_v7  ;;  %v3291_v7 = vpop.f32.mrf.mxu2  ;;  %v5729_v14 = vor.u32 %v6257_v2, %v5726_v3  ;;  %v6241_v55 = vld [vmem:[%s6956_s30 + $0x74c] sm:$0xf] }
 0x280   : > { %v6268_v60 = vld [vmem:[%s6965_s21 + $0x20] sm:$0xff]  ;;  %v6274_v7 = vld [vmem:[%s6965_s21 + $0x50] sm:$0xff] }
 0x281   : > { %3583 = vmatpush.bf16.msrb.mxu1 %v5169_v49  ;;  %v4990_v49 = vld [vmem:[%s6956_s30 + $0x218] sm:$0xf0]  ;;  %v6213_v61 = vld [vmem:[%s6956_s30 + $0x66c] sm:$0xf] }
 0x282   : > { %3609 = vmatpush.bf16.msrb.mxu3 %v5425_v12  ;;  %3569 = vmatpush.bf16.msrb.mxu0 %v5057_v17  ;;  %v6229_v12 = vld [vmem:[%s6956_s30 + $0x6ec] sm:$0xf]  ;;  %v4993_v19 = vor.u32 %v6073_v9, %v4990_v49  ;;  %v6267_v49 = vld [vmem:[%s6965_s21 + $0x18] sm:$0xff] }
 0x283   : > { %3595 = vmatpush.bf16.msrb.mxu2 %v5313_v21  ;;  %v5710_v21 = vld [vmem:[%s6956_s30 + $0x7b8] sm:$0xf0]  ;;  %v5617_v29 = vor.u32 %v6229_v12, %v5614_v13  ;;  %v6237_v3 = vld [vmem:[%s6956_s30 + $0x72c] sm:$0xf] }
 0x284   : > { %v7812_v17 = vpop.f32.mrf.mxu3  ;;  %v5713_v34 = vor.u32 %v6253_v20, %v5710_v21  ;;  %v6233_v12 = vld [vmem:[%s6956_s30 + $0x70c] sm:$0xf]  ;;  %v5630_v13 = vld [vmem:[%s6956_s30 + $0x718] sm:$0xf0]  ;;  %v1941_v21 = vperm.slane %v7801_v0, 1 }
 0x285   : > { %3584 = vmatpush.bf16.msrb.mxu1 %v5153_v28  ;;  %v5249_v28 = vor.u32 %v6137_v10, %v5246_v11  ;;  %v5534_v10 = vld [vmem:[%s6956_s30 + $0x658] sm:$0xf0] }
 0x286   : > { %3610 = vmatpush.bf16.msrb.mxu3 %v5409_v32  ;;  %3570 = vmatpush.bf16.msrb.mxu0 %v5041_v35  ;;  %v6225_v32 = vld [vmem:[%s6956_s30 + $0x6cc] sm:$0xf] }
 0x287   : > { %3596 = vmatpush.bf16.msrb.mxu2 %v5297_v39  ;;  %v6249_v35 = vld [vmem:[%s6956_s30 + $0x78c] sm:$0xf]  ;;  %v5601_v39 = vor.u32 %v6225_v32, %v5598_v33  ;;  %v5633_v33 = vor.u32 %v6233_v12, %v5630_v13 }
 0x289   : > { %3585 = vmatpush.bf16.msrb.mxu1 %v5137_v43  ;;  %v5582_v43 = vld [vmem:[%s6956_s30 + $0x6b8] sm:$0xf0] }
 0x28a   : > { %3611 = vmatpush.bf16.msrb.mxu3 %v5393_v47  ;;  %3571 = vmatpush.bf16.msrb.mxu0 %v5025_v59  ;;  %v6245_v47 = vld [vmem:[%s6956_s30 + $0x76c] sm:$0xf]  ;;  %v5585_v53 = vor.u32 %v6221_v42, %v5582_v43 }
 0x28b   : > { %3597 = vmatpush.bf16.msrb.mxu2 %v5281_v23  ;;  %v6217_v59 = vld [vmem:[%s6956_s30 + $0x68c] sm:$0xf]  ;;  %v5681_v31 = vor.u32 %v6245_v47, %v5678_v50  ;;  %v5662_v23 = vld [vmem:[%s6956_s30 + $0x758] sm:$0xf0] }
 0x28c   : > { %v3356_v46 = vpop.f32.mrf.mxu3 }
 0x28d   : > { %3586 = vmatpush.bf16.msrb.mxu1 %v5121_v58  ;;  %v7833_v44 = vpop.f32.mrf.mxu1  ;;  %v5569_v58 = vor.u32 %v6217_v59, %v5566_v54  ;;  %v6264_v46 = vld [vmem:[%s6965_s21] sm:$0xff] }
 0x28e   : > { %3612 = vmatpush.bf16.msrb.mxu3 %v5377_v62  ;;  %3572 = vmatpush.bf16.msrb.mxu0 %v5009_v1  ;;  %v5550_v62 = vld [vmem:[%s6956_s30 + $0x678] sm:$0xf0]  ;;  %v5665_v1 = vor.u32 %v6241_v55, %v5662_v23  ;;  %v6287_v55 = vld [vmem:[%s6965_s21 + $0xb8] sm:$0xff] }
 0x28f   : > { %3598 = vmatpush.bf16.msrb.mxu2 %v5265_v8  ;;  %v5553_v9 = vor.u32 %v6213_v61, %v5550_v62  ;;  %v6285_v61 = vld [vmem:[%s6965_s21 + $0xa8] sm:$0xff]  ;;  %v6284_v62 = vld [vmem:[%s6965_s21 + $0xa0] sm:$0xff] }
 0x290   : > { %3587 = vmatmul.bf16.vlgmr.msrb.gmra.mxu1 %v7418_v18  ;;  %v3238_v18 = vadd.f32 %v7698_v27, %v1940_v25  ;;  %v5697_v27 = vor.u32 %v6249_v35, %v5694_v36  ;;  %v6205_v25 = vld [vmem:[%s6956_s30 + $0x62c] sm:$0xf] }
 0x291   : > { %3631 = vmatpush.bf16.msra.mxu1 %v5745_v63  ;;  %3613 = vmatmul.bf16.vlgmr.msrb.gmra.mxu3 %v7458_v26  ;;  %v7827_v26 = vpop.f32.mrf.mxu2 }
 0x292   : > { %3925 = vmatpush.bf16.msra.mxu3 %v6279_v6  ;;  %3573 = vmatpush.bf16.msrb.mxu0 %v4993_v19  ;;  %v3251_v52 = vadd.f32 %v7686_v5, %v3238_v18  ;;  %v3315_v5 = vpop.f32.mrf.mxu0  ;;  %v5646_v6 = vld [vmem:[%s6956_s30 + $0x738] sm:$0xf0]  ;;  %v3342_v36 = vadd.f32 %v7827_v26, %v1941_v21  ;;  %v6201_v18 = vld [vmem:[%s6956_s30 + $0x60c] sm:$0xf] }
 0x293   : > { %3599 = vmatpush.bf16.msrb.mxu2 %v5249_v28  ;;  %v5649_v11 = vor.u32 %v6237_v3, %v5646_v6  ;;  %v5518_v28 = vld [vmem:[%s6956_s30 + $0x638] sm:$0xf0]  ;;  %v6281_v3 = vld [vmem:[%s6965_s21 + $0x88] sm:$0xff] }
 0x294   : > { %v7851_v2 = vpop.f32.mrf.mxu3  ;;  %v5521_v35 = vor.u32 %v6205_v25, %v5518_v28 }
 0x295   : > { %3632 = vmatpush.bf16.msra.mxu1 %v5729_v14  ;;  %3574 = vmatmul.bf16.vlgmr.msrb.gmra.mxu0 %v7432_v41  ;;  %v6269_v41 = vld [vmem:[%s6965_s21 + $0x28] sm:$0xff]  ;;  %v3330_v63 = vpop.f32.mrf.mxu1 }
 0x296   : > { %3926 = vmatpush.bf16.msra.mxu3 %v6278_v22  ;;  %3618 = vmatpush.bf16.msra.mxu0 %v5617_v29  ;;  %v6273_v14 = vld [vmem:[%s6965_s21 + $0x48] sm:$0xff]  ;;  %v6266_v22 = vld [vmem:[%s6965_s21 + $0x10] sm:$0xff]  ;;  %v6283_v63 = vld [vmem:[%s6965_s21 + $0x98] sm:$0xff] }
 0x297   : > { %3912 = vmatpush.bf16.msra.mxu2 %v6271_v30 }
 0x298   : > { %3600 = vmatmul.bf16.vlgmr.msrb.gmra.mxu2 %v7472_v48  ;;  %v3264_v48 = vadd.f32 %v7726_v4, %v3251_v52 }
 0x299   : > { %3633 = vmatpush.bf16.msra.mxu1 %v5713_v34  ;;  %v3343_v56 = vpop.f32.mrf.mxu2 }
 0x29a   : > { %3927 = vmatpush.bf16.msra.mxu3 %v6277_v37  ;;  %3619 = vmatpush.bf16.msra.mxu0 %v5601_v39  ;;  %v3277_v4 = vadd.f32 %v7710_v45, %v3264_v48  ;;  %v6209_v45 = vld [vmem:[%s6956_s30 + $0x64c] sm:$0xf]  ;;  %v6265_v37 = vld [vmem:[%s6965_s21 + $0x8] sm:$0xff]  ;;  %v5502_v39 = vld [vmem:[%s6956_s30 + $0x618] sm:$0xf0] }
 0x29b   : > { %3913 = vmatpush.bf16.msra.mxu2 %v6270_v40  ;;  %v5537_v20 = vor.u32 %v6209_v45, %v5534_v10  ;;  %v5505_v43 = vor.u32 %v6201_v18, %v5502_v39  ;;  %v1942_v45 = vperm.slane %v7801_v0, 2  ;;  %v6293_v39 = vld [vmem:[%s6965_s21 + $0xe8] sm:$0xff] }
 0x29c   : > { %v3290_v8 = vadd.f32 %v7784_v38, %v3277_v4  ;;  %v3317_v38 = vpop.f32.mrf.mxu0  ;;  %v3408_v34 = vpop.f32.mrf.mxu3 }
 0x29d   : > { %3634 = vmatpush.bf16.msra.mxu1 %v5697_v27  ;;  %v3380_v30 = vpop.f32.mrf.mxu1  ;;  %v3355_v27 = vadd.f32 %v7812_v17, %v3342_v36 }
 0x29e   : > { %3928 = vmatpush.bf16.msra.mxu3 %v6276_v51  ;;  %3620 = vmatpush.bf16.msra.mxu0 %v5585_v53  ;;  %v3303_v19 = vadd.f32 %v7772_v15, %v3290_v8  ;;  %v6272_v15 = vld [vmem:[%s6965_s21 + $0x40] sm:$0xff] }
 0x29f   : > { %3914 = vmatpush.bf16.msra.mxu2 %v6269_v41  ;;  %v6280_v8 = vld [vmem:[%s6965_s21 + $0x80] sm:$0xff] }
 0x2a0   : > { %v3316_v29 = vadd.f32 %v3315_v5, %v3303_v19  ;;  %v6286_v5 = vld [vmem:[%s6965_s21 + $0xb0] sm:$0xff] }
 0x2a1   : > { %3635 = vmatpush.bf16.msra.mxu1 %v5681_v31  ;;  %v3393_v32 = vpop.f32.mrf.mxu2 }
 0x2a2   : > { %3929 = vmatpush.bf16.msra.mxu3 %v6275_v24  ;;  %3621 = vmatpush.bf16.msra.mxu0 %v5569_v58  ;;  %v3329_v40 = vadd.f32 %v7833_v44, %v3316_v29 }
 0x2a3   : > { %3915 = vmatpush.bf16.msra.mxu2 %v6268_v60 }
 0x2a4   : > { %v3367_v42 = vpop.f32.mrf.mxu0  ;;  %v3644_v47 = vmax.f32 %v3329_v40, 0.0  ;;  %v6292_v40 = vld [vmem:[%s6965_s21 + $0xe0] sm:$0xff] }
 0x2a5   : > { %3636 = vmatpush.bf16.msra.mxu1 %v5665_v1  ;;  %v3382_v50 = vpop.f32.mrf.mxu1  ;;  %v3368_v51 = vadd.f32 %v3367_v42, %v3355_v27  ;;  %v6282_v1 = vld [vmem:[%s6965_s21 + $0x90] sm:$0xff] }
 0x2a6   : > { %3930 = vmatpush.bf16.msra.mxu3 %v6274_v7  ;;  %3622 = vmatpush.bf16.msra.mxu0 %v5553_v9  ;;  %v3648_v52 = vpack.c.bf16 %v3644_v47, %v3644_v47  ;;  %v6290_v27 = vld [vmem:[%s6965_s21 + $0xd0] sm:$0xff]  ;;  %v6289_v47 = vld [vmem:[%s6965_s21 + $0xc8] sm:$0xff] }
 0x2a7   : > { %3916 = vmatpush.bf16.msra.mxu2 %v6267_v49  ;;  %v3381_v44 = vadd.f32 %v3380_v30, %v3368_v51  ;;  %v6288_v51 = vld [vmem:[%s6965_s21 + $0xc0] sm:$0xff] }
 0x2a9   : > { %3637 = vmatpush.bf16.msra.mxu1 %v5649_v11  ;;  %v3395_v26 = vpop.f32.mrf.mxu2  ;;  %v3394_v17 = vadd.f32 %v3393_v32, %v3381_v44  ;;  %v6295_v32 = vld [vmem:[%s6965_s21 + $0xf8] sm:$0xff] }
 0x2aa   : > { %3931 = vmatpush.bf16.msra.mxu3 %v6273_v14  ;;  %3623 = vmatpush.bf16.msra.mxu0 %v5537_v20 }
 0x2ab   : > { %3917 = vmatpush.bf16.msra.mxu2 %v6266_v22 }
 0x2ac   : > { %v3369_v53 = vpop.f32.mrf.mxu0 }
 0x2ad   : > { %3638 = vmatpush.bf16.msra.mxu1 %v5633_v33  ;;  %v3432_v41 = vpop.f32.mrf.mxu1  ;;  %v1943_v53 = vperm.slane %v7801_v0, 3 }
 0x2ae   : > { %3932 = vmatpush.bf16.msra.mxu3 %v6272_v15  ;;  %3624 = vmatpush.bf16.msra.mxu0 %v5521_v35  ;;  %v6294_v15 = vld [vmem:[%s6965_s21 + $0xf0] sm:$0xff] }
 0x2af   : > { %3918 = vmatpush.bf16.msra.mxu2 %v6265_v37 }
 0x2b0   : > { %3639 = vmatmul.bf16.vlgmr.msra.gmra.mxu1 %v7515_v57  ;;  %v3407_v57 = vadd.f32 %v7851_v2, %v3394_v17 }
 0x2b1   : > { %3951 = vmatpush.bf16.msrb.mxu1 %v6295_v32 }
 0x2b2   : > { %3625 = vmatpush.bf16.msra.mxu0 %v5505_v43  ;;  %v6291_v43 = vld [vmem:[%s6965_s21 + $0xd8] sm:$0xff] }
 0x2b3   : > { %3919 = vmatpush.bf16.msra.mxu2 %v6264_v46 }
 0x2b4   : > { %v3419_v59 = vpop.f32.mrf.mxu0  ;;  %v3458_v54 = vpop.f32.mrf.mxu3 }
 0x2b5   : > { %3626 = vmatmul.bf16.vlgmr.msra.gmra.mxu0 %v7531_v16  ;;  %v3420_v48 = vadd.f32 %v3419_v59, %v3407_v57  ;;  %v3434_v31 = vpop.f32.mrf.mxu1  ;;  %3952 = vmatpush.bf16.msrb.mxu1 %v6294_v15 }
 0x2b6   : > { %3920 = vmatmul.bf16.vlgmr.msra.gmra.mxu2 %v3648_v52  ;;  %3938 = vmatpush.bf16.msrb.mxu0 %v6287_v55 }
 0x2b7   : > { %v3433_v23 = vadd.f32 %v3432_v41, %v3420_v48 }
 0x2b9   : > { %v3645_v24 = vmax.f32 %v3433_v23, 0.0  ;;  %3953 = vmatpush.bf16.msrb.mxu1 %v6293_v39 }
 0x2ba   : > { %3939 = vmatpush.bf16.msrb.mxu0 %v6286_v5 }
 0x2bb   : > { %v3649_v16 = vpack.c.bf16 %v3645_v24, %v3645_v24  ;;  %v3445_v56 = vpop.f32.mrf.mxu2 }
 0x2bc   : > { %v3421_v58 = vpop.f32.mrf.mxu0  ;;  %v3460_v60 = vpop.f32.mrf.mxu3  ;;  %v3446_v12 = vadd.f32 %v3445_v56, %v1942_v45 }
 0x2bd   : > { %3933 = vmatmul.bf16.vlgmr.msra.gmra.mxu3 %v3649_v16  ;;  %3954 = vmatpush.bf16.msrb.mxu1 %v6292_v40 }
 0x2be   : > { %3940 = vmatpush.bf16.msrb.mxu0 %v6285_v61  ;;  %v3459_v14 = vadd.f32 %v3458_v54, %v3446_v12 }
 0x2c1   : > { %3955 = vmatpush.bf16.msrb.mxu1 %v6291_v43 }
 0x2c2   : > { %3941 = vmatpush.bf16.msrb.mxu0 %v6284_v62 }
 0x2c3   : > { %v3447_v4 = vpop.f32.mrf.mxu2 }
 0x2c5   : > { %3956 = vmatpush.bf16.msrb.mxu1 %v6290_v27 }
 0x2c6   : > { %3942 = vmatpush.bf16.msrb.mxu0 %v6283_v63  ;;  %v6376_v63 = vld [vmem:[%s547_s22] ss:$0 sm:$0xff] }
 0x2c9   : > { %3957 = vmatpush.bf16.msrb.mxu1 %v6289_v47 }
 0x2ca   : > { %3943 = vmatpush.bf16.msrb.mxu0 %v6282_v1 }
 0x2cd   : > { %v3484_v2 = vpop.f32.mrf.mxu1  ;;  %3958 = vmatpush.bf16.msrb.mxu1 %v6288_v51 }
 0x2ce   : > { %3944 = vmatpush.bf16.msrb.mxu0 %v6281_v3 }
 0x2d2   : > { %v3471_v6 = vpop.f32.mrf.mxu0  ;;  %3945 = vmatpush.bf16.msrb.mxu0 %v6280_v8 }
 0x2d3   : > { %v3472_v19 = vadd.f32 %v3471_v6, %v3459_v14 }
 0x2d4   : > { %v3510_v7 = vpop.f32.mrf.mxu3 }
 0x2d5   : > { %v3486_v9 = vpop.f32.mrf.mxu1  ;;  %v3485_v38 = vadd.f32 %v3484_v2, %v3472_v19 }
 0x2da   : > { %v3473_v10 = vpop.f32.mrf.mxu0 }
 0x2db   : > { %v3497_v49 = vpop.f32.mrf.mxu2 }
 0x2dc   : > { %v3512_v11 = vpop.f32.mrf.mxu3  ;;  %v3498_v21 = vadd.f32 %v3497_v49, %v3485_v38 }
 0x2de   : > { %v3511_v22 = vadd.f32 %v3510_v7, %v3498_v21 }
 0x2e3   : > { %v3499_v13 = vpop.f32.mrf.mxu2 }
 0x2ed   : > { %v3536_v20 = vpop.f32.mrf.mxu1 }
 0x2f2   : > { %v3523_v25 = vpop.f32.mrf.mxu0 }
 0x2f3   : > { %v3524_v28 = vadd.f32 %v3523_v25, %v3511_v22 }
 0x2f4   : > { %v3562_v29 = vpop.f32.mrf.mxu3 }
 0x2f5   : > { %v3538_v30 = vpop.f32.mrf.mxu1  ;;  %v3537_v33 = vadd.f32 %v3536_v20, %v3524_v28 }
 0x2f7   : > { %v3646_v34 = vmax.f32 %v3537_v33, 0.0 }
 0x2f9   : > { %v3650_v35 = vpack.c.bf16 %v3646_v34, %v3646_v34 }
 0x2fa   : > { %v3525_v37 = vpop.f32.mrf.mxu0 }
 0x2fb   : > { %v3549_v36 = vpop.f32.mrf.mxu2  ;;  %3946 = vmatmul.bf16.vlgmr.msrb.gmra.mxu0 %v3650_v35 }
 0x2fc   : > { %v3564_v18 = vpop.f32.mrf.mxu3  ;;  %v3550_v57 = vadd.f32 %v3549_v36, %v1943_v53 }
 0x2fe   : > { %v3563_v54 = vadd.f32 %v3562_v29, %v3550_v57 }
 0x303   : > { %v3551_v42 = vpop.f32.mrf.mxu2 }
 0x30d   : > { %v3588_v46 = vpop.f32.mrf.mxu1 }
 0x312   : > { %v3575_v50 = vpop.f32.mrf.mxu0 }
 0x313   : > { %v3576_v48 = vadd.f32 %v3575_v50, %v3563_v54 }
 0x314   : > { %v3614_v26 = vpop.f32.mrf.mxu3 }
 0x315   : > { %v3590_v52 = vpop.f32.mrf.mxu1  ;;  %v3589_v31 = vadd.f32 %v3588_v46, %v3576_v48 }
 0x31a   : > { %v3577_v41 = vpop.f32.mrf.mxu0 }
 0x31b   : > { %v3601_v44 = vpop.f32.mrf.mxu2 }
 0x31c   : > { %v3616_v17 = vpop.f32.mrf.mxu3  ;;  %v3602_v23 = vadd.f32 %v3601_v44, %v3589_v31 }
 0x31e   : > { %v3615_v24 = vadd.f32 %v3614_v26, %v3602_v23 }
 0x323   : > { %v3603_v59 = vpop.f32.mrf.mxu2 }
 0x32d   : > { %v3640_v55 = vpop.f32.mrf.mxu1 }
 0x332   : > { %v3627_v5 = vpop.f32.mrf.mxu0 }
 0x333   : > { %v3628_v16 = vadd.f32 %v3627_v5, %v3615_v24 }
 0x335   : > { %v3642_v56 = vpop.f32.mrf.mxu1  ;;  %v3641_v58 = vadd.f32 %v3640_v55, %v3628_v16 }
 0x337   : > { %v3647_v60 = vmax.f32 %v3641_v58, 0.0 }
 0x339   : > { %v3651_v61 = vpack.c.bf16 %v3647_v60, %v3647_v60  ;;  %v3921_v0 = vpop.f32.mrf.mxu2 }
 0x33a   : > { %v3629_v62 = vpop.f32.mrf.mxu0  ;;  %v3922_v1 = vadd.f32 %v6376_v63, %v3921_v0 }
 0x33b   : > { %3959 = vmatmul.bf16.vlgmr.msrb.gmra.mxu1 %v3651_v61 }
 0x340   : > { %v3934_v2 = vpop.f32.mrf.mxu3 }
 0x341   : > { %v3923_v4 = vpop.f32.mrf.mxu2  ;;  %v3935_v3 = vadd.f32 %v3934_v2, %v3922_v1 }
 0x348   : > { %v3936_v6 = vpop.f32.mrf.mxu3 }
 0x378   : > { %v3947_v7 = vpop.f32.mrf.mxu0 }
 0x379   : > { %v3948_v9 = vadd.f32 %v3947_v7, %v3935_v3 }
 0x380   : > { %v3949_v8 = vpop.f32.mrf.mxu0 }
 0x3b8   : > { %v3960_v49 = vpop.f32.mrf.mxu1 }
 0x3b9   : > { %v3961_v45 = vadd.f32 %v3960_v49, %v3948_v9 }
 0x3bb   : > { %3964 = vst [vmem:[%s619_s27] sm:$0xff] %v3961_v45 }
 0x3c0   : > { %v3962_v10 = vpop.f32.mrf.mxu1 }
 0x3c1 PF: > { %s7951_s12 = sld [smem:[#allocation21_spill]]  ;;  %s7954_s30 = smov %s6659_s10 }
 0x3c2   : > { %s7952_s16 = sld [smem:[#allocation20_spill]] }
 0x3c3   : > { %s7953_s11 = sld [smem:[#allocation22_spill]] }
 0x3c7   : > { %p31_p8 = scmp.ge.s32.totalorder %s7951_s12, 5  }
 0x3c8   : > { %s7955_s10 = smov %s7952_s16 }
 0x3c9   :  { %33 = sbr.rel (!%p31_p8) target bundleno = 16 (0x10), region = 181 }
 0x3ce   :  { %3984 = vsyncpa [#allocation3], 1 }
 0x3cf   :  { %3986 = vsyncpa [#allocation3 + $0x1], 1 }
 0x3d0   :  { %3987 = vsyncpa [#allocation5], 1 }
 0x3d1   :  { %3989 = vsyncpa [#allocation5 + $0x1], 1 }
 0x3d2   :  { %3990 = vsyncpa [#allocation8], 1 }
 0x3d3   :  { %3992 = vsyncpa [#allocation8 + $0x1], 1 }
 0x3d4   :  { %3993 = vsyncpa [#allocation11], 1 }
 0x3d5   :  { %3995 = vsyncpa [#allocation11 + $0x1], 1 }
 0x3d6   :  { %3996 = vsyncpa [#allocation14], 1 }
 0x3d7   :  { %3998 = vsyncpa [#allocation14 + $0x1], 1 }

</bundles_post_ra>
